<compile_context>
chip_gen: v7x
topology: tpu7x:2x2x1
jax: 0.10.0
libtpu: 0.0.40
codegen_flags: <defaults>
</compile_context>

<pallas_src>
import functools

import jax
import jax.numpy as jnp
from jax.experimental import pallas as pl
from jax.experimental.pallas import tpu as pltpu

IMG = 32                                  # small stand-in for img_size = 128
FEAT = 32 * (IMG // 4) * (IMG // 4)       # Linear-1 fan-in (same formula as module)
COMPUTE_DTYPE = jnp.bfloat16              # MXU operand dtype; accumulation is f32


# ------------------ fused conv3x3 + bias + ReLU + maxpool2 ------------------

def _conv3x3_relu_pool_kernel(x_main_ref, x_halo_ref, w_ref, b_ref, o_ref,
                              xpool_ref, *, band_h, W, Cin, Cout):
    """One (image, pooled-row band) per grid step.

    x_main_ref: (1, band_h, W+2, Cin)   rows [band_h*b, band_h*(b+1)) of padded input
    x_halo_ref: (1, 2, W+2, Cin)        2-row bottom halo
    w_ref     : (9*Cin, Cout)           folded im2col weights, row = (dy*3+dx)*Cin + c
    b_ref     : (1, Cout)               float32 bias
    o_ref     : (1, band_h//2, W//2, Cout)
    xpool_ref : (band_h//2 * W, Cout)   float32 scratch for the x-pool strided reads
    """
    band_hp = band_h // 2
    WP = W // 2

    # Assemble the (band_h + 2, W + 2, Cin) zero-padded input band.
    xb = jnp.concatenate([x_main_ref[0], x_halo_ref[0]], axis=0)

    # Folded-K im2col: one (band_h*W, 9*Cin) slab, tap order k = dy*3 + dx,
    # channel-minor (matches the (9*Cin, Cout) weight layout).  Per-tap slices
    # are taken on the small band tile only.
    pieces = []
    for dy in range(3):
        for dx in range(3):
            pieces.append(xb[dy:dy + band_h, dx:dx + W, :].reshape(band_h * W, Cin))
    slab = jnp.concatenate(pieces, axis=-1)                      # (band_h*W, 9*Cin)

    # Single MXU pass (K = 27 / 144), f32 accumulation, no RMW accumulator.
    acc = jnp.dot(slab, w_ref[...], preferred_element_type=jnp.float32)

    # 2x2 max pool, stride 2.  y-pool first (leading-dim slab selection, near
    # free), x-pool second (stride-2 sublane reads on the halved tensor).
    # bias + ReLU commute with max, so apply them on the pooled tensor (f32).
    a4 = acc.reshape(band_hp, 2, W, Cout)
    ymax = jnp.maximum(a4[:, 0], a4[:, 1])                       # (band_hp, W, Cout)
    xpool_ref[...] = ymax.reshape(band_hp * W, Cout)
    xmax = jnp.maximum(xpool_ref[pl.ds(0, band_hp * WP, 2), :],
                       xpool_ref[pl.ds(1, band_hp * WP, 2), :])  # (band_hp*WP, Cout)
    pooled = jnp.maximum(xmax + b_ref[...], 0.0)                 # bias + ReLU (f32)
    o_ref[0] = pooled.reshape(band_hp, WP, Cout).astype(o_ref.dtype)


def _pick_band_hp(HP):
    # Largest band (<= 16 pooled rows) dividing HP while keeping >= 2 bands,
    # so the spatial axis can feed both v7x TensorCores even at batch=1.
    for cand in range(min(16, HP // 2), 0, -1):
        if HP % cand == 0:
            return cand
    return HP


def conv3x3_relu_pool(x_pad, w_flat, b, *, band_hp=None):
    """x_pad: (N, H+2, W+2, Cin) zero-padded NHWC input; w_flat: (9*Cin, Cout);
    b: (1, Cout) float32.  Returns (N, H//2, W//2, Cout) in x_pad.dtype."""
    n, hp2, wp2, cin = x_pad.shape
    H, W = hp2 - 2, wp2 - 2
    assert H % 2 == 0 and W % 2 == 0, "maxpool2 needs even spatial dims"
    cout = w_flat.shape[-1]
    HP, WP = H // 2, W // 2
    if band_hp is None:
        band_hp = _pick_band_hp(HP)
    assert HP % band_hp == 0
    band_h = 2 * band_hp
    n_bands = HP // band_hp

    kern = functools.partial(_conv3x3_relu_pool_kernel,
                             band_h=band_h, W=W, Cin=cin, Cout=cout)
    return pl.pallas_call(
        kern,
        out_shape=jax.ShapeDtypeStruct((n, HP, WP, cout), x_pad.dtype),
        grid=(n, n_bands),
        in_specs=[
            # main band: padded rows [band_h*b, band_h*(b+1))
            pl.BlockSpec((1, band_h, wp2, cin), lambda i, b: (i, b, 0, 0)),
            # 2-row bottom halo: padded rows [band_h*(b+1), band_h*(b+1) + 2)
            pl.BlockSpec((1, 2, wp2, cin),
                         lambda i, b: (i, band_hp * (b + 1), 0, 0)),
            pl.BlockSpec((9 * cin, cout), lambda i, b: (0, 0)),
            pl.BlockSpec((1, cout), lambda i, b: (0, 0)),
        ],
        out_specs=pl.BlockSpec((1, band_hp, WP, cout), lambda i, b: (i, b, 0, 0)),
        scratch_shapes=[pltpu.VMEM((band_hp * W, cout), jnp.float32)],
        compiler_params=pltpu.CompilerParams(
            dimension_semantics=("parallel", "parallel"),
            vmem_limit_bytes=48 * 1024 * 1024),
    )(x_pad, x_pad, w_flat, b)


# --------------------- fused Linear -> ReLU -> Linear -----------------------

def _fc_head_kernel(x_ref, w1_ref, b1_ref, w2_ref, b2_ref, o_ref):
    h = jnp.dot(x_ref[...], w1_ref[...], preferred_element_type=jnp.float32)
    h = jnp.maximum(h + b1_ref[...], 0.0)
    y = jnp.dot(h.astype(w2_ref.dtype), w2_ref[...],
                preferred_element_type=jnp.float32)
    o_ref[...] = (y + b2_ref[...]).astype(o_ref.dtype)


def fc_head(x, w1, b1, w2, b2):
    # Tiny GEMMs (M = batch): single invocation, everything resident in VMEM.
    # TODO(synk): tile M with a grid for large batch; prefetch w1 across conv2.
    n, feat = x.shape
    hid, out = w1.shape[-1], w2.shape[-1]
    flops = 2 * n * feat * hid + 2 * n * hid * out
    bytes_accessed = int(x.size * x.dtype.itemsize + w1.size * w1.dtype.itemsize
                         + w2.size * w2.dtype.itemsize + b1.size * 4
                         + b2.size * 4 + n * out * 4)
    vmem = pl.BlockSpec(memory_space=pltpu.MemorySpace.VMEM)
    return pl.pallas_call(
        _fc_head_kernel,
        out_shape=jax.ShapeDtypeStruct((n, out), jnp.float32),
        in_specs=[vmem] * 5,
        out_specs=vmem,
        cost_estimate=pl.CostEstimate(flops=flops, transcendentals=0,
                                      bytes_accessed=bytes_accessed),
        compiler_params=pltpu.CompilerParams(
            vmem_limit_bytes=48 * 1024 * 1024),
    )(x, w1, b1, w2, b2)


# ----------------------------- model wrapper --------------------------------

def init_params(key):
    """PyTorch-layout parameters (Conv2d OIHW, Linear (out,in)), PyTorch init."""
    ks = jax.random.split(key, 8)

    def u(k, shape, fan_in):
        bound = 1.0 / jnp.sqrt(jnp.float32(fan_in))
        return jax.random.uniform(k, shape, jnp.float32, -bound, bound)

    return {
        "conv1.w": u(ks[0], (16, 3, 3, 3), 3 * 9),
        "conv1.b": u(ks[1], (16,), 3 * 9),
        "conv2.w": u(ks[2], (32, 16, 3, 3), 16 * 9),
        "conv2.b": u(ks[3], (32,), 16 * 9),
        "fc1.w": u(ks[4], (64, FEAT), FEAT),
        "fc1.b": u(ks[5], (64,), FEAT),
        "fc2.w": u(ks[6], (2, 64), 64),
        "fc2.b": u(ks[7], (2,), 64),
    }


def prepare_params(p):
    """One-time (outside jit) layout prep: Conv2d OIHW -> folded (9*Cin, Cout)
    im2col weights; Linear (out,in) -> (in,out); fc1 rows reordered from
    PyTorch's (C,H,W) flatten order to the NHWC order produced by the conv
    stack, so no runtime activation transpose is needed before the flatten."""
    hp, wp, c2 = IMG // 4, IMG // 4, 32
    cd = COMPUTE_DTYPE

    def conv_w(w):  # (Cout, Cin, 3, 3) -> (9*Cin, Cout), row = (dy*3+dx)*Cin + c
        cout, cin = w.shape[0], w.shape[1]
        return jnp.transpose(w, (2, 3, 1, 0)).reshape(9 * cin, cout)

    wl1 = jnp.transpose(p["fc1.w"])                               # (FEAT, 64), rows (c,h,w)
    wl1 = wl1.reshape(c2, hp, wp, 64).transpose(1, 2, 0, 3).reshape(FEAT, 64)

    return {
        "w1": conv_w(p["conv1.w"]).astype(cd), "b1": p["conv1.b"].reshape(1, -1),
        "w2": conv_w(p["conv2.w"]).astype(cd), "b2": p["conv2.b"].reshape(1, -1),
        "wl1": wl1.astype(cd),                 "bl1": p["fc1.b"].reshape(1, -1),
        "wl2": jnp.transpose(p["fc2.w"]).astype(cd),
        "bl2": p["fc2.b"].reshape(1, -1),
    }


def fire_cnn_forward(kp, x_nchw):
    n = x_nchw.shape[0]
    x = jnp.transpose(x_nchw, (0, 2, 3, 1)).astype(COMPUTE_DTYPE)   # NCHW -> NHWC
    x = jnp.pad(x, ((0, 0), (1, 1), (1, 1), (0, 0)))                # pad for conv1
    x = conv3x3_relu_pool(x, kp["w1"], kp["b1"])                    # (N, IMG/2, IMG/2, 16)
    x = jnp.pad(x, ((0, 0), (1, 1), (1, 1), (0, 0)))                # pad for conv2 (tiny)
    x = conv3x3_relu_pool(x, kp["w2"], kp["b2"])                    # (N, IMG/4, IMG/4, 32)
    x = x.reshape(n, FEAT)                                          # NHWC flatten (wl1 pre-permuted)
    return fc_head(x, kp["wl1"], kp["bl1"], kp["wl2"], kp["bl2"])   # (N, 2) float32


# ------------------------- pure-JAX reference (f32) --------------------------

def _reference_forward(p, x):
    def conv(h, w, b):
        y = jax.lax.conv_general_dilated(
            h, w, (1, 1), ((1, 1), (1, 1)),
            dimension_numbers=("NCHW", "OIHW", "NCHW"))
        return y + b[None, :, None, None]

    def pool(h):
        return jax.lax.reduce_window(h, -jnp.inf, jax.lax.max,
                                     (1, 1, 2, 2), (1, 1, 2, 2), "VALID")

    h = pool(jnp.maximum(conv(x, p["conv1.w"], p["conv1.b"]), 0.0))
    h = pool(jnp.maximum(conv(h, p["conv2.w"], p["conv2.b"]), 0.0))
    h = h.reshape(x.shape[0], -1)
    h = jnp.maximum(h @ p["fc1.w"].T + p["fc1.b"], 0.0)
    return h @ p["fc2.w"].T + p["fc2.b"]


if __name__ == "__main__":
    key = jax.random.PRNGKey(0)
    k_x, k_p = jax.random.split(key)
    x = jax.random.normal(k_x, (2, 3, IMG, IMG), jnp.float32)       # NCHW like PyTorch
    raw = init_params(k_p)
    params = prepare_params(raw)

    out = jax.block_until_ready(jax.jit(fire_cnn_forward)(params, x))
    assert out.shape == (2, 2) and out.dtype == jnp.float32
    assert bool(jnp.all(jnp.isfinite(out)))

    ref = _reference_forward(raw, x)                                # float32 reference
    err = float(jnp.max(jnp.abs(out - ref)))
    scale = float(jnp.max(jnp.abs(ref)))
    assert err <= 5e-2 * max(scale, 1.0), (err, scale)              # loose bf16 tolerance
    print("KERNEL_OK")
</pallas_src>

<mosaic_0001>
module attributes {stable_mosaic.version = 11 : i64} {
  func.func @_conv3x3_relu_pool_kernel(%arg0: i32, %arg1: i32, %arg2: memref<1x16x34x3xbf16, #tpu.memory_space<vmem>>, %arg3: memref<1x2x34x3xbf16, #tpu.memory_space<vmem>>, %arg4: memref<27x16xbf16, #tpu.memory_space<vmem>>, %arg5: memref<1x16xf32, #tpu.memory_space<vmem>>, %arg6: memref<1x8x16x16xbf16, #tpu.memory_space<vmem>>, %arg7: memref<256x16xf32, #tpu.memory_space<vmem>>) attributes {dimension_semantics = [#tpu.dimension_semantics<parallel>, #tpu.dimension_semantics<parallel>], iteration_bounds = array<i64: 2, 2>, scalar_prefetch = 0 : i64, scratch_operands = 1 : i64, tpu.core_type = #tpu.core_type<tc>, window_params = [{transform_indices = @transform_0, window_bounds = array<i64: 1, 16, 34, 3>}, {transform_indices = @transform_1, window_bounds = array<i64: 1, 2, 34, 3>}, {pipeline_mode = #tpu.pipeline_mode<synchronous>, transform_indices = @transform_2, window_bounds = array<i64: 27, 16>}, {pipeline_mode = #tpu.pipeline_mode<synchronous>, transform_indices = @transform_3, window_bounds = array<i64: 1, 16>}, {transform_indices = @transform_4, window_bounds = array<i64: 1, 8, 16, 16>}]} {
    %c0 = arith.constant 0 : index
    %c0_0 = arith.constant 0 : index
    %c0_1 = arith.constant 0 : index
    %c0_2 = arith.constant 0 : index
    %0 = vector.load %arg2[%c0, %c0_0, %c0_1, %c0_2] : memref<1x16x34x3xbf16, #tpu.memory_space<vmem>>, vector<1x16x34x3xbf16>
    %1 = vector.shape_cast %0 : vector<1x16x34x3xbf16> to vector<16x34x3xbf16>
    %c0_3 = arith.constant 0 : index
    %c0_4 = arith.constant 0 : index
    %c0_5 = arith.constant 0 : index
    %c0_6 = arith.constant 0 : index
    %2 = vector.load %arg3[%c0_3, %c0_4, %c0_5, %c0_6] : memref<1x2x34x3xbf16, #tpu.memory_space<vmem>>, vector<1x2x34x3xbf16>
    %3 = vector.shape_cast %2 : vector<1x2x34x3xbf16> to vector<2x34x3xbf16>
    %4 = tpu.concatenate %1, %3 in 0 : vector<16x34x3xbf16>, vector<2x34x3xbf16> -> vector<18x34x3xbf16>
    %5 = vector.extract_strided_slice %4 {offsets = [0, 0, 0], sizes = [16, 32, 3], strides = [1, 1, 1]} : vector<18x34x3xbf16> to vector<16x32x3xbf16>
    %6 = vector.shape_cast %5 : vector<16x32x3xbf16> to vector<512x3xbf16>
    %7 = vector.extract_strided_slice %4 {offsets = [0, 1, 0], sizes = [16, 32, 3], strides = [1, 1, 1]} : vector<18x34x3xbf16> to vector<16x32x3xbf16>
    %8 = vector.shape_cast %7 : vector<16x32x3xbf16> to vector<512x3xbf16>
    %9 = vector.extract_strided_slice %4 {offsets = [0, 2, 0], sizes = [16, 32, 3], strides = [1, 1, 1]} : vector<18x34x3xbf16> to vector<16x32x3xbf16>
    %10 = vector.shape_cast %9 : vector<16x32x3xbf16> to vector<512x3xbf16>
    %11 = vector.extract_strided_slice %4 {offsets = [1, 0, 0], sizes = [16, 32, 3], strides = [1, 1, 1]} : vector<18x34x3xbf16> to vector<16x32x3xbf16>
    %12 = vector.shape_cast %11 : vector<16x32x3xbf16> to vector<512x3xbf16>
    %13 = vector.extract_strided_slice %4 {offsets = [1, 1, 0], sizes = [16, 32, 3], strides = [1, 1, 1]} : vector<18x34x3xbf16> to vector<16x32x3xbf16>
    %14 = vector.shape_cast %13 : vector<16x32x3xbf16> to vector<512x3xbf16>
    %15 = vector.extract_strided_slice %4 {offsets = [1, 2, 0], sizes = [16, 32, 3], strides = [1, 1, 1]} : vector<18x34x3xbf16> to vector<16x32x3xbf16>
    %16 = vector.shape_cast %15 : vector<16x32x3xbf16> to vector<512x3xbf16>
    %17 = vector.extract_strided_slice %4 {offsets = [2, 0, 0], sizes = [16, 32, 3], strides = [1, 1, 1]} : vector<18x34x3xbf16> to vector<16x32x3xbf16>
    %18 = vector.shape_cast %17 : vector<16x32x3xbf16> to vector<512x3xbf16>
    %19 = vector.extract_strided_slice %4 {offsets = [2, 1, 0], sizes = [16, 32, 3], strides = [1, 1, 1]} : vector<18x34x3xbf16> to vector<16x32x3xbf16>
    %20 = vector.shape_cast %19 : vector<16x32x3xbf16> to vector<512x3xbf16>
    %21 = vector.extract_strided_slice %4 {offsets = [2, 2, 0], sizes = [16, 32, 3], strides = [1, 1, 1]} : vector<18x34x3xbf16> to vector<16x32x3xbf16>
    %22 = vector.shape_cast %21 : vector<16x32x3xbf16> to vector<512x3xbf16>
    %23 = tpu.concatenate %6, %8, %10, %12, %14, %16, %18, %20, %22 in 1 : vector<512x3xbf16>, vector<512x3xbf16>, vector<512x3xbf16>, vector<512x3xbf16>, vector<512x3xbf16>, vector<512x3xbf16>, vector<512x3xbf16>, vector<512x3xbf16>, vector<512x3xbf16> -> vector<512x27xbf16>
    %c0_7 = arith.constant 0 : index
    %c0_8 = arith.constant 0 : index
    %24 = vector.load %arg4[%c0_7, %c0_8] : memref<27x16xbf16, #tpu.memory_space<vmem>>, vector<27x16xbf16>
    %cst = arith.constant dense<0.000000e+00> : vector<512x16xf32>
    %25 = tpu.matmul %23, %24, %cst {dimension_numbers = #tpu.dot_dimension_numbers<[1], [0], [0], [1], [0, 0, 1, 1], [], []>} : vector<512x27xbf16>, vector<27x16xbf16>, vector<512x16xf32> -> vector<512x16xf32>
    %26 = vector.shape_cast %25 : vector<512x16xf32> to vector<8x2x32x16xf32>
    %27 = vector.extract_strided_slice %26 {offsets = [0, 0, 0, 0], sizes = [8, 1, 32, 16], strides = [1, 1, 1, 1]} : vector<8x2x32x16xf32> to vector<8x1x32x16xf32>
    %28 = vector.shape_cast %27 : vector<8x1x32x16xf32> to vector<8x32x16xf32>
    %29 = vector.extract_strided_slice %26 {offsets = [0, 1, 0, 0], sizes = [8, 1, 32, 16], strides = [1, 1, 1, 1]} : vector<8x2x32x16xf32> to vector<8x1x32x16xf32>
    %30 = vector.shape_cast %29 : vector<8x1x32x16xf32> to vector<8x32x16xf32>
    %31 = arith.maximumf %28, %30 : vector<8x32x16xf32>
    %32 = vector.shape_cast %31 : vector<8x32x16xf32> to vector<256x16xf32>
    %c0_9 = arith.constant 0 : index
    %c0_10 = arith.constant 0 : index
    %33 = vector.load %arg7[%c0_9, %c0_10] : memref<256x16xf32, #tpu.memory_space<vmem>>, vector<256x16xf32>
    tpu.vector_store %arg7[%c0_9, %c0_10], %32 {strides = array<i32>} : memref<256x16xf32, #tpu.memory_space<vmem>>, vector<256x16xf32>,
    %c0_11 = arith.constant 0 : index
    %c0_12 = arith.constant 0 : index
    %34 = tpu.strided_load %arg7[%c0_11, %c0_12] {strides = array<i32: 2, 1>} : memref<256x16xf32, #tpu.memory_space<vmem>>, vector<128x16xf32>
    %c1 = arith.constant 1 : index
    %c0_13 = arith.constant 0 : index
    %35 = tpu.strided_load %arg7[%c1, %c0_13] {strides = array<i32: 2, 1>} : memref<256x16xf32, #tpu.memory_space<vmem>>, vector<128x16xf32>
    %36 = arith.maximumf %34, %35 : vector<128x16xf32>
    %c0_14 = arith.constant 0 : index
    %c0_15 = arith.constant 0 : index
    %37 = vector.load %arg5[%c0_14, %c0_15] : memref<1x16xf32, #tpu.memory_space<vmem>>, vector<1x16xf32>
    %38 = vector.broadcast %37 : vector<1x16xf32> to vector<128x16xf32>
    %39 = arith.addf %36, %38 : vector<128x16xf32>
    %cst_16 = arith.constant 0.000000e+00 : f32
    %40 = vector.broadcast %cst_16 : f32 to vector<128x16xf32>
    %41 = arith.maximumf %39, %40 : vector<128x16xf32>
    %42 = vector.shape_cast %41 : vector<128x16xf32> to vector<8x16x16xf32>
    %43 = arith.truncf %42 : vector<8x16x16xf32> to vector<8x16x16xbf16>
    %c0_17 = arith.constant 0 : index
    %c0_18 = arith.constant 0 : index
    %c0_19 = arith.constant 0 : index
    %c0_20 = arith.constant 0 : index
    %44 = vector.load %arg6[%c0_17, %c0_18, %c0_19, %c0_20] : memref<1x8x16x16xbf16, #tpu.memory_space<vmem>>, vector<1x8x16x16xbf16>
    %45 = vector.shape_cast %44 : vector<1x8x16x16xbf16> to vector<8x16x16xbf16>
    %46 = vector.shape_cast %43 : vector<8x16x16xbf16> to vector<1x8x16x16xbf16>
    tpu.vector_store %arg6[%c0_17, %c0_18, %c0_19, %c0_20], %46 {strides = array<i32>} : memref<1x8x16x16xbf16, #tpu.memory_space<vmem>>, vector<1x8x16x16xbf16>,
    return
  }
  func.func @transform_0(%arg0: i32, %arg1: i32) -> (i32, i32, i32, i32) {
    %c0_i32 = arith.constant 0 : i32
    %c0_i32_0 = arith.constant 0 : i32
    %c0_i32_1 = arith.constant 0 : i32
    return %arg0, %arg1, %c0_i32, %c0_i32_0 : i32, i32, i32, i32
  }
  func.func @transform_1(%arg0: i32, %arg1: i32) -> (i32, i32, i32, i32) {
    %c1_i32 = arith.constant 1 : i32
    %0 = arith.addi %arg1, %c1_i32 : i32
    %c8_i32 = arith.constant 8 : i32
    %1 = arith.muli %c8_i32, %0 : i32
    %c0_i32 = arith.constant 0 : i32
    %c0_i32_0 = arith.constant 0 : i32
    %c0_i32_1 = arith.constant 0 : i32
    return %arg0, %1, %c0_i32, %c0_i32_0 : i32, i32, i32, i32
  }
  func.func @transform_2(%arg0: i32, %arg1: i32) -> (i32, i32) {
    %c0_i32 = arith.constant 0 : i32
    %c0_i32_0 = arith.constant 0 : i32
    %c0_i32_1 = arith.constant 0 : i32
    return %c0_i32, %c0_i32_0 : i32, i32
  }
  func.func @transform_3(%arg0: i32, %arg1: i32) -> (i32, i32) {
    %c0_i32 = arith.constant 0 : i32
    %c0_i32_0 = arith.constant 0 : i32
    %c0_i32_1 = arith.constant 0 : i32
    return %c0_i32, %c0_i32_0 : i32, i32
  }
  func.func @transform_4(%arg0: i32, %arg1: i32) -> (i32, i32, i32, i32) {
    %c0_i32 = arith.constant 0 : i32
    %c0_i32_0 = arith.constant 0 : i32
    %c0_i32_1 = arith.constant 0 : i32
    return %arg0, %arg1, %c0_i32, %c0_i32_0 : i32, i32, i32, i32
  }
}

module attributes {stable_mosaic.version = 11 : i64} {
  func.func @_conv3x3_relu_pool_kernel(%arg0: i32, %arg1: i32, %arg2: memref<1x8x18x16xbf16, #tpu.memory_space<vmem>>, %arg3: memref<1x2x18x16xbf16, #tpu.memory_space<vmem>>, %arg4: memref<144x32xbf16, #tpu.memory_space<vmem>>, %arg5: memref<1x32xf32, #tpu.memory_space<vmem>>, %arg6: memref<1x4x8x32xbf16, #tpu.memory_space<vmem>>, %arg7: memref<64x32xf32, #tpu.memory_space<vmem>>) attributes {dimension_semantics = [#tpu.dimension_semantics<parallel>, #tpu.dimension_semantics<parallel>], iteration_bounds = array<i64: 2, 2>, scalar_prefetch = 0 : i64, scratch_operands = 1 : i64, tpu.core_type = #tpu.core_type<tc>, window_params = [{transform_indices = @transform_0, window_bounds = array<i64: 1, 8, 18, 16>}, {transform_indices = @transform_1, window_bounds = array<i64: 1, 2, 18, 16>}, {pipeline_mode = #tpu.pipeline_mode<synchronous>, transform_indices = @transform_2, window_bounds = array<i64: 144, 32>}, {pipeline_mode = #tpu.pipeline_mode<synchronous>, transform_indices = @transform_3, window_bounds = array<i64: 1, 32>}, {transform_indices = @transform_4, window_bounds = array<i64: 1, 4, 8, 32>}]} {
    %c0 = arith.constant 0 : index
    %c0_0 = arith.constant 0 : index
    %c0_1 = arith.constant 0 : index
    %c0_2 = arith.constant 0 : index
    %0 = vector.load %arg2[%c0, %c0_0, %c0_1, %c0_2] : memref<1x8x18x16xbf16, #tpu.memory_space<vmem>>, vector<1x8x18x16xbf16>
    %1 = vector.shape_cast %0 : vector<1x8x18x16xbf16> to vector<8x18x16xbf16>
    %c0_3 = arith.constant 0 : index
    %c0_4 = arith.constant 0 : index
    %c0_5 = arith.constant 0 : index
    %c0_6 = arith.constant 0 : index
    %2 = vector.load %arg3[%c0_3, %c0_4, %c0_5, %c0_6] : memref<1x2x18x16xbf16, #tpu.memory_space<vmem>>, vector<1x2x18x16xbf16>
    %3 = vector.shape_cast %2 : vector<1x2x18x16xbf16> to vector<2x18x16xbf16>
    %4 = tpu.concatenate %1, %3 in 0 : vector<8x18x16xbf16>, vector<2x18x16xbf16> -> vector<10x18x16xbf16>
    %5 = vector.extract_strided_slice %4 {offsets = [0, 0, 0], sizes = [8, 16, 16], strides = [1, 1, 1]} : vector<10x18x16xbf16> to vector<8x16x16xbf16>
    %6 = vector.shape_cast %5 : vector<8x16x16xbf16> to vector<128x16xbf16>
    %7 = vector.extract_strided_slice %4 {offsets = [0, 1, 0], sizes = [8, 16, 16], strides = [1, 1, 1]} : vector<10x18x16xbf16> to vector<8x16x16xbf16>
    %8 = vector.shape_cast %7 : vector<8x16x16xbf16> to vector<128x16xbf16>
    %9 = vector.extract_strided_slice %4 {offsets = [0, 2, 0], sizes = [8, 16, 16], strides = [1, 1, 1]} : vector<10x18x16xbf16> to vector<8x16x16xbf16>
    %10 = vector.shape_cast %9 : vector<8x16x16xbf16> to vector<128x16xbf16>
    %11 = vector.extract_strided_slice %4 {offsets = [1, 0, 0], sizes = [8, 16, 16], strides = [1, 1, 1]} : vector<10x18x16xbf16> to vector<8x16x16xbf16>
    %12 = vector.shape_cast %11 : vector<8x16x16xbf16> to vector<128x16xbf16>
    %13 = vector.extract_strided_slice %4 {offsets = [1, 1, 0], sizes = [8, 16, 16], strides = [1, 1, 1]} : vector<10x18x16xbf16> to vector<8x16x16xbf16>
    %14 = vector.shape_cast %13 : vector<8x16x16xbf16> to vector<128x16xbf16>
    %15 = vector.extract_strided_slice %4 {offsets = [1, 2, 0], sizes = [8, 16, 16], strides = [1, 1, 1]} : vector<10x18x16xbf16> to vector<8x16x16xbf16>
    %16 = vector.shape_cast %15 : vector<8x16x16xbf16> to vector<128x16xbf16>
    %17 = vector.extract_strided_slice %4 {offsets = [2, 0, 0], sizes = [8, 16, 16], strides = [1, 1, 1]} : vector<10x18x16xbf16> to vector<8x16x16xbf16>
    %18 = vector.shape_cast %17 : vector<8x16x16xbf16> to vector<128x16xbf16>
    %19 = vector.extract_strided_slice %4 {offsets = [2, 1, 0], sizes = [8, 16, 16], strides = [1, 1, 1]} : vector<10x18x16xbf16> to vector<8x16x16xbf16>
    %20 = vector.shape_cast %19 : vector<8x16x16xbf16> to vector<128x16xbf16>
    %21 = vector.extract_strided_slice %4 {offsets = [2, 2, 0], sizes = [8, 16, 16], strides = [1, 1, 1]} : vector<10x18x16xbf16> to vector<8x16x16xbf16>
    %22 = vector.shape_cast %21 : vector<8x16x16xbf16> to vector<128x16xbf16>
    %23 = tpu.concatenate %6, %8, %10, %12, %14, %16, %18, %20, %22 in 1 : vector<128x16xbf16>, vector<128x16xbf16>, vector<128x16xbf16>, vector<128x16xbf16>, vector<128x16xbf16>, vector<128x16xbf16>, vector<128x16xbf16>, vector<128x16xbf16>, vector<128x16xbf16> -> vector<128x144xbf16>
    %c0_7 = arith.constant 0 : index
    %c0_8 = arith.constant 0 : index
    %24 = vector.load %arg4[%c0_7, %c0_8] : memref<144x32xbf16, #tpu.memory_space<vmem>>, vector<144x32xbf16>
    %cst = arith.constant dense<0.000000e+00> : vector<128x32xf32>
    %25 = tpu.matmul %23, %24, %cst {dimension_numbers = #tpu.dot_dimension_numbers<[1], [0], [0], [1], [0, 0, 1, 1], [], []>} : vector<128x144xbf16>, vector<144x32xbf16>, vector<128x32xf32> -> vector<128x32xf32>
    %26 = vector.shape_cast %25 : vector<128x32xf32> to vector<4x2x16x32xf32>
    %27 = vector.extract_strided_slice %26 {offsets = [0, 0, 0, 0], sizes = [4, 1, 16, 32], strides = [1, 1, 1, 1]} : vector<4x2x16x32xf32> to vector<4x1x16x32xf32>
    %28 = vector.shape_cast %27 : vector<4x1x16x32xf32> to vector<4x16x32xf32>
    %29 = vector.extract_strided_slice %26 {offsets = [0, 1, 0, 0], sizes = [4, 1, 16, 32], strides = [1, 1, 1, 1]} : vector<4x2x16x32xf32> to vector<4x1x16x32xf32>
    %30 = vector.shape_cast %29 : vector<4x1x16x32xf32> to vector<4x16x32xf32>
    %31 = arith.maximumf %28, %30 : vector<4x16x32xf32>
    %32 = vector.shape_cast %31 : vector<4x16x32xf32> to vector<64x32xf32>
    %c0_9 = arith.constant 0 : index
    %c0_10 = arith.constant 0 : index
    %33 = vector.load %arg7[%c0_9, %c0_10] : memref<64x32xf32, #tpu.memory_space<vmem>>, vector<64x32xf32>
    tpu.vector_store %arg7[%c0_9, %c0_10], %32 {strides = array<i32>} : memref<64x32xf32, #tpu.memory_space<vmem>>, vector<64x32xf32>,
    %c0_11 = arith.constant 0 : index
    %c0_12 = arith.constant 0 : index
    %34 = tpu.strided_load %arg7[%c0_11, %c0_12] {strides = array<i32: 2, 1>} : memref<64x32xf32, #tpu.memory_space<vmem>>, vector<32x32xf32>
    %c1 = arith.constant 1 : index
    %c0_13 = arith.constant 0 : index
    %35 = tpu.strided_load %arg7[%c1, %c0_13] {strides = array<i32: 2, 1>} : memref<64x32xf32, #tpu.memory_space<vmem>>, vector<32x32xf32>
    %36 = arith.maximumf %34, %35 : vector<32x32xf32>
    %c0_14 = arith.constant 0 : index
    %c0_15 = arith.constant 0 : index
    %37 = vector.load %arg5[%c0_14, %c0_15] : memref<1x32xf32, #tpu.memory_space<vmem>>, vector<1x32xf32>
    %38 = vector.broadcast %37 : vector<1x32xf32> to vector<32x32xf32>
    %39 = arith.addf %36, %38 : vector<32x32xf32>
    %cst_16 = arith.constant 0.000000e+00 : f32
    %40 = vector.broadcast %cst_16 : f32 to vector<32x32xf32>
    %41 = arith.maximumf %39, %40 : vector<32x32xf32>
    %42 = vector.shape_cast %41 : vector<32x32xf32> to vector<4x8x32xf32>
    %43 = arith.truncf %42 : vector<4x8x32xf32> to vector<4x8x32xbf16>
    %c0_17 = arith.constant 0 : index
    %c0_18 = arith.constant 0 : index
    %c0_19 = arith.constant 0 : index
    %c0_20 = arith.constant 0 : index
    %44 = vector.load %arg6[%c0_17, %c0_18, %c0_19, %c0_20] : memref<1x4x8x32xbf16, #tpu.memory_space<vmem>>, vector<1x4x8x32xbf16>
    %45 = vector.shape_cast %44 : vector<1x4x8x32xbf16> to vector<4x8x32xbf16>
    %46 = vector.shape_cast %43 : vector<4x8x32xbf16> to vector<1x4x8x32xbf16>
    tpu.vector_store %arg6[%c0_17, %c0_18, %c0_19, %c0_20], %46 {strides = array<i32>} : memref<1x4x8x32xbf16, #tpu.memory_space<vmem>>, vector<1x4x8x32xbf16>,
    return
  }
  func.func @transform_0(%arg0: i32, %arg1: i32) -> (i32, i32, i32, i32) {
    %c0_i32 = arith.constant 0 : i32
    %c0_i32_0 = arith.constant 0 : i32
    %c0_i32_1 = arith.constant 0 : i32
    return %arg0, %arg1, %c0_i32, %c0_i32_0 : i32, i32, i32, i32
  }
  func.func @transform_1(%arg0: i32, %arg1: i32) -> (i32, i32, i32, i32) {
    %c1_i32 = arith.constant 1 : i32
    %0 = arith.addi %arg1, %c1_i32 : i32
    %c4_i32 = arith.constant 4 : i32
    %1 = arith.muli %c4_i32, %0 : i32
    %c0_i32 = arith.constant 0 : i32
    %c0_i32_0 = arith.constant 0 : i32
    %c0_i32_1 = arith.constant 0 : i32
    return %arg0, %1, %c0_i32, %c0_i32_0 : i32, i32, i32, i32
  }
  func.func @transform_2(%arg0: i32, %arg1: i32) -> (i32, i32) {
    %c0_i32 = arith.constant 0 : i32
    %c0_i32_0 = arith.constant 0 : i32
    %c0_i32_1 = arith.constant 0 : i32
    return %c0_i32, %c0_i32_0 : i32, i32
  }
  func.func @transform_3(%arg0: i32, %arg1: i32) -> (i32, i32) {
    %c0_i32 = arith.constant 0 : i32
    %c0_i32_0 = arith.constant 0 : i32
    %c0_i32_1 = arith.constant 0 : i32
    return %c0_i32, %c0_i32_0 : i32, i32
  }
  func.func @transform_4(%arg0: i32, %arg1: i32) -> (i32, i32, i32, i32) {
    %c0_i32 = arith.constant 0 : i32
    %c0_i32_0 = arith.constant 0 : i32
    %c0_i32_1 = arith.constant 0 : i32
    return %arg0, %arg1, %c0_i32, %c0_i32_0 : i32, i32, i32, i32
  }
}

module attributes {stable_mosaic.version = 11 : i64} {
  func.func @_fc_head_kernel(%arg0: memref<2x2048xbf16, #tpu.memory_space<vmem>>, %arg1: memref<2048x64xbf16, #tpu.memory_space<vmem>>, %arg2: memref<1x64xf32, #tpu.memory_space<vmem>>, %arg3: memref<64x2xbf16, #tpu.memory_space<vmem>>, %arg4: memref<1x2xf32, #tpu.memory_space<vmem>>, %arg5: memref<2x2xf32, #tpu.memory_space<vmem>>) attributes {dimension_semantics = [], scalar_prefetch = 0 : i64, scratch_operands = 0 : i64, tpu.core_type = #tpu.core_type<tc>} {
    %c0 = arith.constant 0 : index
    %c0_0 = arith.constant 0 : index
    %0 = vector.load %arg0[%c0, %c0_0] : memref<2x2048xbf16, #tpu.memory_space<vmem>>, vector<2x2048xbf16>
    %c0_1 = arith.constant 0 : index
    %c0_2 = arith.constant 0 : index
    %1 = vector.load %arg1[%c0_1, %c0_2] : memref<2048x64xbf16, #tpu.memory_space<vmem>>, vector<2048x64xbf16>
    %cst = arith.constant dense<0.000000e+00> : vector<2x64xf32>
    %2 = tpu.matmul %0, %1, %cst {dimension_numbers = #tpu.dot_dimension_numbers<[1], [0], [0], [1], [0, 0, 1, 1], [], []>} : vector<2x2048xbf16>, vector<2048x64xbf16>, vector<2x64xf32> -> vector<2x64xf32>
    %c0_3 = arith.constant 0 : index
    %c0_4 = arith.constant 0 : index
    %3 = vector.load %arg2[%c0_3, %c0_4] : memref<1x64xf32, #tpu.memory_space<vmem>>, vector<1x64xf32>
    %4 = vector.broadcast %3 : vector<1x64xf32> to vector<2x64xf32>
    %5 = arith.addf %2, %4 : vector<2x64xf32>
    %cst_5 = arith.constant 0.000000e+00 : f32
    %6 = vector.broadcast %cst_5 : f32 to vector<2x64xf32>
    %7 = arith.maximumf %5, %6 : vector<2x64xf32>
    %8 = arith.truncf %7 : vector<2x64xf32> to vector<2x64xbf16>
    %c0_6 = arith.constant 0 : index
    %c0_7 = arith.constant 0 : index
    %9 = vector.load %arg3[%c0_6, %c0_7] : memref<64x2xbf16, #tpu.memory_space<vmem>>, vector<64x2xbf16>
    %cst_8 = arith.constant dense<0.000000e+00> : vector<2x2xf32>
    %10 = tpu.matmul %8, %9, %cst_8 {dimension_numbers = #tpu.dot_dimension_numbers<[1], [0], [0], [1], [0, 0, 1, 1], [], []>} : vector<2x64xbf16>, vector<64x2xbf16>, vector<2x2xf32> -> vector<2x2xf32>
    %c0_9 = arith.constant 0 : index
    %c0_10 = arith.constant 0 : index
    %11 = vector.load %arg4[%c0_9, %c0_10] : memref<1x2xf32, #tpu.memory_space<vmem>>, vector<1x2xf32>
    %12 = vector.broadcast %11 : vector<1x2xf32> to vector<2x2xf32>
    %13 = arith.addf %10, %12 : vector<2x2xf32>
    %c0_11 = arith.constant 0 : index
    %c0_12 = arith.constant 0 : index
    %14 = vector.load %arg5[%c0_11, %c0_12] : memref<2x2xf32, #tpu.memory_space<vmem>>, vector<2x2xf32>
    tpu.vector_store %arg5[%c0_11, %c0_12], %13 {strides = array<i32>} : memref<2x2xf32, #tpu.memory_space<vmem>>, vector<2x2xf32>,
    return
  }
}

</mosaic_0001>

<bundles_post_ra>
// kernel: fire_cnn_forward.4
= control target key start
LH: loop header
LB: loop body
LE: loop exit
PB: predicated region body
PF: predicated region fallthrough
CT: control target
= control target key end

     0   :  { %s1643_s15 = smov 0   ;;  %s1645_s16 = smov 0   ;;  %s2337_s0 = inlined_call_operand.vmem [shape: bf16[2,18,18,16], index: 0, kind: input, shape index: {}, may-alias: {0,1}]   ;;  %s2338_s1 = inlined_call_operand.vmem [shape: bf16[2,18,18,16], index: 1, kind: input, shape index: {}, may-alias: {0,1}]   ;;  %s2339_s2 = inlined_call_operand.vmem [shape: bf16[144,32], index: 2, kind: input, shape index: {}]   ;;  %s2340_s3 = inlined_call_operand.vmem [shape: f32[1,32], index: 3, kind: input, shape index: {}]   ;;  %s2341_s4 = inlined_call_operand.vmem [shape: bf16[2,8,8,32], index: 4, kind: output, shape index: {}]  }
   0x1   :  { %s1647_s17 = smov 0   ;;  %s1649_s18 = smov 0  }
   0x2   :  { %s1651_s19 = smov 0  }
   0x3 LB: > { %s23_s20 = sadd.s32 1, %s1600_s17  ;;  %s26_s21 = sadd.s32 1, %s1604_s18  ;;  %s1608_s19 = sphi %s1651_s19, %s14_s19   ;;  %s1604_s18 = sphi %s1649_s18, %s2350_s18   ;;  %s1600_s17 = sphi %s1647_s17, %s2349_s17   ;;  %s1596_s16 = sphi %s1645_s16, %s2348_s16   ;;  %s1592_s15 = sphi %s1643_s15, %s2347_s15  }
   0x4   : > { %p24_p0 = scmp.ge.s32.totalorder %s23_s20, 2  ;;  %p1404_p1 = scmp.ge.s32.totalorder %s1608_s19, 1 }
   0x5   : > { %p220_p2 = scmp.lt.s32.totalorder %s1608_s19, 5 }
   0x6   : > { %s2352_s20 = smov (%p24_p0, %s23_s20), 0  ;;  %s2354_s21 = smov (!%p24_p0, %s26_s21), %s1604_s18 }
   0x7   : > { %p221_p3 = pnand %p1404_p1, %p220_p2  ;;  %p28_p4 = scmp.ge.s32.totalorder %s2354_s21, 2 }
   0x8   : > { %s1676_s22 = sshll.u32 (!%p221_p3), %s1592_s15, 3  ;;  %p278_p5 = scmp.lt.s32.totalorder (!%p221_p3), %s1596_s16, 1  ;;  %v1560_v0 = vld [vmem:[%s2339_s2] sm:$0xff] (!%p221_p3)   ;;  %v1610_v1 = vmov (!%p221_p3), 0   ;;  %v1561_v2 = vld [vmem:[%s2339_s2 + $0x8] sm:$0xff] (!%p221_p3)   ;;  %vm568_vm0 = vcmask (!%p221_p3), 1042432  }
   0x9   : > { %s2356_s21 = smov (%p28_p4, %s2354_s21), 0  ;;  %224 = sbr.rel (%p221_p3) target bundleno = 497 (0x1f1), region = 36 }
   0xa   : > { %p280_p6 = scmp.lt.s32.totalorder (!%p221_p3), %s1676_s22, 17  ;;  %1128 = vmatprep.subr.bf16.mxu0 (!%p221_p3), %v1610_v1  ;;  %1482 = vmatprep.subr.bf16.mxu1 (!%p221_p3), %v1610_v1  ;;  %vm569_vm1 = vcmask (!%p221_p3), 1046532   ;;  %v1562_v3 = vld [vmem:[%s2339_s2 + $0x10] sm:$0xff] (!%p221_p3)   ;;  %v1563_v4 = vld [vmem:[%s2339_s2 + $0x18] sm:$0xff] (!%p221_p3)   ;;  %s1481_s13 = sadd.s32 (!%p221_p3), 8, %s1676_s22  ;;  %v1564_v23 = vld [vmem:[%s2339_s2 + $0x20] sm:$0xff] (!%p221_p3)  }
   0xb   : > { %1129 = vmatpush1.bf16.msra.mxu0 (!%p221_p3), %v1560_v0  ;;  %1491 = vmatpush1.bf16.msra.mxu1 (!%p221_p3), %v1560_v0  ;;  %s1611_s14 = smov (!%p221_p3), 48   ;;  %vm349_vm2 = vsmask.f32 (!%p221_p3), 3328  ;;  %vm350_vm3 = vsmask.f32 (!%p221_p3), 7440  ;;  %vm1762_vm4 = vmor (!%p221_p3), %vm568_vm0, %vm569_vm1  ;;  %p1768_p7 = scmp.lt.s32.totalorder (!%p221_p3), %s1481_s13, 17 }
   0xc   : > { %1130 = vmatprep.subr.bf16.mxu0 (!%p221_p3), %v1610_v1  ;;  %1483 = vmatprep.subr.bf16.mxu1 (!%p221_p3), %v1610_v1  ;;  %v1565_v46 = vld [vmem:[%s2339_s2 + $0x28] sm:$0xff] (!%p221_p3)   ;;  %vm1857_vm5 = vmor (!%p221_p3), %vm349_vm2, %vm350_vm3  ;;  %s1614_s5 = smov (!%p221_p3), 32   ;;  %s1616_s23 = smov (!%p221_p3), 64   ;;  %vm897_vm6 = vcmask (!%p221_p3), 130048   ;;  %vm922_vm7 = vcmask (!%p221_p3), 261120   ;;  %vm939_vm8 = vcmask (!%p221_p3), 392192  }
   0xd   : > { %s1617_s24 = smov (!%p221_p3), 112   ;;  %vm956_vm9 = vcmask (!%p221_p3), 523264   ;;  %vm973_vm10 = vcmask (!%p221_p3), 654336   ;;  %vm990_vm11 = vcmask (!%p221_p3), 785408   ;;  %vm1007_vm12 = vcmask (!%p221_p3), 916480  }
   0xe   : > { %vm1279_vm13 = vcmask (!%p221_p3), 257024  }
   0xf   : > { %1131 = vmatpush1.bf16.msra.mxu0 (!%p221_p3), %v1561_v2  ;;  %1492 = vmatpush1.bf16.msra.mxu1 (!%p221_p3), %v1561_v2 }
  0x10   : > { %s2358_s16 = smov (!%p278_p5, %s1596_s16), 1  ;;  %1132 = vmatprep.subr.bf16.mxu0 %v1610_v1  ;;  %1484 = vmatprep.subr.bf16.mxu1 %v1610_v1  ;;  %s2360_s13 = smov (!%p1768_p7, %s1481_s13), 17 }
  0x11   : > { %s281_s25 = scalar_select %p280_p6, %s1676_s22, 17 }
  0x12   : > { %s1501_s26 = smul.u32 54, %s2358_s16 }
  0x13   : > { %s1500_s27 = smul.u32 3, %s281_s25  ;;  %1133 = vmatpush1.bf16.msra.mxu0 %v1562_v3  ;;  %1493 = vmatpush1.bf16.msra.mxu1 %v1562_v3 }
  0x14   : > { %1134 = vmatprep.subr.bf16.mxu0 %v1610_v1  ;;  %1485 = vmatprep.subr.bf16.mxu1 %v1610_v1  ;;  %s1502_s22 = smul.u32 3, %s2360_s13  ;;  %s1615_s13 = smov 16  }
  0x15   : > { %s284_s30 = sadd.s32 %s1501_s26, %s1500_s27  ;;  %s1612_s27 = smov 96  }
  0x16   : > { %s1406_s7 = sshll.u32 %s284_s30, 2  ;;  %s1613_s30 = smov 80  }
  0x17   : > { %s1703_s10 = scalar_lea.vmem %s2337_s0, %s1406_s7  ;;  %1135 = vmatpush1.bf16.msra.mxu0 %v1563_v4  ;;  %1494 = vmatpush1.bf16.msra.mxu1 %v1563_v4  ;;  %s1880_s8 = sadd.s32 %s1502_s22, %s1501_s26 }
  0x18   : > { %v1709_v5 = vld [vmem:[%s1703_s10 + $0x3c] sm:$0xf]  ;;  %v1712_v6 = vld [vmem:[%s1703_s10 + $0x40] sm:$0xf]  ;;  %v322_v7 = vld [vmem:[%s1703_s10 + $0xc] sm:$0xf]  ;;  %1136 = vmatprep.subr.bf16.mxu0 %v1610_v1  ;;  %1486 = vmatprep.subr.bf16.mxu1 %v1610_v1 }
  0x19   : > { %v486_v8 = vshrl.u32 %v1712_v6, 16  ;;  %v1718_v9 = vcombine.low %v1709_v5, %v1712_v6  ;;  %v473_v10 = vshrl.u32 %v1709_v5, 16  ;;  %v476_v11 = vshll.u32 %v1709_v5, 16  ;;  %v1723_v12 = vld [vmem:[%s1703_s10 + $0x10] sm:$0xf]  ;;  %s1409_s25 = sshll.u32 %s1880_s8, 2 }
  0x1a   : > { %v386_v13 = vshll.u32 %v1723_v12, 16  ;;  %v390_v14 = vshrl.u32 %v1723_v12, 16  ;;  %v1729_v15 = vcombine.low %v322_v7, %v1723_v12  ;;  %v377_v16 = vshrl.u32 %v322_v7, 16  ;;  %v1732_v17 = vld [vmem:[%s1703_s10 + $0x48] sm:$0xf]  ;;  %s2005_s22 = scalar_lea.vmem %s2338_s1, %s1409_s25 }
  0x1b   : > { %810 = vrot.lane.b32.xlu1 %v1718_v9, %s1611_s14  ;;  %v380_v18 = vshll.u32 %v322_v7, 16  ;;  %v1739_v19 = vld [vmem:[%s1703_s10 + $0x4c] sm:$0xf]  ;;  %v497_v20 = vshrl.u32 %v1732_v17, 16  ;;  %v500_v21 = vshll.u32 %v1732_v17, 16  ;;  %v1414_v22 = vrot.slane %v322_v7, 9  ;;  %1137 = vmatpush1.bf16.msra.mxu0 %v1564_v23 }
  0x1c   : > { %v1746_v24 = vrot.slane %v390_v14, 4  ;;  %802 = vrot.lane.b32.xlu0 %v1729_v15, %s1611_s14  ;;  %v1750_v25 = vrot.slane %v377_v16, 4  ;;  %v510_v26 = vshrl.u32 %v1739_v19, 16  ;;  %v1755_v27 = vcombine.low %v1732_v17, %v1739_v19  ;;  %v1758_v28 = vld [vmem:[%s1703_s10 + $0x18] sm:$0xf]  ;;  %1495 = vmatpush1.bf16.msra.mxu1 %v1564_v23 }
  0x1d   : > { %v1772_v30 = vrot.slane %v380_v18, 5  ;;  %v1775_v31 = vld [vmem:[%s1703_s10 + $0x1c] sm:$0xf]  ;;  %v401_v32 = vshrl.u32 %v1758_v28, 16  ;;  %v404_v33 = vshll.u32 %v1758_v28, 16  ;;  %v580_v34 = vrot.slane %v1723_v12, 5  ;;  %1138 = vmatprep.subr.bf16.mxu0 %v1610_v1  ;;  %1487 = vmatprep.subr.bf16.mxu1 %v1610_v1 }
  0x1e   : > { %v414_v35 = vshrl.u32 %v1775_v31, 16  ;;  %v1783_v36 = vcombine.low %v1758_v28, %v1775_v31  ;;  %v1786_v37 = vld [vmem:[%s1703_s10 + $0x14] sm:$0x1]  ;;  %v1789_v38 = vld [vmem:[%s1703_s10] sm:$0xf]  ;;  %v1418_v39 = vrot.slane %v1709_v5, 9 }
  0x1f   : > { %867 = vrot.lane.b32.xlu1 %v1755_v27, %s1612_s27  ;;  %v581_v40 = vsel %vm1762_vm4, %v1414_v22, %v580_v34  ;;  %v582_v41 = vrot.slane %v580_v34, 4  ;;  %v583_v42 = vrot.slane %v1786_v37, 5  ;;  %v1800_v43 = vld [vmem:[%s1703_s10 + $0x4] sm:$0xf]  ;;  %v321_v44 = vld [vmem:[%s1703_s10 + $0x8] sm:$0x1]  ;;  %v383_v45 = vor.u32 %v1772_v30, %v1750_v25  ;;  %1139 = vmatpush1.bf16.msra.mxu0 %v1565_v46 }
  0x20   : > { %859 = vrot.lane.b32.xlu0 %v1783_v36, %s1612_s27  ;;  %v1413_v47 = vrot.slane %v1789_v38, 9  ;;  %v573_v48 = vrot.slane %v1800_v43, 5  ;;  %v576_v49 = vrot.slane %v321_v44, 5  ;;  %v1813_v50 = vld [vmem:[%s1703_s10 + $0x30] sm:$0xf]  ;;  %v353_v51 = vshrl.u32 %v1789_v38, 16  ;;  %1496 = vmatpush1.bf16.msra.mxu1 %v1565_v46 }
  0x21   : > { %v584_v52 = vsel %vm1762_vm4, %v582_v41, %v583_v42  ;;  %v1819_v53 = vld [vmem:[%s1703_s10 + $0x34] sm:$0xf]  ;;  %v1822_v54 = vld [vmem:[%s1703_s10 + $0x38] sm:$0x1]  ;;  %v1417_v55 = vrot.slane %v1813_v50, 9  ;;  %v356_v56 = vshll.u32 %v1789_v38, 16  ;;  %v1423_v57 = vcombine.low %v1789_v38, %v1800_v43  ;;  %1140 = vmatprep.subr.bf16.mxu0 %v1610_v1  ;;  %1488 = vmatprep.subr.bf16.mxu1 %v1610_v1 }
  0x22   : > { %v1828_v58 = vcombine.low %v581_v40, %v584_v52  ;;  %v574_v59 = vsel %vm1762_vm4, %v1413_v47, %v573_v48  ;;  %v575_v60 = vrot.slane %v573_v48, 4  ;;  %v601_v61 = vrot.slane %v1819_v53, 5  ;;  %v1844_v3 = vld [vmem:[%s1703_s10 + $0x44] sm:$0x1]  ;;  %v1567_v52 = vld [vmem:[%s2339_s2 + $0x30] sm:$0xff]  }
  0x23   : > { %v604_v62 = vrot.slane %v1822_v54, 5  ;;  %v355_v63 = vrot.slane %v353_v51, 4  ;;  %v358_v0 = vrot.slane %v356_v56, 5  ;;  %v362_v2 = vshll.u32 %v1800_v43, 16  ;;  %1141 = vmatpush1.bf16.msra.mxu0 %v1567_v52  ;;  %v1569_v5 = vld [vmem:[%s2339_s2 + $0x40] sm:$0xff]  }
  0x24   : > { %840 = vrot.lane.b32.xlu0 %v1828_v58, %s1613_s30  ;;  %v577_v4 = vsel %vm1762_vm4, %v575_v60, %v576_v49  ;;  %v602_v7 = vsel %vm1762_vm4, %v1417_v55, %v601_v61  ;;  %v603_v14 = vrot.slane %v601_v61, 4  ;;  %v366_v16 = vshrl.u32 %v1800_v43, 16  ;;  %1497 = vmatpush1.bf16.msra.mxu1 %v1567_v52 }
  0x25   : > { %v1439_v18 = vcombine.low %v574_v59, %v577_v4  ;;  %v359_v22 = vor.u32 %v358_v0, %v355_v63  ;;  %v364_v23 = vrot.slane %v362_v2, 5  ;;  %v372_v34 = vshll.u32 %v321_v44, 16  ;;  %1142 = vmatprep.subr.bf16.mxu0 %v1610_v1  ;;  %1489 = vmatprep.subr.bf16.mxu1 %v1610_v1 }
  0x26   : > { %v605_v40 = vsel %vm1762_vm4, %v603_v14, %v604_v62  ;;  %v368_v42 = vrot.slane %v366_v16, 4  ;;  %v608_v47 = vrot.slane %v1712_v6, 5  ;;  %v611_v48 = vrot.slane %v1844_v3, 5 }
  0x27   : > { %783 = vrot.lane.b32.xlu1 %v1439_v18, %s1614_s5  ;;  %v1867_v44 = vcombine.low %v602_v7, %v605_v40  ;;  %v360_v46 = vrot.slane %v359_v22, 4  ;;  %v374_v49 = vrot.slane %v372_v34, 5  ;;  %v449_v51 = vshrl.u32 %v1813_v50, 16 }
  0x28   : > { %v369_v55 = vor.u32 %v368_v42, %v364_v23  ;;  %v609_v56 = vsel %vm1762_vm4, %v1418_v39, %v608_v47  ;;  %v610_v59 = vrot.slane %v608_v47, 4  ;;  %v452_v60 = vshll.u32 %v1813_v50, 16  ;;  %v1568_v39 = vld [vmem:[%s2339_s2 + $0x38] sm:$0xff]  }
  0x29   : > { %v365_v61 = vsel %vm1857_vm5, %v360_v46, %v364_v23  ;;  %v451_v62 = vrot.slane %v449_v51, 4  ;;  %v458_v63 = vshll.u32 %v1819_v53, 16  ;;  %v462_v0 = vshrl.u32 %v1819_v53, 16  ;;  %1143 = vmatpush1.bf16.msra.mxu0 %v1568_v39  ;;  %1498 = vmatpush1.bf16.msra.mxu1 %v1568_v39 }
  0x2a   : > { %v370_v2 = vrot.slane %v369_v55, 4  ;;  %v612_v4 = vsel %vm1762_vm4, %v610_v59, %v611_v48  ;;  %v454_v7 = vrot.slane %v452_v60, 5  ;;  %v468_v14 = vshll.u32 %v1822_v54, 16  ;;  %1144 = vmatprep.subr.bf16.mxu0 %v1610_v1  ;;  %1490 = vmatprep.subr.bf16.mxu1 %v1610_v1 }
  0x2b   : > { %791 = vrot.lane.b32.xlu1 %v1867_v44, %s1614_s5  ;;  %v1896_v16 = vcombine.low %v609_v56, %v612_v4  ;;  %v460_v18 = vrot.slane %v458_v63, 5  ;;  %v464_v22 = vrot.slane %v462_v0, 4  ;;  %v475_v23 = vrot.slane %v473_v10, 4 }
  0x2c   : > { %v375_v34 = vsel %vm1857_vm5, %v370_v2, %v374_v49  ;;  %v455_v40 = vor.u32 %v454_v7, %v451_v62  ;;  %v470_v42 = vrot.slane %v468_v14, 5  ;;  %v478_v54 = vrot.slane %v476_v11, 5 }
  0x2d   : > { %v1431_v47 = vcombine.low %v365_v61, %v375_v34  ;;  %v465_v48 = vor.u32 %v464_v22, %v460_v18  ;;  %v482_v46 = vshll.u32 %v1712_v6, 16  ;;  %v488_v51 = vrot.slane %v486_v8, 4  ;;  %1145 = vmatpush1.bf16.msra.mxu0 %v1569_v5  ;;  %1499 = vmatpush1.bf16.msra.mxu1 %v1569_v5 }
  0x2e   : > { %v456_v52 = vrot.slane %v455_v40, 4  ;;  %v479_v55 = vor.u32 %v478_v54, %v475_v23  ;;  %v492_v10 = vshll.u32 %v1844_v3, 16  ;;  %v384_v49 = vrot.slane %v383_v45, 4 }
  0x2f   : > { %743 = vrot.lane.b32.xlu0 %v1431_v47, %s1615_s13  ;;  %848 = vrot.lane.b32.xlu1 %v1896_v16, %s1613_s30  ;;  %v466_v6 = vrot.slane %v465_v48, 4  ;;  %v484_v8 = vrot.slane %v482_v46, 5  ;;  %v388_v11 = vrot.slane %v386_v13, 5  ;;  %v396_v25 = vshll.u32 %v1786_v37, 16  ;;  %v1932_v13 = vld [vmem:[%s1703_s10 + $0x50] sm:$0x1] }
  0x30   : > { %v461_v1 = vsel %vm1857_vm5, %v456_v52, %v460_v18  ;;  %v480_v30 = vrot.slane %v479_v55, 4  ;;  %v494_v45 = vrot.slane %v492_v10, 5  ;;  %v499_v3 = vrot.slane %v497_v20, 4 }
  0x31   : > { %v471_v56 = vsel %vm1857_vm5, %v466_v6, %v470_v42  ;;  %v489_v59 = vor.u32 %v488_v51, %v484_v8  ;;  %v389_v60 = vsel %vm1857_vm5, %v384_v49, %v388_v11  ;;  %v393_v12 = vor.u32 %v1746_v24, %v388_v11 }
  0x32   : > { %v1934_v37 = vcombine.low %v461_v1, %v471_v56  ;;  %v485_v61 = vsel %vm1857_vm5, %v480_v30, %v484_v8  ;;  %v398_v62 = vrot.slane %v396_v25, 5  ;;  %v502_v20 = vrot.slane %v500_v21, 5  ;;  %v1982_v30 = vld [vmem:[%s1703_s10 + $0x54] sm:$0xf]  ;;  %v1990_v56 = vld [vmem:[%s1703_s10 + $0x58] sm:$0xf] }
  0x33   : > { %v490_v63 = vrot.slane %v489_v59, 4  ;;  %v394_v0 = vrot.slane %v393_v12, 4  ;;  %v506_v39 = vshll.u32 %v1739_v19, 16  ;;  %v512_v24 = vrot.slane %v510_v26, 4  ;;  %v1955_v26 = vld [vmem:[%s1703_s10 + $0x20] sm:$0x1] }
  0x34   : > { %751 = vrot.lane.b32.xlu0 %v1934_v37, %s1615_s13  ;;  %v503_v2 = vor.u32 %v502_v20, %v499_v3  ;;  %v516_v4 = vshll.u32 %v1932_v13, 16  ;;  %v403_v7 = vrot.slane %v401_v32, 4  ;;  %v406_v21 = vrot.slane %v404_v33, 5  ;;  %v1997_v12 = vld [vmem:[%s1703_s10 + $0x24] sm:$0xf] }
  0x35   : > { %v495_v14 = vsel %vm1857_vm5, %v490_v63, %v494_v45  ;;  %v399_v18 = vsel %vm1857_vm5, %v394_v0, %v398_v62  ;;  %v508_v22 = vrot.slane %v506_v39, 5  ;;  %v410_v23 = vshll.u32 %v1775_v31, 16 }
  0x36   : > { %v1958_v34 = vcombine.low %v485_v61, %v495_v14  ;;  %v1432_v40 = vcombine.low %v389_v60, %v399_v18  ;;  %v504_v42 = vrot.slane %v503_v2, 4  ;;  %v518_v54 = vrot.slane %v516_v4, 5  ;;  %v2000_v61 = vld [vmem:[%s1703_s10 + $0x28] sm:$0xf]  ;;  %v2020_v2 = vld [vmem:[%s2005_s22] sm:$0xf] }
  0x37   : > { %v513_v32 = vor.u32 %v512_v24, %v508_v22  ;;  %v407_v47 = vor.u32 %v406_v21, %v403_v7  ;;  %v412_v48 = vrot.slane %v410_v23, 5  ;;  %v416_v33 = vrot.slane %v414_v35, 4 }
  0x38   : > { %829 = vrot.lane.b32.xlu1 %v1958_v34, %s1616_s23  ;;  %821 = vrot.lane.b32.xlu0 %v1432_v40, %s1616_s23  ;;  %v420_v46 = vshll.u32 %v1955_v26, 16  ;;  %v509_v51 = vsel %vm1857_vm5, %v504_v42, %v508_v22  ;;  %v615_v11 = vrot.slane %v1739_v19, 5  ;;  %v1419_v45 = vrot.slane %v1732_v17, 9 }
  0x39   : > { %v514_v52 = vrot.slane %v513_v32, 4  ;;  %v408_v55 = vrot.slane %v407_v47, 4  ;;  %v417_v10 = vor.u32 %v416_v33, %v412_v48  ;;  %v618_v19 = vrot.slane %v1932_v13, 5  ;;  %v2041_v47 = vld [vmem:[%s1703_s10 + $0x2c] sm:$0x1] }
  0x3a   : > { %v422_v49 = vrot.slane %v420_v46, 5  ;;  %v617_v3 = vrot.slane %v615_v11, 4  ;;  %v521_v59 = vshrl.u32 %v1982_v30, 16  ;;  %v524_v60 = vshll.u32 %v1982_v30, 16 }
  0x3b   : > { %v519_v35 = vsel %vm1857_vm5, %v514_v52, %v518_v54  ;;  %v413_v5 = vsel %vm1857_vm5, %v408_v55, %v412_v48  ;;  %v418_v6 = vrot.slane %v417_v10, 4  ;;  %v587_v17 = vrot.slane %v1775_v31, 5  ;;  %v2036_v54 = vld [vmem:[%s1703_s10 + $0x5c] sm:$0x1]  ;;  %v2055_v10 = vld [vmem:[%s2005_s22 + $0x8] sm:$0x1] }
  0x3c   : > { %v1972_v8 = vcombine.low %v509_v51, %v519_v35  ;;  %v534_v13 = vshrl.u32 %v1990_v56, 16  ;;  %v530_v62 = vshll.u32 %v1990_v56, 16  ;;  %v616_v20 = vsel %vm1762_vm4, %v1419_v45, %v615_v11  ;;  %v2066_v11 = vld [vmem:[%s2005_s22 + $0xc] sm:$0xf]  ;;  %s1410_s10 = sshll.u32 %s1592_s15, 2  ;;  %s1411_s15 = sshll.u32 %s2358_s16, 3 }
  0x3d   : > { %v423_v25 = vsel %vm1857_vm5, %v418_v6, %v422_v49  ;;  %v619_v63 = vsel %vm1762_vm4, %v617_v3, %v618_v19  ;;  %v425_v0 = vshrl.u32 %v1997_v12, 16  ;;  %v428_v39 = vshll.u32 %v1997_v12, 16  ;;  %p311_p8 = scmp.lt.s32.totalorder %s1410_s10, 7 }
  0x3e   : > { %886 = vrot.lane.b32.xlu1 %v1972_v8, %s1617_s24  ;;  %v1979_v1 = vcombine.low %v413_v5, %v423_v25  ;;  %v438_v31 = vshrl.u32 %v2000_v61, 16  ;;  %v434_v24 = vshll.u32 %v2000_v61, 16  ;;  %v1415_v4 = vrot.slane %v1758_v28, 9 }
  0x3f   : > { %v523_v7 = vrot.slane %v521_v59, 4  ;;  %v526_v21 = vrot.slane %v524_v60, 5  ;;  %v589_v14 = vrot.slane %v587_v17, 4  ;;  %v590_v18 = vrot.slane %v1955_v26, 5  ;;  %s2362_s10 = smov (!%p311_p8, %s1410_s10), 7 }
  0x40   : > { %878 = vrot.lane.b32.xlu0 %v1979_v1, %s1617_s24  ;;  %v2026_v22 = vrot.slane %v530_v62, 5  ;;  %v536_v23 = vrot.slane %v534_v13, 4  ;;  %v2033_v42 = vcombine.low %v616_v20, %v619_v63  ;;  %v628_v28 = vshrl.u32 %v2020_v2, 16 }
  0x41   : > { %v631_v32 = vshll.u32 %v2020_v2, 16  ;;  %v427_v26 = vrot.slane %v425_v0, 4  ;;  %v430_v48 = vrot.slane %v428_v39, 5  ;;  %v2043_v33 = vrot.slane %v434_v24, 5 }
  0x42   : > { %753 = vrot.lane.b32.xlu1 %v1958_v34, %s1615_s13  ;;  %v440_v46 = vrot.slane %v438_v31, 4  ;;  %v2051_v51 = vcombine.low %v1982_v30, %v1990_v56  ;;  %v527_v52 = vor.u32 %v526_v21, %v523_v7  ;;  %v591_v49 = vsel %vm1762_vm4, %v589_v14, %v590_v18  ;;  %v2085_v18 = vld [vmem:[%s2005_s22 + $0x14] sm:$0x1]  ;;  %1466 = vmatprep.mubr.msk.bf16.mxu1 %vm897_vm6, %v2033_v42 }
  0x43   : > { %v537_v35 = vor.u32 %v536_v23, %v2026_v22  ;;  %v540_v5 = vshll.u32 %v2036_v54, 16  ;;  %v2063_v6 = vcombine.low %v1813_v50, %v1819_v53  ;;  %v444_v25 = vshll.u32 %v2041_v47, 16  ;;  %v2075_v50 = vld [vmem:[%s2005_s22 + $0x10] sm:$0xf] }
  0x44   : > { %745 = vrot.lane.b32.xlu0 %v1432_v40, %s1615_s13  ;;  %v2029_v40 = vld [vmem:[%s2005_s22 + $0x4] sm:$0xf]  ;;  %v630_v45 = vrot.slane %v628_v28, 4  ;;  %v633_v3 = vrot.slane %v631_v32, 5  ;;  %v431_v59 = vor.u32 %v430_v48, %v427_v26  ;;  %v441_v60 = vor.u32 %v440_v46, %v2043_v33 }
  0x45   : > { %v641_v55 = vshrl.u32 %v2029_v40, 16  ;;  %v637_v19 = vshll.u32 %v2029_v40, 16  ;;  %v647_v13 = vshll.u32 %v2055_v10, 16  ;;  %v528_v53 = vrot.slane %v527_v52, 4 }
  0x46   : > { %793 = vrot.lane.b32.xlu1 %v1896_v16, %s1614_s5  ;;  %v634_v62 = vor.u32 %v633_v3, %v630_v45  ;;  %v662_v63 = vshrl.u32 %v2066_v11, 16  ;;  %v538_v39 = vrot.slane %v537_v35, 4  ;;  %v542_v31 = vrot.slane %v540_v5, 5 }
  0x47   : > { %v639_v20 = vrot.slane %v637_v19, 5  ;;  %v665_v24 = vshll.u32 %v2066_v11, 16  ;;  %v649_v21 = vrot.slane %v647_v13, 5  ;;  %v675_v14 = vshrl.u32 %v2075_v50, 16 }
  0x48   : > { %785 = vrot.lane.b32.xlu0 %v1828_v58, %s1614_s5  ;;  %v588_v58 = vsel %vm1762_vm4, %v1415_v4, %v587_v17  ;;  %v643_v17 = vrot.slane %v641_v55, 4  ;;  %v635_v4 = vrot.slane %v634_v62, 4  ;;  %v432_v23 = vrot.slane %v431_v59, 4 }
  0x49   : > { %v1441_v0 = vcombine.low %v588_v58, %v591_v49  ;;  %v442_v28 = vrot.slane %v441_v60, 4  ;;  %v446_v32 = vrot.slane %v444_v25, 5  ;;  %v664_v26 = vrot.slane %v662_v63, 4 }
  0x4a   : > { %812 = vrot.lane.b32.xlu1 %v1755_v27, %s1611_s14  ;;  %v644_v7 = vor.u32 %v643_v17, %v639_v20  ;;  %v533_v48 = vsel %vm1857_vm5, %v528_v53, %v2026_v22  ;;  %v640_v46 = vsel %vm1857_vm5, %v635_v4, %v639_v20  ;;  %v667_v52 = vrot.slane %v665_v24, 5 }
  0x4b   : > { %v543_v55 = vsel %vm1857_vm5, %v538_v39, %v542_v31  ;;  %v671_v49 = vshll.u32 %v2075_v50, 16  ;;  %v677_v35 = vrot.slane %v675_v14, 4  ;;  %v681_v5 = vshll.u32 %v2085_v18, 16  ;;  %1462 = vmatprep.mubr.msk.bf16.mxu0 %vm897_vm6, %v1441_v0 }
  0x4c   : > { %804 = vrot.lane.b32.xlu0 %v1783_v36, %s1611_s14  ;;  %v645_v58 = vrot.slane %v644_v7, 4  ;;  %v2101_v25 = vcombine.low %v1997_v12, %v2000_v61  ;;  %v668_v45 = vor.u32 %v667_v52, %v664_v26  ;;  %v437_v3 = vsel %vm1857_vm5, %v432_v23, %v2043_v33 }
  0x4d   : > { %v447_v19 = vsel %vm1857_vm5, %v442_v28, %v446_v32  ;;  %v673_v60 = vrot.slane %v671_v49, 5  ;;  %v1438_v17 = vcombine.low %v533_v48, %v543_v55  ;;  %v683_v62 = vrot.slane %v681_v5, 5 }
  0x4e   : > { %831 = vrot.lane.b32.xlu1 %v1972_v8, %s1616_s23  ;;  %v650_v22 = vsel %vm1857_vm5, %v645_v58, %v649_v21  ;;  %v669_v13 = vrot.slane %v668_v45, 4  ;;  %v1434_v33 = vcombine.low %v437_v3, %v447_v19  ;;  %v622_v24 = vrot.slane %v1990_v56, 5 }
  0x4f   : > { %v2110_v59 = vcombine.low %v640_v46, %v650_v22  ;;  %v678_v53 = vor.u32 %v677_v35, %v673_v60  ;;  %v594_v4 = vrot.slane %v2000_v61, 5  ;;  %v1420_v7 = vrot.slane %v1982_v30, 9 }
  0x50   : > { %823 = vrot.lane.b32.xlu0 %v1979_v1, %s1616_s23  ;;  %v674_v20 = vsel %vm1857_vm5, %v669_v13, %v673_v60  ;;  %v624_v41 = vrot.slane %v622_v24, 4  ;;  %v625_v21 = vrot.slane %v2036_v54, 5  ;;  %v1416_v14 = vrot.slane %v1997_v12, 9 }
  0x51   : > { %v679_v63 = vrot.slane %v678_v53, 4  ;;  %v597_v56 = vrot.slane %v2041_v47, 5  ;;  %v1447_v47 = vcombine.low %v2020_v2, %v2029_v40  ;;  %v690_v23 = vrot.slane %v2075_v50, 5 }
  0x52   : > { %850 = vrot.lane.b32.xlu1 %v2033_v42, %s1613_s30  ;;  %v626_v61 = vsel %vm1762_vm4, %v624_v41, %v625_v21  ;;  %v595_v30 = vsel %vm1762_vm4, %v1416_v14, %v594_v4  ;;  %v1421_v28 = vrot.slane %v2020_v2, 9  ;;  %v659_v26 = vrot.slane %v2055_v10, 5 }
  0x53   : > { %v684_v39 = vsel %vm1857_vm5, %v679_v63, %v683_v62  ;;  %v1422_v48 = vrot.slane %v2066_v11, 9  ;;  %v693_v46 = vrot.slane %v2085_v18, 5  ;;  %v1450_v49 = vcombine.low %v2066_v11, %v2075_v50 }
  0x54   : > { %842 = vrot.lane.b32.xlu0 %v1441_v0, %s1613_s30  ;;  %v1451_v31 = vcombine.low %v674_v20, %v684_v39 }
  0x55   : > { %v2190_v2 = vsel %vm1762_vm4, %v1422_v48, %v690_v23 }
  0x56   : > { %869 = vrot.lane.b32.xlu1 %v2051_v51, %s1612_s27 }
  0x58   : > { %861 = vrot.lane.b32.xlu0 %v2101_v25, %s1612_s27 }
  0x5a   : > { %888 = vrot.lane.b32.xlu1 %v1438_v17, %s1617_s24 }
  0x5c   : > { %880 = vrot.lane.b32.xlu0 %v1434_v33, %s1617_s24 }
  0x5e   : > { %755 = vrot.lane.b32.xlu1 %v1972_v8, %s1615_s13  ;;  %v596_v8 = vrot.slane %v594_v4, 4 }
  0x60   : > { %747 = vrot.lane.b32.xlu0 %v1979_v1, %s1615_s13  ;;  %v623_v1 = vsel %vm1762_vm4, %v1420_v7, %v622_v24  ;;  %v598_v12 = vsel %vm1762_vm4, %v596_v8, %v597_v56 }
  0x61   : > { %v2154_v54 = vcombine.low %v595_v30, %v598_v12 }
  0x62   : > { %795 = vrot.lane.b32.xlu1 %v2033_v42, %s1614_s5  ;;  %v2151_v42 = vcombine.low %v623_v1, %v626_v61 }
  0x64   : > { %787 = vrot.lane.b32.xlu0 %v1441_v0, %s1614_s5  ;;  %v656_v0 = vrot.slane %v2029_v40, 5  ;;  %v692_v40 = vrot.slane %v690_v23, 4 }
  0x66   : > { %814 = vrot.lane.b32.xlu1 %v2051_v51, %s1611_s14  ;;  %v658_v32 = vrot.slane %v656_v0, 4  ;;  %v657_v58 = vsel %vm1762_vm4, %v1421_v28, %v656_v0  ;;  %v2194_v10 = vsel %vm1762_vm4, %v692_v40, %v693_v46 }
  0x67   : > { %v1452_v18 = vcombine.low %v2190_v2, %v2194_v10 }
  0x68   : > { %806 = vrot.lane.b32.xlu0 %v2101_v25, %s1611_s14  ;;  %v660_v52 = vsel %vm1762_vm4, %v658_v32, %v659_v26 }
  0x69   : > { %v2200_v55 = vcombine.low %v657_v58, %v660_v52 }
  0x6a   : > { %833 = vrot.lane.b32.xlu1 %v1438_v17, %s1616_s23 }
  0x6c   : > { %825 = vrot.lane.b32.xlu0 %v1434_v33, %s1616_s23 }
  0x6e   : > { %852 = vrot.lane.b32.xlu1 %v2151_v42, %s1613_s30 }
  0x70   : > { %844 = vrot.lane.b32.xlu0 %v2154_v54, %s1613_s30 }
  0x72   : > { %871 = vrot.lane.b32.xlu1 %v1447_v47, %s1612_s27 }
  0x74   : > { %863 = vrot.lane.b32.xlu0 %v2063_v6, %s1612_s27 }
  0x76   : > { %890 = vrot.lane.b32.xlu1 %v2110_v59, %s1617_s24 }
  0x78   : > { %882 = vrot.lane.b32.xlu0 %v1934_v37, %s1617_s24 }
  0x7a   : > { %757 = vrot.lane.b32.xlu1 %v1438_v17, %s1615_s13 }
  0x7c   : > { %749 = vrot.lane.b32.xlu0 %v1434_v33, %s1615_s13 }
  0x7e   : > { %797 = vrot.lane.b32.xlu1 %v2151_v42, %s1614_s5 }
  0x80   : > { %789 = vrot.lane.b32.xlu0 %v2154_v54, %s1614_s5 }
  0x82   : > { %816 = vrot.lane.b32.xlu1 %v1447_v47, %s1611_s14 }
  0x84   : > { %808 = vrot.lane.b32.xlu0 %v2063_v6, %s1611_s14  ;;  %s314_s14 = sadd.s32 %s1411_s15, %s2362_s10 }
  0x85   : > { %s1412_s5 = sshll.u32 %s314_s14, 2 }
  0x86   : > { %835 = vrot.lane.b32.xlu1 %v2110_v59, %s1616_s23  ;;  %s2308_s8 = scalar_lea.vmem %s2341_s4, %s1412_s5 }
  0x88   : > { %827 = vrot.lane.b32.xlu0 %v1934_v37, %s1616_s23 }
  0x8a   : > { %854 = vrot.lane.b32.xlu1 %v2200_v55, %s1613_s30 }
  0x8c   : > { %846 = vrot.lane.b32.xlu0 %v1867_v44, %s1613_s30 }
  0x8d   : > { %v811_v29 = vpop.permute.xlu1 %810 }
  0x8e   : > { %873 = vrot.lane.b32.xlu1 %v1450_v49, %s1612_s27  ;;  %v803_v35 = vpop.permute.xlu0 %802 }
  0x90   : > { %865 = vrot.lane.b32.xlu0 %v1718_v9, %s1612_s27 }
  0x91   : > { %v868_v5 = vpop.permute.xlu1 %867 }
  0x92   : > { %892 = vrot.lane.b32.xlu1 %v1451_v31, %s1617_s24  ;;  %v860_v37 = vpop.permute.xlu0 %859 }
  0x94   : > { %884 = vrot.lane.b32.xlu0 %v1958_v34, %s1617_s24 }
  0x96   : > { %v841_v45 = vpop.permute.xlu0 %840 }
  0x99   : > { %v784_v22 = vpop.permute.xlu1 %783 }
  0x9d   : > { %v792_v11 = vpop.permute.xlu1 %791 }
  0xa1   : > { %v744_v50 = vpop.permute.xlu0 %743  ;;  %v849_v19 = vpop.permute.xlu1 %848 }
  0xa2   : > { %v900_v3 = vsel %vm897_vm6, %v1423_v57, %v744_v50 }
  0xa3   : > { %v924_v60 = vsel %vm922_vm7, %v900_v3, %v784_v22 }
  0xa4   : > { %v941_v62 = vsel %vm939_vm8, %v924_v60, %v803_v35 }
  0xa6   : > { %v752_v59 = vpop.permute.xlu0 %751 }
  0xa7   : > { %v912_v17 = vsel %vm897_vm6, %v2063_v6, %v752_v59 }
  0xa8   : > { %v932_v34 = vsel %vm922_vm7, %v912_v17, %v792_v11 }
  0xa9   : > { %v949_v13 = vsel %vm939_vm8, %v932_v34, %v811_v29 }
  0xaa   : > { %v830_v53 = vpop.permute.xlu1 %829  ;;  %v822_v38 = vpop.permute.xlu0 %821 }
  0xab   : > { %v966_v43 = vsel %vm956_vm9, %v949_v13, %v830_v53  ;;  %v958_v57 = vsel %vm956_vm9, %v941_v62, %v822_v38 }
  0xac   : > { %v983_v33 = vsel %vm973_vm10, %v966_v43, %v849_v19  ;;  %v975_v6 = vsel %vm973_vm10, %v958_v57, %v841_v45 }
  0xad   : > { %v1000_v20 = vsel %vm990_vm11, %v983_v33, %v868_v5  ;;  %v992_v39 = vsel %vm990_vm11, %v975_v6, %v860_v37 }
  0xb0   : > { %v887_v63 = vpop.permute.xlu1 %886 }
  0xb1   : > { %v1021_v31 = vsel %vm1007_vm12, %v1000_v20, %v887_v63 }
  0xb2   : > { %v879_v24 = vpop.permute.xlu0 %878  ;;  %1193 = vmatmul.mubr.bf16.vlgmr.msra.gmra.mrb[0].mxu1 %v1021_v31 }
  0xb3   : > { %v1009_v4 = vsel %vm1007_vm12, %v992_v39, %v879_v24  ;;  %1467 = vmatprep.mubr.msk.bf16.mxu1 %vm897_vm6, %v2151_v42 }
  0xb4   : > { %1161 = vmatmul.mubr.bf16.vlgmr.msra.gmra.mrb[0].mxu0 %v1009_v4  ;;  %v754_v7 = vpop.permute.xlu1 %753 }
  0xb5   : > { %1463 = vmatprep.mubr.msk.bf16.mxu0 %vm897_vm6, %v2154_v54  ;;  %v915_v47 = vsel %vm897_vm6, %v1718_v9, %v754_v7 }
  0xb6   : > { %v746_v41 = vpop.permute.xlu0 %745 }
  0xb7   : > { %v903_v23 = vsel %vm897_vm6, %v1729_v15, %v746_v41 }
  0xb8   : > { %v794_v21 = vpop.permute.xlu1 %793 }
  0xb9   : > { %v934_v0 = vsel %vm922_vm7, %v915_v47, %v794_v21 }
  0xba   : > { %v786_v14 = vpop.permute.xlu0 %785 }
  0xbb   : > { %v926_v28 = vsel %vm922_vm7, %v903_v23, %v786_v14 }
  0xbc   : > { %v813_v8 = vpop.permute.xlu1 %812 }
  0xbd   : > { %v951_v54 = vsel %vm939_vm8, %v934_v0, %v813_v8 }
  0xbe   : > { %v805_v56 = vpop.permute.xlu0 %804 }
  0xbf   : > { %v943_v48 = vsel %vm939_vm8, %v926_v28, %v805_v56 }
  0xc0   : > { %v832_v1 = vpop.permute.xlu1 %831 }
  0xc1   : > { %v968_v32 = vsel %vm956_vm9, %v951_v54, %v832_v1 }
  0xc2   : > { %v824_v61 = vpop.permute.xlu0 %823 }
  0xc3   : > { %v960_v40 = vsel %vm956_vm9, %v943_v48, %v824_v61 }
  0xc4   : > { %v851_v30 = vpop.permute.xlu1 %850 }
  0xc5   : > { %v985_v46 = vsel %vm973_vm10, %v968_v32, %v851_v30 }
  0xc6   : > { %v843_v12 = vpop.permute.xlu0 %842 }
  0xc7   : > { %v977_v52 = vsel %vm973_vm10, %v960_v40, %v843_v12 }
  0xc8   : > { %v870_v42 = vpop.permute.xlu1 %869 }
  0xc9   : > { %v1002_v9 = vsel %vm990_vm11, %v985_v46, %v870_v42 }
  0xca   : > { %v862_v26 = vpop.permute.xlu0 %861 }
  0xcb   : > { %v994_v49 = vsel %vm990_vm11, %v977_v52, %v862_v26 }
  0xcc   : > { %v889_v58 = vpop.permute.xlu1 %888 }
  0xcd   : > { %v1024_v15 = vsel %vm1007_vm12, %v1002_v9, %v889_v58 }
  0xce   : > { %v881_v29 = vpop.permute.xlu0 %880  ;;  %1201 = vmatmul.mubr.bf16.gmra.mrb[4].mxu1 %v1024_v15 }
  0xcf   : > { %v1012_v35 = vsel %vm1007_vm12, %v994_v49, %v881_v29  ;;  %1468 = vmatprep.mubr.msk.bf16.mxu1 %vm897_vm6, %v2200_v55 }
  0xd0   : > { %1169 = vmatmul.mubr.bf16.gmra.mrb[4].mxu0 %v1012_v35  ;;  %v756_v5 = vpop.permute.xlu1 %755 }
  0xd1   : > { %1464 = vmatprep.mubr.msk.bf16.mxu0 %vm897_vm6, %v1867_v44  ;;  %v918_v17 = vsel %vm897_vm6, %v1755_v27, %v756_v5 }
  0xd2   : > { %v748_v37 = vpop.permute.xlu0 %747 }
  0xd3   : > { %v906_v13 = vsel %vm897_vm6, %v1783_v36, %v748_v37 }
  0xd4   : > { %v796_v22 = vpop.permute.xlu1 %795 }
  0xd5   : > { %v936_v34 = vsel %vm922_vm7, %v918_v17, %v796_v22 }
  0xd6   : > { %v788_v45 = vpop.permute.xlu0 %787 }
  0xd7   : > { %v928_v53 = vsel %vm922_vm7, %v906_v13, %v788_v45 }
  0xd8   : > { %v815_v11 = vpop.permute.xlu1 %814 }
  0xd9   : > { %v953_v44 = vsel %vm939_vm8, %v936_v34, %v815_v11 }
  0xda   : > { %v807_v50 = vpop.permute.xlu0 %806 }
  0xdb   : > { %v945_v43 = vsel %vm939_vm8, %v928_v53, %v807_v50 }
  0xdc   : > { %v834_v3 = vpop.permute.xlu1 %833 }
  0xdd   : > { %v970_v62 = vsel %vm956_vm9, %v953_v44, %v834_v3 }
  0xde   : > { %v826_v19 = vpop.permute.xlu0 %825 }
  0xdf   : > { %v962_v33 = vsel %vm956_vm9, %v945_v43, %v826_v19 }
  0xe0   : > { %v853_v59 = vpop.permute.xlu1 %852 }
  0xe1   : > { %v987_v57 = vsel %vm973_vm10, %v970_v62, %v853_v59 }
  0xe2   : > { %v845_v60 = vpop.permute.xlu0 %844 }
  0xe3   : > { %v979_v20 = vsel %vm973_vm10, %v962_v33, %v845_v60 }
  0xe4   : > { %v872_v55 = vpop.permute.xlu1 %871 }
  0xe5   : > { %v1004_v27 = vsel %vm990_vm11, %v987_v57, %v872_v55  ;;  %v1470_v55 = vld [vmem:[%s2340_s3] ss:$0 sm:$0xff] }
  0xe6   : > { %v864_v38 = vpop.permute.xlu0 %863 }
  0xe7   : > { %v996_v63 = vsel %vm990_vm11, %v979_v20, %v864_v38 }
  0xe8   : > { %v891_v6 = vpop.permute.xlu1 %890 }
  0xe9   : > { %v1027_v36 = vsel %vm1007_vm12, %v1004_v27, %v891_v6 }
  0xea   : > { %v883_v39 = vpop.permute.xlu0 %882  ;;  %1209 = vmatmul.mubr.bf16.gmra.mrb[8].mxu1 %v1027_v36 }
  0xeb   : > { %v1015_v31 = vsel %vm1007_vm12, %v996_v63, %v883_v39  ;;  %1469 = vmatprep.mubr.msk.bf16.mxu1 %vm897_vm6, %v1452_v18 }
  0xec   : > { %1177 = vmatmul.mubr.bf16.gmra.mrb[8].mxu0 %v1015_v31  ;;  %v758_v24 = vpop.permute.xlu1 %757 }
  0xed   : > { %1465 = vmatprep.mubr.msk.bf16.mxu0 %vm897_vm6, %v1896_v16  ;;  %v921_v30 = vsel %vm897_vm6, %v2051_v51, %v758_v24 }
  0xee   : > { %v750_v4 = vpop.permute.xlu0 %749 }
  0xef   : > { %v909_v18 = vsel %vm897_vm6, %v2101_v25, %v750_v4 }
  0xf0   : > { %v798_v7 = vpop.permute.xlu1 %797 }
  0xf1   : > { %v938_v2 = vsel %vm922_vm7, %v921_v30, %v798_v7 }
  0xf2   : > { %v790_v41 = vpop.permute.xlu0 %789 }
  0xf3   : > { %v930_v12 = vsel %vm922_vm7, %v909_v18, %v790_v41 }
  0xf4   : > { %v817_v21 = vpop.permute.xlu1 %816 }
  0xf5   : > { %v955_v16 = vsel %vm939_vm8, %v938_v2, %v817_v21 }
  0xf6   : > { %v809_v14 = vpop.permute.xlu0 %808 }
  0xf7   : > { %v947_v42 = vsel %vm939_vm8, %v930_v12, %v809_v14 }
  0xf8   : > { %v836_v8 = vpop.permute.xlu1 %835 }
  0xf9   : > { %v972_v47 = vsel %vm956_vm9, %v955_v16, %v836_v8 }
  0xfa   : > { %v828_v56 = vpop.permute.xlu0 %827 }
  0xfb   : > { %v964_v54 = vsel %vm956_vm9, %v947_v42, %v828_v56 }
  0xfc   : > { %v855_v1 = vpop.permute.xlu1 %854 }
  0xfd   : > { %v989_v23 = vsel %vm973_vm10, %v972_v47, %v855_v1 }
  0xfe   : > { %v847_v61 = vpop.permute.xlu0 %846 }
  0xff   : > { %v981_v32 = vsel %vm973_vm10, %v964_v54, %v847_v61 }
 0x100   : > { %v874_v10 = vpop.permute.xlu1 %873 }
 0x101   : > { %v1006_v51 = vsel %vm990_vm11, %v989_v23, %v874_v10 }
 0x102   : > { %v866_v0 = vpop.permute.xlu0 %865 }
 0x103   : > { %v998_v26 = vsel %vm990_vm11, %v981_v32, %v866_v0 }
 0x104   : > { %v893_v28 = vpop.permute.xlu1 %892 }
 0x105   : > { %v1030_v25 = vsel %vm1007_vm12, %v1006_v51, %v893_v28 }
 0x106   : > { %v885_v48 = vpop.permute.xlu0 %884  ;;  %1217 = vmatmul.mubr.bf16.gmra.mrb[12].mxu1 %v1030_v25 }
 0x107   : > { %v1018_v46 = vsel %vm1007_vm12, %v998_v26, %v885_v48 }
 0x108   : > { %1185 = vmatmul.mubr.bf16.gmra.mrb[12].mxu0 %v1018_v46 }
 0x185   : > { %v1194_v40 = vpop.f32.mrb[0].mxu1 }
 0x186   : > { %v1196_v9 = vpop.f32.mrb[1].mxu1 }
 0x187   : > { %v1162_v58 = vpop.f32.mrb[0].mxu0  ;;  %v1197_v52 = vpop.f32.mrb[2].mxu1 }
 0x188   : > { %v1164_v15 = vpop.f32.mrb[1].mxu0  ;;  %v1199_v49 = vpop.f32.mrb[3].mxu1 }
 0x189   : > { %v1165_v29 = vpop.f32.mrb[2].mxu0 }
 0x18a   : > { %v1167_v35 = vpop.f32.mrb[3].mxu0 }
 0x1a1   : > { %v1202_v5 = vpop.f32.mrb[4].mxu1 }
 0x1a2   : > { %v1229_v37 = vmax.f32 %v1194_v40, %v1202_v5  ;;  %v1204_v22 = vpop.f32.mrb[5].mxu1 }
 0x1a3   : > { %v1170_v45 = vpop.f32.mrb[4].mxu0  ;;  %v1205_v11 = vpop.f32.mrb[6].mxu1 }
 0x1a4   : > { %v1225_v50 = vmax.f32 %v1162_v58, %v1170_v45  ;;  %1237 = vst.msk [vmem:[#allocation2 + $0x20] sm:$0xff] %vm922_vm7, %v1229_v37  ;;  %v1172_v3 = vpop.f32.mrb[5].mxu0  ;;  %v1230_v19 = vmax.f32 %v1197_v52, %v1205_v11  ;;  %v1207_v59 = vpop.f32.mrb[7].mxu1 }
 0x1a5   : > { %v1173_v60 = vpop.f32.mrb[6].mxu0 }
 0x1a6   : > { %1233 = vst.msk [vmem:[#allocation2] sm:$0xff] %vm922_vm7, %v1225_v50  ;;  %v1226_v17 = vmax.f32 %v1165_v29, %v1173_v60  ;;  %1238 = vst.msk [vmem:[#allocation2 + $0x28] sm:$0xff] %vm922_vm7, %v1230_v19  ;;  %v1175_v34 = vpop.f32.mrb[7].mxu0 }
 0x1a8   : > { %1234 = vst.msk [vmem:[#allocation2 + $0x8] sm:$0xff] %vm922_vm7, %v1226_v17 }
 0x1ad   : > { %v1245_v13 = vld [vmem:[#allocation2 + $0x20] ss:$2 sm:$0xff]  ;;  %v1253_v44 = vld [vmem:[#allocation2 + $0x21] ss:$2 sm:$0xff] }
 0x1ae   : > { %v1258_v53 = vmax.f32 %v1245_v13, %v1253_v44 }
 0x1af   : > { %v1241_v62 = vld [vmem:[#allocation2] ss:$2 sm:$0xff]  ;;  %v1249_v38 = vld [vmem:[#allocation2 + $0x1] ss:$2 sm:$0xff] }
 0x1b0   : > { %v1256_v43 = vmax.f32 %v1241_v62, %v1249_v38  ;;  %v1269_v57 = vadd.f32 %v1470_v55, %v1258_v53 }
 0x1b2   : > { %v1267_v33 = vadd.f32 %v1470_v55, %v1256_v43  ;;  %v1273_v27 = vmax.f32 %v1269_v57, 0.0 }
 0x1b4   : > { %v1271_v6 = vmax.f32 %v1267_v33, 0.0  ;;  %v1277_v20 = vpack.c.bf16 %v1273_v27, %v1273_v27 }
 0x1b6   : > { %v1275_v36 = vpack.c.bf16 %v1271_v6, %v1271_v6  ;;  %1282 = vst.msk [vmem:[%s2308_s8 + $0x8] sm:$0xf] %vm1279_vm13, %v1277_v20 }
 0x1b8   : > { %1280 = vst.msk [vmem:[%s2308_s8] sm:$0xf] %vm1279_vm13, %v1275_v36 }
 0x1bd   : > { %v1210_v63 = vpop.f32.mrb[8].mxu1 }
 0x1be   : > { %v1212_v39 = vpop.f32.mrb[9].mxu1 }
 0x1bf   : > { %v1178_v31 = vpop.f32.mrb[8].mxu0  ;;  %v1213_v24 = vpop.f32.mrb[10].mxu1 }
 0x1c0   : > { %v1180_v4 = vpop.f32.mrb[9].mxu0  ;;  %v1215_v7 = vpop.f32.mrb[11].mxu1 }
 0x1c1   : > { %v1181_v41 = vpop.f32.mrb[10].mxu0 }
 0x1c2   : > { %v1183_v21 = vpop.f32.mrb[11].mxu0 }
 0x1d9   : > { %v1218_v14 = vpop.f32.mrb[12].mxu1 }
 0x1da   : > { %v1231_v8 = vmax.f32 %v1210_v63, %v1218_v14  ;;  %v1220_v56 = vpop.f32.mrb[13].mxu1 }
 0x1db   : > { %v1186_v1 = vpop.f32.mrb[12].mxu0  ;;  %v1221_v61 = vpop.f32.mrb[14].mxu1 }
 0x1dc   : > { %v1227_v30 = vmax.f32 %v1178_v31, %v1186_v1  ;;  %1239 = vst.msk [vmem:[#allocation2 + $0x30] sm:$0xff] %vm922_vm7, %v1231_v8  ;;  %v1188_v2 = vpop.f32.mrb[13].mxu0  ;;  %v1232_v10 = vmax.f32 %v1213_v24, %v1221_v61  ;;  %v1223_v18 = vpop.f32.mrb[15].mxu1 }
 0x1dd   : > { %v1189_v16 = vpop.f32.mrb[14].mxu0 }
 0x1de   : > { %1235 = vst.msk [vmem:[#allocation2 + $0x10] sm:$0xff] %vm922_vm7, %v1227_v30  ;;  %v1228_v12 = vmax.f32 %v1181_v41, %v1189_v16  ;;  %1240 = vst.msk [vmem:[#allocation2 + $0x38] sm:$0xff] %vm922_vm7, %v1232_v10  ;;  %v1191_v47 = vpop.f32.mrb[15].mxu0 }
 0x1e0   : > { %1236 = vst.msk [vmem:[#allocation2 + $0x18] sm:$0xff] %vm922_vm7, %v1228_v12 }
 0x1e5   : > { %v1247_v0 = vld [vmem:[#allocation2 + $0x30] ss:$2 sm:$0xff]  ;;  %v1255_v42 = vld [vmem:[#allocation2 + $0x31] ss:$2 sm:$0xff] }
 0x1e6   : > { %v1259_v23 = vmax.f32 %v1247_v0, %v1255_v42 }
 0x1e7   : > { %v1243_v54 = vld [vmem:[#allocation2 + $0x10] ss:$2 sm:$0xff]  ;;  %v1251_v51 = vld [vmem:[#allocation2 + $0x11] ss:$2 sm:$0xff] }
 0x1e8   : > { %v1257_v28 = vmax.f32 %v1243_v54, %v1251_v51  ;;  %v1270_v32 = vadd.f32 %v1470_v55, %v1259_v23 }
 0x1ea   : > { %v1268_v25 = vadd.f32 %v1470_v55, %v1257_v28  ;;  %v1274_v26 = vmax.f32 %v1270_v32, 0.0 }
 0x1ec   : > { %v1272_v48 = vmax.f32 %v1268_v25, 0.0  ;;  %v1278_v46 = vpack.c.bf16 %v1274_v26, %v1274_v26 }
 0x1ee   : > { %v1276_v40 = vpack.c.bf16 %v1272_v48, %v1272_v48  ;;  %1283 = vst.msk [vmem:[%s2308_s8 + $0xc] sm:$0xf] %vm1279_vm13, %v1278_v46 }
 0x1f0   : > { %1281 = vst.msk [vmem:[%s2308_s8 + $0x4] sm:$0xf] %vm1279_vm13, %v1276_v40 }
 0x1f1 PF: > { %s14_s19 = sadd.s32 1, %s1608_s19   ;;  %s2347_s15 = smov %s1600_s17 }
 0x1f2   : > { %p11_p9 = scmp.ge.s32.totalorder %s14_s19, 6   ;;  %s2348_s16 = smov %s1604_s18 }
 0x1f3   : > { %s2349_s17 = smov %s2352_s20  ;;  %s2350_s18 = smov %s2356_s21 }
 0x1f4   :  { %13 = sbr.rel (!%p11_p9) target bundleno = 3 (0x3), region = 76 }

// kernel: fire_cnn_forward.3
= control target key start
LH: loop header
LB: loop body
LE: loop exit
PB: predicated region body
PF: predicated region fallthrough
CT: control target
= control target key end

     0   :  { %s4241_s15 = smov 0   ;;  %s4243_s16 = smov 0   ;;  %s6701_s0 = inlined_call_operand.vmem [shape: bf16[2,34,34,3], index: 0, kind: input, shape index: {}, may-alias: {0,1}]   ;;  %s6702_s1 = inlined_call_operand.vmem [shape: bf16[2,34,34,3], index: 1, kind: input, shape index: {}, may-alias: {0,1}]   ;;  %s6703_s2 = inlined_call_operand.vmem [shape: bf16[27,16], index: 2, kind: input, shape index: {}]   ;;  %s6704_s3 = inlined_call_operand.vmem [shape: f32[1,16], index: 3, kind: input, shape index: {}]   ;;  %s6705_s4 = inlined_call_operand.vmem [shape: bf16[2,16,16,16], index: 4, kind: output, shape index: {}]  }
   0x1   :  { %s4245_s17 = smov 0   ;;  %s4247_s18 = smov 0  }
   0x2   :  { %s4249_s19 = smov 0  }
   0x3 LB: > { %s23_s20 = sadd.s32 1, %s4197_s17  ;;  %s26_s21 = sadd.s32 1, %s4201_s18  ;;  %s4205_s19 = sphi %s4249_s19, %s14_s19   ;;  %s4201_s18 = sphi %s4247_s18, %s7145_s18   ;;  %s4197_s17 = sphi %s4245_s17, %s7144_s17   ;;  %s4193_s16 = sphi %s4243_s16, %s7143_s16   ;;  %s4189_s15 = sphi %s4241_s15, %s7142_s15  }
   0x4   : > { %p24_p0 = scmp.ge.s32.totalorder %s23_s20, 2  ;;  %p3687_p1 = scmp.ge.s32.totalorder %s4205_s19, 1 }
   0x5   : > { %p220_p2 = scmp.lt.s32.totalorder %s4205_s19, 5 }
   0x6   : > { %s7147_s20 = smov (%p24_p0, %s23_s20), 0  ;;  %s7149_s21 = smov (!%p24_p0, %s26_s21), %s4201_s18 }
   0x7   : > { %p221_p3 = pnand %p3687_p1, %p220_p2  ;;  %p28_p4 = scmp.ge.s32.totalorder %s7149_s21, 2 }
   0x9   : > { %s7151_s21 = smov (%p28_p4, %s7149_s21), 0  ;;  %224 = sbr.rel (%p221_p3) target bundleno = 961 (0x3c1), region = 36 }
  0x10   : > { %s4274_s22 = sshll.u32 %s4189_s15, 4  ;;  %p279_p5 = scmp.lt.s32.totalorder %s4193_s16, 1  ;;  %vm411_vm0 = vsmask.f32 3328  ;;  %vm412_vm1 = vsmask.f32 7440 }
  0x11   : > { %p281_p6 = scmp.lt.s32.totalorder %s4274_s22, 33  ;;  %vm4296_vm2 = vmor %vm411_vm0, %vm412_vm1  ;;  %v6837_v24 = vmov 0  ;;  %s4207_s5 = smov 3   ;;  %vm1198_vm3 = vcmask 1042432   ;;  %vm1199_vm4 = vcmask 1046532   ;;  %vm3001_vm6 = vcmask 1044480  }
  0x12   : > { %s7153_s16 = smov (!%p279_p5, %s4193_s16), 1  ;;  %v6838_v24 = vsel %vm4296_vm2, 4294967295, %v6837_v24  ;;  %vm4873_vm5 = vmor %vm1198_vm3, %vm1199_vm4  ;;  %s4208_s6 = smov 6   ;;  %vm3002_vm7 = vcmask 1045504   ;;  %vm2369_vm8 = vcmask 23552   ;;  %vm2466_vm9 = vcmask 48128  }
  0x13   : > { %s282_s23 = scalar_select %p281_p6, %s4274_s22, 33  ;;  %6839 = vst [vmem:[#allocation3_spill] sm:$0xff] %v6838_v24  ;;  %vm2531_vm10 = vcmask 72704   ;;  %vm2596_vm11 = vcmask 97280   ;;  %vm2661_vm12 = vcmask 121856   ;;  %vm2726_vm13 = vcmask 146432  }
  0x14   : > { %s4008_s24 = smul.u32 170, %s7153_s16  ;;  %s4209_s7 = smov 9   ;;  %vm2791_vm14 = vcmask 171008   ;;  %vm2856_vm15 = vcmask 195584   ;;  %vm2936_vm0 = vcmask 220160   ;;  %vm3329_vm1 = vcmask 130048  }
  0x15   : > { %s4007_s25 = smul.u32 5, %s282_s23  ;;  %s4210_s8 = smov 12  }
  0x16   : > { %s4211_s9 = smov 15   ;;  %s4212_s10 = smov 18  }
  0x17   : > { %s285_s26 = sadd.s32 %s4008_s24, %s4007_s25  ;;  %s4214_s23 = smov 21  }
  0x18   : > { %s3689_s27 = sshll.u32 %s285_s26, 2  ;;  %s4215_s25 = smov 24  }
  0x19   : > { %s4286_s30 = scalar_lea.vmem %s6701_s0, %s3689_s27  ;;  %s3900_s26 = sadd.s32 16, %s4274_s22 }
  0x1a   : > { %v326_v0 = vld [vmem:[%s4286_s30 + $0x14] sm:$0xf]  ;;  %v327_v1 = vld [vmem:[%s4286_s30 + $0x18] sm:$0xf]  ;;  %v328_v2 = vld [vmem:[%s4286_s30 + $0x1c] sm:$0xf] }
  0x1b   : > { %v459_v3 = vshrl.u32 %v326_v0, 16  ;;  %v462_v4 = vshll.u32 %v326_v0, 16  ;;  %v468_v5 = vshll.u32 %v327_v1, 16  ;;  %v472_v6 = vshrl.u32 %v327_v1, 16  ;;  %v321_v7 = vld [vmem:[%s4286_s30] sm:$0xf] }
  0x1c   : > { %v478_v8 = vshll.u32 %v328_v2, 16  ;;  %v482_v9 = vshrl.u32 %v328_v2, 16  ;;  %v322_v10 = vld [vmem:[%s4286_s30 + $0x4] sm:$0xf]  ;;  %v323_v15 = vld [vmem:[%s4286_s30 + $0x8] sm:$0xf] }
  0x1d   : > { %v461_v11 = vrot.slane %v459_v3, 4  ;;  %v464_v12 = vrot.slane %v462_v4, 5  ;;  %v470_v13 = vrot.slane %v468_v5, 5  ;;  %v474_v14 = vrot.slane %v472_v6, 4  ;;  %v329_v29 = vld [vmem:[%s4286_s30 + $0x20] sm:$0xf] }
  0x1e   : > { %v480_v16 = vrot.slane %v478_v8, 5  ;;  %v484_v17 = vrot.slane %v482_v9, 4  ;;  %v415_v18 = vshrl.u32 %v321_v7, 16  ;;  %v418_v19 = vshll.u32 %v321_v7, 16  ;;  %v330_v34 = vld [vmem:[%s4286_s30 + $0x24] sm:$0x1] }
  0x1f   : > { %v465_v20 = vor.u32 %v464_v12, %v461_v11  ;;  %v475_v21 = vor.u32 %v474_v14, %v470_v13  ;;  %v424_v22 = vshll.u32 %v322_v10, 16  ;;  %v428_v23 = vshrl.u32 %v322_v10, 16  ;;  %v324_v39 = vld [vmem:[%s4286_s30 + $0xc] sm:$0xf]  ;;  %v325_v51 = vld [vmem:[%s4286_s30 + $0x10] sm:$0x1] }
  0x20   : > { %v485_v25 = vor.u32 %v484_v17, %v480_v16  ;;  %v417_v26 = vrot.slane %v415_v18, 4  ;;  %v420_v27 = vrot.slane %v418_v19, 5  ;;  %v434_v28 = vshll.u32 %v323_v15, 16  ;;  %v333_v57 = vld [vmem:[%s4286_s30 + $0x30] sm:$0xf]  ;;  %p299_p7 = scmp.lt.s32.totalorder %s3900_s26, 33 }
  0x21   : > { %v466_v30 = vrot.slane %v465_v20, 4  ;;  %v476_v31 = vrot.slane %v475_v21, 4  ;;  %v426_v32 = vrot.slane %v424_v22, 5  ;;  %v430_v33 = vrot.slane %v428_v23, 4  ;;  %v334_v58 = vld [vmem:[%s4286_s30 + $0x34] sm:$0xf] }
  0x22   : > { %v421_v35 = vor.u32 %v420_v27, %v417_v26  ;;  %v436_v36 = vrot.slane %v434_v28, 5  ;;  %v438_v37 = vshrl.u32 %v323_v15, 16  ;;  %v486_v38 = vrot.slane %v485_v25, 4  ;;  %v335_v4 = vld [vmem:[%s4286_s30 + $0x38] sm:$0x1]  ;;  %s7155_s26 = smov (!%p299_p7, %s3900_s26), 33 }
  0x23   : > { %v471_v40 = vsel %vm4296_vm2, %v466_v30, %v470_v13  ;;  %v481_v41 = vsel %vm4296_vm2, %v476_v31, %v480_v16  ;;  %v431_v42 = vor.u32 %v430_v33, %v426_v32  ;;  %v488_v43 = vshll.u32 %v329_v29, 16  ;;  %v331_v12 = vld [vmem:[%s4286_s30 + $0x28] sm:$0xf]  ;;  %v332_v17 = vld [vmem:[%s4286_s30 + $0x2c] sm:$0xf]  ;;  %s4009_s22 = smul.u32 5, %s7155_s26 }
  0x24   : > { %v4307_v44 = vcombine.low %v471_v40, %v481_v41  ;;  %v422_v45 = vrot.slane %v421_v35, 4  ;;  %v440_v46 = vrot.slane %v438_v37, 4  ;;  %v492_v47 = vshrl.u32 %v329_v29, 16  ;;  %v338_v27 = vld [vmem:[%s4286_s30 + $0x44] sm:$0xf] }
  0x25   : > { %v432_v48 = vrot.slane %v431_v42, 4  ;;  %v490_v49 = vrot.slane %v488_v43, 5  ;;  %v498_v50 = vshll.u32 %v330_v34, 16  ;;  %v444_v52 = vshll.u32 %v324_v39, 16  ;;  %v340_v43 = vld [vmem:[%s4286_s30 + $0x4c] sm:$0x1]  ;;  %s303_s27 = sadd.s32 %s4009_s22, %s4008_s24 }
  0x26   : > { %6840 = vst [vmem:[#allocation4_spill] sm:$0xff] %v4307_v44  ;;  %1729 = vrot.lane.b32.xlu1 %v4307_v44, %s4207_s5  ;;  %v427_v53 = vsel %vm4296_vm2, %v422_v45, %v426_v32  ;;  %v441_v54 = vor.u32 %v440_v46, %v436_v36  ;;  %v494_v55 = vrot.slane %v492_v47, 4  ;;  %v448_v56 = vshrl.u32 %v324_v39, 16  ;;  %v339_v32 = vld [vmem:[%s4286_s30 + $0x48] sm:$0xf]  ;;  %s3692_s28 = sshll.u32 %s303_s27, 2 }
  0x27   : > { %v437_v59 = vsel %vm4296_vm2, %v432_v48, %v436_v36  ;;  %v491_v60 = vsel %vm4296_vm2, %v486_v38, %v490_v49  ;;  %v500_v61 = vrot.slane %v498_v50, 5  ;;  %v446_v62 = vrot.slane %v444_v52, 5  ;;  %v336_v47 = vld [vmem:[%s4286_s30 + $0x3c] sm:$0xf]  ;;  %v337_v52 = vld [vmem:[%s4286_s30 + $0x40] sm:$0xf] }
  0x28   : > { %v3747_v63 = vcombine.low %v427_v53, %v437_v59  ;;  %v495_v0 = vor.u32 %v494_v55, %v490_v49  ;;  %v442_v1 = vrot.slane %v441_v54, 4  ;;  %v450_v2 = vrot.slane %v448_v56, 4  ;;  %v4954_v24 = vld [vmem:[%s4286_s30 + $0x48] sm:$0xf]  ;;  %s3693_s24 = sshll.u32 %s4189_s15, 3 }
  0x29   : > { %v454_v3 = vshll.u32 %v325_v51, 16  ;;  %v522_v5 = vshll.u32 %v333_v57, 16  ;;  %v526_v6 = vshrl.u32 %v333_v57, 16  ;;  %v532_v7 = vshll.u32 %v334_v58, 16  ;;  %6898 = vst [vmem:[#allocation60_spill] sm:$0xff] %v4954_v24  ;;  %p6478_p8 = scmp.lt.s32.totalorder %s3693_s24, 15 }
  0x2a   : > { %1725 = vrot.lane.b32.xlu0 %v3747_v63, %s4207_s5  ;;  %v496_v8 = vrot.slane %v495_v0, 4  ;;  %v447_v9 = vsel %vm4296_vm2, %v442_v1, %v446_v62  ;;  %v451_v10 = vor.u32 %v450_v2, %v446_v62  ;;  %v536_v11 = vshrl.u32 %v334_v58, 16  ;;  %v343_v1 = vld [vmem:[%s4286_s30 + $0x58] sm:$0xf] }
  0x2b   : > { %v456_v13 = vrot.slane %v454_v3, 5  ;;  %v4325_v14 = vrot.slane %v522_v5, 5  ;;  %v528_v15 = vrot.slane %v526_v6, 4  ;;  %v534_v16 = vrot.slane %v532_v7, 5  ;;  %s7157_s24 = smov (!%p6478_p8, %s3693_s24), 15 }
  0x2c   : > { %v501_v18 = vsel %vm4296_vm2, %v496_v8, %v500_v61  ;;  %v452_v19 = vrot.slane %v451_v10, 4  ;;  %v538_v20 = vrot.slane %v536_v11, 4  ;;  %v542_v21 = vshll.u32 %v335_v4, 16  ;;  %v344_v10 = vld [vmem:[%s4286_s30 + $0x5c] sm:$0xf] }
  0x2d   : > { %v4330_v22 = vcombine.low %v491_v60, %v501_v18  ;;  %v529_v23 = vor.u32 %v528_v15, %v4325_v14  ;;  %v503_v25 = vshrl.u32 %v331_v12, 16  ;;  %v506_v26 = vshll.u32 %v331_v12, 16 }
  0x2e   : > { %v457_v28 = vsel %vm4296_vm2, %v452_v19, %v456_v13  ;;  %v539_v29 = vor.u32 %v538_v20, %v534_v16  ;;  %v544_v30 = vrot.slane %v542_v21, 5  ;;  %v512_v31 = vshll.u32 %v332_v17, 16  ;;  %v345_v20 = vld [vmem:[%s4286_s30 + $0x60] sm:$0x1]  ;;  %v341_v21 = vld [vmem:[%s4286_s30 + $0x50] sm:$0xf] }
  0x2f   : > { %6841 = vst [vmem:[#allocation5_spill] sm:$0xff] %v4330_v22  ;;  %1731 = vrot.lane.b32.xlu1 %v4330_v22, %s4207_s5  ;;  %v3748_v33 = vcombine.low %v447_v9, %v457_v28  ;;  %v530_v34 = vrot.slane %v529_v23, 4  ;;  %v505_v35 = vrot.slane %v503_v25, 4  ;;  %v508_v36 = vrot.slane %v506_v26, 5 }
  0x30   : > { %v540_v37 = vrot.slane %v539_v29, 4  ;;  %v514_v38 = vrot.slane %v512_v31, 5  ;;  %v516_v39 = vshrl.u32 %v332_v17, 16  ;;  %v566_v40 = vshll.u32 %v338_v27, 16  ;;  %v342_v31 = vld [vmem:[%s4286_s30 + $0x54] sm:$0xf] }
  0x31   : > { %1727 = vrot.lane.b32.xlu0 %v3748_v33, %s4207_s5  ;;  %v535_v41 = vsel %vm4296_vm2, %v530_v34, %v534_v16  ;;  %v509_v42 = vor.u32 %v508_v36, %v505_v35  ;;  %v570_v45 = vshrl.u32 %v338_v27, 16  ;;  %v576_v46 = vshll.u32 %v339_v32, 16 }
  0x32   : > { %v545_v48 = vsel %vm4296_vm2, %v540_v37, %v544_v30  ;;  %v518_v49 = vrot.slane %v516_v39, 4  ;;  %v4346_v50 = vrot.slane %v566_v40, 5  ;;  %v580_v51 = vshrl.u32 %v339_v32, 16  ;;  %v348_v40 = vld [vmem:[%s4286_s30 + $0x6c] sm:$0xf] }
  0x33   : > { %v4349_v53 = vcombine.low %v535_v41, %v545_v48  ;;  %v510_v54 = vrot.slane %v509_v42, 4  ;;  %v572_v55 = vrot.slane %v570_v45, 4  ;;  %v578_v56 = vrot.slane %v576_v46, 5 }
  0x34   : > { %v519_v57 = vor.u32 %v518_v49, %v514_v38  ;;  %v582_v58 = vrot.slane %v580_v51, 4  ;;  %v586_v59 = vshll.u32 %v340_v43, 16  ;;  %v547_v60 = vshrl.u32 %v336_v47, 16  ;;  %v349_v51 = vld [vmem:[%s4286_s30 + $0x70] sm:$0xf] }
  0x35   : > { %6842 = vst [vmem:[#allocation6_spill] sm:$0xff] %v4349_v53  ;;  %1735 = vrot.lane.b32.xlu1 %v4349_v53, %s4207_s5  ;;  %v515_v61 = vsel %vm4296_vm2, %v510_v54, %v514_v38  ;;  %v573_v62 = vor.u32 %v572_v55, %v4346_v50  ;;  %v550_v63 = vshll.u32 %v336_v47, 16  ;;  %v556_v0 = vshll.u32 %v337_v52, 16 }
  0x36   : > { %v520_v2 = vrot.slane %v519_v57, 4  ;;  %v583_v3 = vor.u32 %v582_v58, %v578_v56  ;;  %v588_v4 = vrot.slane %v586_v59, 5  ;;  %v549_v5 = vrot.slane %v547_v60, 4 }
  0x37   : > { %v574_v6 = vrot.slane %v573_v62, 4  ;;  %v552_v7 = vrot.slane %v550_v63, 5  ;;  %v558_v8 = vrot.slane %v556_v0, 5  ;;  %v560_v9 = vshrl.u32 %v337_v52, 16  ;;  %v350_v52 = vld [vmem:[%s4286_s30 + $0x74] sm:$0x1] }
  0x38   : > { %v525_v11 = vsel %vm4296_vm2, %v520_v2, %v4325_v14  ;;  %v584_v12 = vrot.slane %v583_v3, 4  ;;  %v610_v13 = vshll.u32 %v343_v1, 16  ;;  %v614_v15 = vshrl.u32 %v343_v1, 16  ;;  %v346_v1 = vld [vmem:[%s4286_s30 + $0x64] sm:$0xf] }
  0x39   : > { %v4361_v16 = vcombine.low %v515_v61, %v525_v11  ;;  %v579_v17 = vsel %vm4296_vm2, %v574_v6, %v578_v56  ;;  %v553_v18 = vor.u32 %v552_v7, %v549_v5  ;;  %v562_v19 = vrot.slane %v560_v9, 4  ;;  %v4399_v6 = vld [vmem:[%s4286_s30 + $0x68] sm:$0xf]  ;;  %v4404_v11 = vld [vmem:[%s4286_s30 + $0x80] sm:$0xf] }
  0x3a   : > { %v589_v23 = vsel %vm4296_vm2, %v584_v12, %v588_v4  ;;  %v4369_v25 = vrot.slane %v610_v13, 5  ;;  %v616_v26 = vrot.slane %v614_v15, 4  ;;  %v620_v14 = vshll.u32 %v344_v10, 16 }
  0x3b   : > { %6843 = vst [vmem:[#allocation7_spill] sm:$0xff] %v4361_v16  ;;  %1733 = vrot.lane.b32.xlu0 %v4361_v16, %s4207_s5  ;;  %v4373_v27 = vcombine.low %v579_v17, %v589_v23  ;;  %v554_v28 = vrot.slane %v553_v18, 4  ;;  %v563_v29 = vor.u32 %v562_v19, %v558_v8  ;;  %v624_v30 = vshrl.u32 %v344_v10, 16 }
  0x3c   : > { %v617_v32 = vor.u32 %v616_v26, %v4369_v25  ;;  %v622_v33 = vrot.slane %v620_v14, 5  ;;  %v630_v34 = vshll.u32 %v345_v20, 16  ;;  %v591_v35 = vshrl.u32 %v341_v21, 16 }
  0x3d   : > { %6844 = vst [vmem:[#allocation8_spill] sm:$0xff] %v4373_v27  ;;  %1739 = vrot.lane.b32.xlu1 %v4373_v27, %s4207_s5  ;;  %v559_v36 = vsel %vm4296_vm2, %v554_v28, %v558_v8  ;;  %v564_v37 = vrot.slane %v563_v29, 4  ;;  %v626_v38 = vrot.slane %v624_v30, 4  ;;  %v594_v39 = vshll.u32 %v341_v21, 16  ;;  %v4417_v28 = vld [vmem:[%s4286_s30 + $0x84] sm:$0xf] }
  0x3e   : > { %v618_v41 = vrot.slane %v617_v32, 4  ;;  %v632_v42 = vrot.slane %v630_v34, 5  ;;  %v593_v43 = vrot.slane %v591_v35, 4  ;;  %v600_v45 = vshll.u32 %v342_v31, 16  ;;  %v4423_v34 = vld [vmem:[%s4286_s30 + $0x88] sm:$0x1] }
  0x3f   : > { %v569_v46 = vsel %vm4296_vm2, %v564_v37, %v4346_v50  ;;  %v627_v47 = vor.u32 %v626_v38, %v622_v33  ;;  %v596_v48 = vrot.slane %v594_v39, 5  ;;  %v604_v49 = vshrl.u32 %v342_v31, 16  ;;  %v4431_v38 = vld [vmem:[%s4286_s30 + $0x78] sm:$0xf] }
  0x40   : > { %v4387_v54 = vcombine.low %v559_v36, %v569_v46  ;;  %v623_v55 = vsel %vm4296_vm2, %v618_v41, %v622_v33  ;;  %v602_v56 = vrot.slane %v600_v45, 5  ;;  %v654_v57 = vshll.u32 %v348_v40, 16 }
  0x41   : > { %v628_v58 = vrot.slane %v627_v47, 4  ;;  %v597_v59 = vor.u32 %v596_v48, %v593_v43  ;;  %v606_v60 = vrot.slane %v604_v49, 4  ;;  %v658_v61 = vshrl.u32 %v348_v40, 16  ;;  %v4443_v48 = vld [vmem:[%s4286_s30 + $0x7c] sm:$0xf] }
  0x42   : > { %6845 = vst [vmem:[#allocation9_spill] sm:$0xff] %v4387_v54  ;;  %1737 = vrot.lane.b32.xlu0 %v4387_v54, %s4207_s5  ;;  %v4393_v50 = vrot.slane %v654_v57, 5  ;;  %v664_v62 = vshll.u32 %v349_v51, 16  ;;  %v668_v63 = vshrl.u32 %v349_v51, 16  ;;  %v674_v0 = vshll.u32 %v350_v52, 16 }
  0x43   : > { %v633_v2 = vsel %vm4296_vm2, %v628_v58, %v632_v42  ;;  %v598_v3 = vrot.slane %v597_v59, 4  ;;  %v607_v4 = vor.u32 %v606_v60, %v602_v56  ;;  %v660_v5 = vrot.slane %v658_v61, 4  ;;  %v4451_v60 = vld [vmem:[%s4286_s30 + $0x94] sm:$0xf]  ;;  %v4689_v54 = vld [vmem:[%s4286_s30 + $0x100] sm:$0x1] }
  0x44   : > { %v4401_v7 = vcombine.low %v623_v55, %v633_v2  ;;  %v666_v8 = vrot.slane %v664_v62, 5  ;;  %v670_v9 = vrot.slane %v668_v63, 4  ;;  %v676_v10 = vrot.slane %v674_v0, 5 }
  0x45   : > { %v603_v12 = vsel %vm4296_vm2, %v598_v3, %v602_v56  ;;  %v608_v13 = vrot.slane %v607_v4, 4  ;;  %v661_v15 = vor.u32 %v660_v5, %v4393_v50  ;;  %v635_v17 = vshrl.u32 %v346_v1, 16  ;;  %v4461_v5 = vld [vmem:[%s4286_s30 + $0x98] sm:$0xf] }
  0x46   : > { %6846 = vst [vmem:[#allocation10_spill] sm:$0xff] %v4401_v7  ;;  %1743 = vrot.lane.b32.xlu1 %v4401_v7, %s4207_s5  ;;  %v671_v18 = vor.u32 %v670_v9, %v666_v8  ;;  %v638_v19 = vshll.u32 %v346_v1, 16  ;;  %v644_v20 = vshll.u32 %v4399_v6, 16  ;;  %v648_v21 = vshrl.u32 %v4399_v6, 16 }
  0x47   : > { %v613_v23 = vsel %vm4296_vm2, %v608_v13, %v4369_v25  ;;  %v662_v26 = vrot.slane %v661_v15, 4  ;;  %v637_v14 = vrot.slane %v635_v17, 4  ;;  %v698_v29 = vshll.u32 %v4404_v11, 16 }
  0x48   : > { %v4420_v30 = vcombine.low %v603_v12, %v613_v23  ;;  %v672_v31 = vrot.slane %v671_v18, 4  ;;  %v640_v32 = vrot.slane %v638_v19, 5  ;;  %v646_v33 = vrot.slane %v644_v20, 5  ;;  %v4469_v18 = vld [vmem:[%s4286_s30 + $0x9c] sm:$0x1] }
  0x49   : > { %v667_v35 = vsel %vm4296_vm2, %v662_v26, %v666_v8  ;;  %v650_v36 = vrot.slane %v648_v21, 4  ;;  %v4427_v37 = vrot.slane %v698_v29, 5  ;;  %v702_v25 = vshrl.u32 %v4404_v11, 16  ;;  %v4473_v19 = vld [vmem:[%s4286_s30 + $0x8c] sm:$0xf] }
  0x4a   : > { %6847 = vst [vmem:[#allocation11_spill] sm:$0xff] %v4420_v30  ;;  %1741 = vrot.lane.b32.xlu0 %v4420_v30, %s4207_s5  ;;  %v677_v39 = vsel %vm4296_vm2, %v672_v31, %v676_v10  ;;  %v641_v40 = vor.u32 %v640_v32, %v637_v14  ;;  %v708_v41 = vshll.u32 %v4417_v28, 16  ;;  %v712_v42 = vshrl.u32 %v4417_v28, 16 }
  0x4b   : > { %v4439_v43 = vcombine.low %v667_v35, %v677_v39  ;;  %v651_v45 = vor.u32 %v650_v36, %v646_v33  ;;  %v704_v46 = vrot.slane %v702_v25, 4  ;;  %v718_v47 = vshll.u32 %v4423_v34, 16 }
  0x4c   : > { %v642_v49 = vrot.slane %v641_v40, 4  ;;  %v710_v51 = vrot.slane %v708_v41, 5  ;;  %v714_v52 = vrot.slane %v712_v42, 4  ;;  %v679_v55 = vshrl.u32 %v4431_v38, 16 }
  0x4d   : > { %6848 = vst [vmem:[#allocation12_spill] sm:$0xff] %v4439_v43  ;;  %1747 = vrot.lane.b32.xlu1 %v4439_v43, %s4207_s5  ;;  %v652_v56 = vrot.slane %v651_v45, 4  ;;  %v705_v57 = vor.u32 %v704_v46, %v4427_v37  ;;  %v720_v58 = vrot.slane %v718_v47, 5  ;;  %v682_v59 = vshll.u32 %v4431_v38, 16  ;;  %v4497_v46 = vld [vmem:[%s4286_s30 + $0xa8] sm:$0xf] }
  0x4e   : > { %v647_v61 = vsel %vm4296_vm2, %v642_v49, %v646_v33  ;;  %v715_v62 = vor.u32 %v714_v52, %v710_v51  ;;  %v681_v63 = vrot.slane %v679_v55, 4  ;;  %v688_v0 = vshll.u32 %v4443_v48, 16  ;;  %v4486_v33 = vld [vmem:[%s4286_s30 + $0x90] sm:$0xf] }
  0x4f   : > { %v657_v1 = vsel %vm4296_vm2, %v652_v56, %v4393_v50  ;;  %v706_v2 = vrot.slane %v705_v57, 4  ;;  %v684_v3 = vrot.slane %v682_v59, 5  ;;  %v692_v4 = vshrl.u32 %v4443_v48, 16  ;;  %v4505_v59 = vld [vmem:[%s4286_s30 + $0xac] sm:$0xf] }
  0x50   : > { %v4463_v8 = vcombine.low %v647_v61, %v657_v1  ;;  %v716_v9 = vrot.slane %v715_v62, 4  ;;  %v690_v10 = vrot.slane %v688_v0, 5  ;;  %v742_v12 = vshll.u32 %v4451_v60, 16 }
  0x51   : > { %v711_v13 = vsel %vm4296_vm2, %v706_v2, %v710_v51  ;;  %v685_v15 = vor.u32 %v684_v3, %v681_v63  ;;  %v694_v17 = vrot.slane %v692_v4, 4  ;;  %v746_v50 = vshrl.u32 %v4451_v60, 16  ;;  %v4513_v4 = vld [vmem:[%s4286_s30 + $0xb0] sm:$0x1] }
  0x52   : > { %6849 = vst [vmem:[#allocation13_spill] sm:$0xff] %v4463_v8  ;;  %1745 = vrot.lane.b32.xlu0 %v4463_v8, %s4207_s5  ;;  %v721_v20 = vsel %vm4296_vm2, %v716_v9, %v720_v58  ;;  %v4479_v21 = vrot.slane %v742_v12, 5  ;;  %v752_v23 = vshll.u32 %v4461_v5, 16  ;;  %v756_v26 = vshrl.u32 %v4461_v5, 16  ;;  %v4517_v9 = vld [vmem:[%s4286_s30 + $0xa0] sm:$0xf] }
  0x53   : > { %v4483_v14 = vcombine.low %v711_v13, %v721_v20  ;;  %v686_v29 = vrot.slane %v685_v15, 4  ;;  %v695_v31 = vor.u32 %v694_v17, %v690_v10  ;;  %v748_v32 = vrot.slane %v746_v50, 4 }
  0x54   : > { %v754_v35 = vrot.slane %v752_v23, 5  ;;  %v758_v36 = vrot.slane %v756_v26, 4  ;;  %v762_v25 = vshll.u32 %v4469_v18, 16  ;;  %v723_v39 = vshrl.u32 %v4473_v19, 16  ;;  %v4530_v26 = vld [vmem:[%s4286_s30 + $0xa4] sm:$0xf] }
  0x55   : > { %6850 = vst [vmem:[#allocation14_spill] sm:$0xff] %v4483_v14  ;;  %1751 = vrot.lane.b32.xlu1 %v4483_v14, %s4207_s5  ;;  %v691_v40 = vsel %vm4296_vm2, %v686_v29, %v690_v10  ;;  %v696_v41 = vrot.slane %v695_v31, 4  ;;  %v749_v42 = vor.u32 %v748_v32, %v4479_v21  ;;  %v726_v45 = vshll.u32 %v4473_v19, 16  ;;  %v4645_v14 = vld [vmem:[%s4286_s30 + $0xec] sm:$0x1] }
  0x56   : > { %v759_v47 = vor.u32 %v758_v36, %v754_v35  ;;  %v764_v49 = vrot.slane %v762_v25, 5  ;;  %v725_v51 = vrot.slane %v723_v39, 4  ;;  %v732_v52 = vshll.u32 %v4486_v33, 16 }
  0x57   : > { %v701_v55 = vsel %vm4296_vm2, %v696_v41, %v4427_v37  ;;  %v750_v56 = vrot.slane %v749_v42, 4  ;;  %v728_v57 = vrot.slane %v726_v45, 5  ;;  %v736_v58 = vshrl.u32 %v4486_v33, 16  ;;  %v4541_v41 = vld [vmem:[%s4286_s30 + $0xbc] sm:$0xf] }
  0x58   : > { %v4507_v61 = vcombine.low %v691_v40, %v701_v55  ;;  %v760_v62 = vrot.slane %v759_v47, 4  ;;  %v734_v63 = vrot.slane %v732_v52, 5  ;;  %v786_v0 = vshll.u32 %v4497_v46, 16 }
  0x59   : > { %v755_v1 = vsel %vm4296_vm2, %v750_v56, %v754_v35  ;;  %v729_v2 = vor.u32 %v728_v57, %v725_v51  ;;  %v738_v3 = vrot.slane %v736_v58, 4  ;;  %v790_v37 = vshrl.u32 %v4497_v46, 16  ;;  %v4549_v57 = vld [vmem:[%s4286_s30 + $0xc0] sm:$0xf] }
  0x5a   : > { %6851 = vst [vmem:[#allocation15_spill] sm:$0xff] %v4507_v61  ;;  %1749 = vrot.lane.b32.xlu0 %v4507_v61, %s4207_s5  ;;  %v765_v10 = vsel %vm4296_vm2, %v760_v62, %v764_v49  ;;  %v4523_v12 = vrot.slane %v786_v0, 5  ;;  %v796_v13 = vshll.u32 %v4505_v59, 16  ;;  %v800_v15 = vshrl.u32 %v4505_v59, 16 }
  0x5b   : > { %v4527_v17 = vcombine.low %v755_v1, %v765_v10  ;;  %v730_v50 = vrot.slane %v729_v2, 4  ;;  %v739_v20 = vor.u32 %v738_v3, %v734_v63  ;;  %v792_v23 = vrot.slane %v790_v37, 4  ;;  %v4557_v37 = vld [vmem:[%s4286_s30 + $0xc4] sm:$0x1]  ;;  %v4561_v10 = vld [vmem:[%s4286_s30 + $0xb4] sm:$0xf] }
  0x5c   : > { %v798_v29 = vrot.slane %v796_v13, 5  ;;  %v802_v31 = vrot.slane %v800_v15, 4  ;;  %v806_v32 = vshll.u32 %v4513_v4, 16  ;;  %v767_v35 = vshrl.u32 %v4517_v9, 16 }
  0x5d   : > { %6852 = vst [vmem:[#allocation16_spill] sm:$0xff] %v4527_v17  ;;  %1755 = vrot.lane.b32.xlu1 %v4527_v17, %s4207_s5  ;;  %v735_v36 = vsel %vm4296_vm2, %v730_v50, %v734_v63  ;;  %v740_v25 = vrot.slane %v739_v20, 4  ;;  %v793_v39 = vor.u32 %v792_v23, %v4523_v12  ;;  %v770_v40 = vshll.u32 %v4517_v9, 16 }
  0x5e   : > { %v803_v42 = vor.u32 %v802_v31, %v798_v29  ;;  %v808_v45 = vrot.slane %v806_v32, 5  ;;  %v769_v47 = vrot.slane %v767_v35, 4  ;;  %v776_v49 = vshll.u32 %v4530_v26, 16  ;;  %v4574_v35 = vld [vmem:[%s4286_s30 + $0xb8] sm:$0xf] }
  0x5f   : > { %v745_v51 = vsel %vm4296_vm2, %v740_v25, %v4479_v21  ;;  %v794_v52 = vrot.slane %v793_v39, 4  ;;  %v772_v55 = vrot.slane %v770_v40, 5  ;;  %v780_v56 = vshrl.u32 %v4530_v26, 16 }
  0x60   : > { %v4551_v58 = vcombine.low %v735_v36, %v745_v51  ;;  %v804_v62 = vrot.slane %v803_v42, 4  ;;  %v778_v63 = vrot.slane %v776_v49, 5  ;;  %v830_v0 = vshll.u32 %v4541_v41, 16  ;;  %v4585_v51 = vld [vmem:[%s4286_s30 + $0xd0] sm:$0xf] }
  0x61   : > { %v799_v1 = vsel %vm4296_vm2, %v794_v52, %v798_v29  ;;  %v773_v2 = vor.u32 %v772_v55, %v769_v47  ;;  %v782_v3 = vrot.slane %v780_v56, 4  ;;  %v834_v21 = vshrl.u32 %v4541_v41, 16 }
  0x62   : > { %6853 = vst [vmem:[#allocation17_spill] sm:$0xff] %v4551_v58  ;;  %1753 = vrot.lane.b32.xlu0 %v4551_v58, %s4207_s5  ;;  %v809_v13 = vsel %vm4296_vm2, %v804_v62, %v808_v45  ;;  %v4567_v15 = vrot.slane %v830_v0, 5  ;;  %v840_v50 = vshll.u32 %v4549_v57, 16  ;;  %v844_v20 = vshrl.u32 %v4549_v57, 16 }
  0x63   : > { %v4571_v23 = vcombine.low %v799_v1, %v809_v13  ;;  %v774_v29 = vrot.slane %v773_v2, 4  ;;  %v783_v31 = vor.u32 %v782_v3, %v778_v63  ;;  %v836_v32 = vrot.slane %v834_v21, 4  ;;  %v4593_v3 = vld [vmem:[%s4286_s30 + $0xd4] sm:$0xf] }
  0x64   : > { %v842_v36 = vrot.slane %v840_v50, 5  ;;  %v846_v25 = vrot.slane %v844_v20, 4  ;;  %v850_v39 = vshll.u32 %v4557_v37, 16  ;;  %v811_v40 = vshrl.u32 %v4561_v10, 16 }
  0x65   : > { %6854 = vst [vmem:[#allocation18_spill] sm:$0xff] %v4571_v23  ;;  %1759 = vrot.lane.b32.xlu1 %v4571_v23, %s4207_s5  ;;  %v779_v42 = vsel %vm4296_vm2, %v774_v29, %v778_v63  ;;  %v784_v45 = vrot.slane %v783_v31, 4  ;;  %v837_v47 = vor.u32 %v836_v32, %v4567_v15  ;;  %v814_v49 = vshll.u32 %v4561_v10, 16 }
  0x66   : > { %v847_v52 = vor.u32 %v846_v25, %v842_v36  ;;  %v852_v55 = vrot.slane %v850_v39, 5  ;;  %v813_v56 = vrot.slane %v811_v40, 4  ;;  %v820_v62 = vshll.u32 %v4574_v35, 16  ;;  %v4601_v25 = vld [vmem:[%s4286_s30 + $0xd8] sm:$0x1] }
  0x67   : > { %v789_v0 = vsel %vm4296_vm2, %v784_v45, %v4523_v12  ;;  %v838_v1 = vrot.slane %v837_v47, 4  ;;  %v816_v63 = vrot.slane %v814_v49, 5  ;;  %v824_v2 = vshrl.u32 %v4574_v35, 16  ;;  %v4605_v39 = vld [vmem:[%s4286_s30 + $0xc8] sm:$0xf] }
  0x68   : > { %v4595_v21 = vcombine.low %v779_v42, %v789_v0  ;;  %v848_v13 = vrot.slane %v847_v52, 4  ;;  %v822_v50 = vrot.slane %v820_v62, 5  ;;  %v874_v20 = vshll.u32 %v4585_v51, 16  ;;  %v4618_v62 = vld [vmem:[%s4286_s30 + $0xcc] sm:$0xf] }
  0x69   : > { %v843_v29 = vsel %vm4296_vm2, %v838_v1, %v842_v36  ;;  %v817_v31 = vor.u32 %v816_v63, %v813_v56  ;;  %v826_v32 = vrot.slane %v824_v2, 4  ;;  %v878_v12 = vshrl.u32 %v4585_v51, 16 }
  0x6a   : > { %6855 = vst [vmem:[#allocation19_spill] sm:$0xff] %v4595_v21  ;;  %1757 = vrot.lane.b32.xlu0 %v4595_v21, %s4207_s5  ;;  %v853_v40 = vsel %vm4296_vm2, %v848_v13, %v852_v55  ;;  %v4611_v42 = vrot.slane %v874_v20, 5  ;;  %v884_v45 = vshll.u32 %v4593_v3, 16  ;;  %v888_v36 = vshrl.u32 %v4593_v3, 16 }
  0x6b   : > { %v4615_v47 = vcombine.low %v843_v29, %v853_v40  ;;  %v818_v49 = vrot.slane %v817_v31, 4  ;;  %v827_v52 = vor.u32 %v826_v32, %v822_v50  ;;  %v880_v56 = vrot.slane %v878_v12, 4  ;;  %v4629_v31 = vld [vmem:[%s4286_s30 + $0xe4] sm:$0xf] }
  0x6c   : > { %v886_v0 = vrot.slane %v884_v45, 5  ;;  %v890_v1 = vrot.slane %v888_v36, 4  ;;  %v894_v63 = vshll.u32 %v4601_v25, 16  ;;  %v855_v55 = vshrl.u32 %v4605_v39, 16 }
  0x6d   : > { %6856 = vst [vmem:[#allocation20_spill] sm:$0xff] %v4615_v47  ;;  %1763 = vrot.lane.b32.xlu1 %v4615_v47, %s4207_s5  ;;  %v823_v2 = vsel %vm4296_vm2, %v818_v49, %v822_v50  ;;  %v828_v13 = vrot.slane %v827_v52, 4  ;;  %v881_v20 = vor.u32 %v880_v56, %v4611_v42  ;;  %v858_v29 = vshll.u32 %v4605_v39, 16  ;;  %v4637_v52 = vld [vmem:[%s4286_s30 + $0xe8] sm:$0xf] }
  0x6e   : > { %v891_v32 = vor.u32 %v890_v1, %v886_v0  ;;  %v896_v12 = vrot.slane %v894_v63, 5  ;;  %v857_v40 = vrot.slane %v855_v55, 4  ;;  %v864_v45 = vshll.u32 %v4618_v62, 16 }
  0x6f   : > { %v833_v36 = vsel %vm4296_vm2, %v828_v13, %v4567_v15  ;;  %v882_v23 = vrot.slane %v881_v20, 4  ;;  %v860_v50 = vrot.slane %v858_v29, 5  ;;  %v868_v49 = vshrl.u32 %v4618_v62, 16  ;;  %v4649_v13 = vld [vmem:[%s4286_s30 + $0xdc] sm:$0xf] }
  0x70   : > { %v4639_v56 = vcombine.low %v823_v2, %v833_v36  ;;  %v892_v21 = vrot.slane %v891_v32, 4  ;;  %v866_v1 = vrot.slane %v864_v45, 5  ;;  %v918_v63 = vshll.u32 %v4629_v31, 16  ;;  %v4662_v36 = vld [vmem:[%s4286_s30 + $0xe0] sm:$0xf] }
  0x71   : > { %v887_v55 = vsel %vm4296_vm2, %v882_v23, %v886_v0  ;;  %v861_v17 = vor.u32 %v860_v50, %v857_v40  ;;  %v870_v58 = vrot.slane %v868_v49, 4  ;;  %v922_v15 = vshrl.u32 %v4629_v31, 16 }
  0x72   : > { %6857 = vst [vmem:[#allocation21_spill] sm:$0xff] %v4639_v56  ;;  %1761 = vrot.lane.b32.xlu0 %v4639_v56, %s4207_s5  ;;  %v897_v2 = vsel %vm4296_vm2, %v892_v21, %v896_v12  ;;  %v4655_v20 = vrot.slane %v918_v63, 5  ;;  %v928_v29 = vshll.u32 %v4637_v52, 16  ;;  %v932_v23 = vshrl.u32 %v4637_v52, 16  ;;  %v4733_v56 = vld [vmem:[%s4286_s30 + $0x114] sm:$0x1] }
  0x73   : > { %v4659_v0 = vcombine.low %v887_v55, %v897_v2  ;;  %v862_v32 = vrot.slane %v861_v17, 4  ;;  %v871_v40 = vor.u32 %v870_v58, %v866_v1  ;;  %v924_v45 = vrot.slane %v922_v15, 4  ;;  %v4673_v55 = vld [vmem:[%s4286_s30 + $0xf8] sm:$0xf]  ;;  %6863 = vst [vmem:[#allocation27_spill] sm:$0xff] %v4733_v56 }
  0x74   : > { %v930_v50 = vrot.slane %v928_v29, 5  ;;  %v934_v49 = vrot.slane %v932_v23, 4  ;;  %v938_v61 = vshll.u32 %v4645_v14, 16  ;;  %v899_v21 = vshrl.u32 %v4649_v13, 16 }
  0x75   : > { %6858 = vst [vmem:[#allocation22_spill] sm:$0xff] %v4659_v0  ;;  %1767 = vrot.lane.b32.xlu1 %v4659_v0, %s4207_s5  ;;  %v867_v12 = vsel %vm4296_vm2, %v862_v32, %v866_v1  ;;  %v872_v63 = vrot.slane %v871_v40, 4  ;;  %v925_v17 = vor.u32 %v924_v45, %v4655_v20  ;;  %v902_v58 = vshll.u32 %v4649_v13, 16  ;;  %v4681_v40 = vld [vmem:[%s4286_s30 + $0xfc] sm:$0xf] }
  0x76   : > { %v935_v15 = vor.u32 %v934_v49, %v930_v50  ;;  %v940_v2 = vrot.slane %v938_v61, 5  ;;  %v901_v29 = vrot.slane %v899_v21, 4  ;;  %v908_v23 = vshll.u32 %v4662_v36, 16 }
  0x77   : > { %v877_v43 = vsel %vm4296_vm2, %v872_v63, %v4611_v42  ;;  %v926_v8 = vrot.slane %v925_v17, 4  ;;  %v904_v1 = vrot.slane %v902_v58, 5  ;;  %v912_v32 = vshrl.u32 %v4662_v36, 16  ;;  %v4693_v63 = vld [vmem:[%s4286_s30 + $0xf0] sm:$0xf] }
  0x78   : > { %v4683_v45 = vcombine.low %v867_v12, %v877_v43  ;;  %v936_v7 = vrot.slane %v935_v15, 4  ;;  %v910_v49 = vrot.slane %v908_v23, 5  ;;  %v962_v61 = vshll.u32 %v4673_v55, 16  ;;  %v4706_v23 = vld [vmem:[%s4286_s30 + $0xf4] sm:$0xf] }
  0x79   : > { %v931_v21 = vsel %vm4296_vm2, %v926_v8, %v930_v50  ;;  %v905_v30 = vor.u32 %v904_v1, %v901_v29  ;;  %v914_v27 = vrot.slane %v912_v32, 4  ;;  %v966_v42 = vshrl.u32 %v4673_v55, 16 }
  0x7a   : > { %6859 = vst [vmem:[#allocation23_spill] sm:$0xff] %v4683_v45  ;;  %1765 = vrot.lane.b32.xlu0 %v4683_v45, %s4207_s5  ;;  %v941_v43 = vsel %vm4296_vm2, %v936_v7, %v940_v2  ;;  %v4699_v12 = vrot.slane %v962_v61, 5  ;;  %v972_v17 = vshll.u32 %v4681_v40, 16  ;;  %v976_v8 = vshrl.u32 %v4681_v40, 16 }
  0x7b   : > { %v4703_v50 = vcombine.low %v931_v21, %v941_v43  ;;  %v906_v58 = vrot.slane %v905_v30, 4  ;;  %v915_v15 = vor.u32 %v914_v27, %v910_v49  ;;  %v968_v29 = vrot.slane %v966_v42, 4  ;;  %v4717_v21 = vld [vmem:[%s4286_s30 + $0x10c] sm:$0xf] }
  0x7c   : > { %v974_v1 = vrot.slane %v972_v17, 5  ;;  %v978_v32 = vrot.slane %v976_v8, 4  ;;  %v982_v0 = vshll.u32 %v4689_v54, 16  ;;  %v943_v7 = vshrl.u32 %v4693_v63, 16 }
  0x7d   : > { %6860 = vst [vmem:[#allocation24_spill] sm:$0xff] %v4703_v50  ;;  %1771 = vrot.lane.b32.xlu1 %v4703_v50, %s4207_s5  ;;  %v911_v2 = vsel %vm4296_vm2, %v906_v58, %v910_v49  ;;  %v916_v61 = vrot.slane %v915_v15, 4  ;;  %v969_v30 = vor.u32 %v968_v29, %v4699_v12  ;;  %v946_v27 = vshll.u32 %v4693_v63, 16  ;;  %v4725_v15 = vld [vmem:[%s4286_s30 + $0x110] sm:$0xf] }
  0x7e   : > { %v979_v42 = vor.u32 %v978_v32, %v974_v1  ;;  %v984_v43 = vrot.slane %v982_v0, 5  ;;  %v945_v17 = vrot.slane %v943_v7, 4  ;;  %v952_v8 = vshll.u32 %v4706_v23, 16  ;;  %6861 = vst [vmem:[#allocation25_spill] sm:$0xff] %v4725_v15 }
  0x7f   : > { %v921_v50 = vsel %vm4296_vm2, %v916_v61, %v4655_v20  ;;  %v970_v45 = vrot.slane %v969_v30, 4  ;;  %v948_v49 = vrot.slane %v946_v27, 5  ;;  %v956_v58 = vshrl.u32 %v4706_v23, 16  ;;  %v4737_v61 = vld [vmem:[%s4286_s30 + $0x104] sm:$0xf] }
  0x80   : > { %v4727_v29 = vcombine.low %v911_v2, %v921_v50  ;;  %v980_v53 = vrot.slane %v979_v42, 4  ;;  %v954_v32 = vrot.slane %v952_v8, 5  ;;  %v1006_v0 = vshll.u32 %v4717_v21, 16  ;;  %6864 = vst [vmem:[#allocation28_spill] sm:$0xff] %v4737_v61  ;;  %v4750_v8 = vld [vmem:[%s4286_s30 + $0x108] sm:$0xf] }
  0x81   : > { %v975_v7 = vsel %vm4296_vm2, %v970_v45, %v974_v1  ;;  %v949_v16 = vor.u32 %v948_v49, %v945_v17  ;;  %v958_v47 = vrot.slane %v956_v58, 4  ;;  %v1010_v20 = vshrl.u32 %v4717_v21, 16  ;;  %6866 = vst [vmem:[#allocation30_spill] sm:$0xff] %v4750_v8 }
  0x82   : > { %6862 = vst [vmem:[#allocation26_spill] sm:$0xff] %v4727_v29  ;;  %1769 = vrot.lane.b32.xlu0 %v4727_v29, %s4207_s5  ;;  %v985_v50 = vsel %vm4296_vm2, %v980_v53, %v984_v43  ;;  %v4743_v2 = vrot.slane %v1006_v0, 5  ;;  %v1016_v30 = vshll.u32 %v4725_v15, 16  ;;  %v1020_v45 = vshrl.u32 %v4725_v15, 16  ;;  %v4777_v15 = vld [vmem:[%s4286_s30 + $0x128] sm:$0x1] }
  0x83   : > { %v4747_v1 = vcombine.low %v975_v7, %v985_v50  ;;  %v950_v27 = vrot.slane %v949_v16, 4  ;;  %v959_v42 = vor.u32 %v958_v47, %v954_v32  ;;  %v1012_v17 = vrot.slane %v1010_v20, 4  ;;  %v4761_v7 = vld [vmem:[%s4286_s30 + $0x120] sm:$0xf]  ;;  %6870 = vst [vmem:[#allocation34_spill] sm:$0xff] %v4777_v15 }
  0x84   : > { %v1018_v49 = vrot.slane %v1016_v30, 5  ;;  %v1022_v58 = vrot.slane %v1020_v45, 4  ;;  %v1026_v29 = vshll.u32 %v4733_v56, 16  ;;  %v987_v53 = vshrl.u32 %v4737_v61, 16  ;;  %6867 = vst [vmem:[#allocation31_spill] sm:$0xff] %v4761_v7 }
  0x85   : > { %6865 = vst [vmem:[#allocation29_spill] sm:$0xff] %v4747_v1  ;;  %1775 = vrot.lane.b32.xlu1 %v4747_v1, %s4207_s5  ;;  %v955_v43 = vsel %vm4296_vm2, %v950_v27, %v954_v32  ;;  %v960_v0 = vrot.slane %v959_v42, 4  ;;  %v1013_v16 = vor.u32 %v1012_v17, %v4743_v2  ;;  %v990_v47 = vshll.u32 %v4737_v61, 16  ;;  %v4769_v42 = vld [vmem:[%s4286_s30 + $0x124] sm:$0xf] }
  0x86   : > { %v1023_v20 = vor.u32 %v1022_v58, %v1018_v49  ;;  %v1028_v50 = vrot.slane %v1026_v29, 5  ;;  %v989_v30 = vrot.slane %v987_v53, 4  ;;  %v996_v45 = vshll.u32 %v4750_v8, 16  ;;  %6868 = vst [vmem:[#allocation32_spill] sm:$0xff] %v4769_v42 }
  0x87   : > { %v965_v1 = vsel %vm4296_vm2, %v960_v0, %v4699_v12  ;;  %v1014_v22 = vrot.slane %v1013_v16, 4  ;;  %v992_v32 = vrot.slane %v990_v47, 5  ;;  %v1000_v27 = vshrl.u32 %v4750_v8, 16  ;;  %v4781_v0 = vld [vmem:[%s4286_s30 + $0x118] sm:$0xf] }
  0x88   : > { %v4771_v17 = vcombine.low %v955_v43, %v965_v1  ;;  %v1024_v44 = vrot.slane %v1023_v20, 4  ;;  %v998_v58 = vrot.slane %v996_v45, 5  ;;  %v1050_v29 = vshll.u32 %v4761_v7, 16  ;;  %6871 = vst [vmem:[#allocation35_spill] sm:$0xff] %v4781_v0  ;;  %v4794_v45 = vld [vmem:[%s4286_s30 + $0x11c] sm:$0xf] }
  0x89   : > { %v1019_v53 = vsel %vm4296_vm2, %v1014_v22, %v1018_v49  ;;  %v993_v61 = vor.u32 %v992_v32, %v989_v30  ;;  %v1002_v56 = vrot.slane %v1000_v27, 4  ;;  %v1054_v12 = vshrl.u32 %v4761_v7, 16  ;;  %v4821_v8 = vld [vmem:[%s4286_s30 + $0x13c] sm:$0x1] }
  0x8a   : > { %6869 = vst [vmem:[#allocation33_spill] sm:$0xff] %v4771_v17  ;;  %1773 = vrot.lane.b32.xlu0 %v4771_v17, %s4207_s5  ;;  %v1029_v1 = vsel %vm4296_vm2, %v1024_v44, %v1028_v50  ;;  %v4787_v43 = vrot.slane %v1050_v29, 5  ;;  %v1060_v16 = vshll.u32 %v4769_v42, 16  ;;  %v1064_v22 = vshrl.u32 %v4769_v42, 16  ;;  %6875 = vst [vmem:[#allocation39_spill] sm:$0xff] %v4821_v8 }
  0x8b   : > { %v4791_v49 = vcombine.low %v1019_v53, %v1029_v1  ;;  %v994_v47 = vrot.slane %v993_v61, 4  ;;  %v1003_v20 = vor.u32 %v1002_v56, %v998_v58  ;;  %v1056_v30 = vrot.slane %v1054_v12, 4  ;;  %v4805_v53 = vld [vmem:[%s4286_s30 + $0x134] sm:$0xf] }
  0x8c   : > { %v1062_v32 = vrot.slane %v1060_v16, 5  ;;  %v1066_v27 = vrot.slane %v1064_v22, 4  ;;  %v1070_v17 = vshll.u32 %v4777_v15, 16  ;;  %v1031_v44 = vshrl.u32 %v4781_v0, 16  ;;  %6873 = vst [vmem:[#allocation37_spill] sm:$0xff] %v4805_v53 }
  0x8d   : > { %6872 = vst [vmem:[#allocation36_spill] sm:$0xff] %v4791_v49  ;;  %1779 = vrot.lane.b32.xlu1 %v4791_v49, %s4207_s5  ;;  %v999_v50 = vsel %vm4296_vm2, %v994_v47, %v998_v58  ;;  %v1004_v29 = vrot.slane %v1003_v20, 4  ;;  %v1057_v61 = vor.u32 %v1056_v30, %v4787_v43  ;;  %v1034_v56 = vshll.u32 %v4781_v0, 16  ;;  %v4813_v20 = vld [vmem:[%s4286_s30 + $0x138] sm:$0xf] }
  0x8e   : > { %v1067_v12 = vor.u32 %v1066_v27, %v1062_v32  ;;  %v1072_v1 = vrot.slane %v1070_v17, 5  ;;  %v1033_v16 = vrot.slane %v1031_v44, 4  ;;  %v1040_v22 = vshll.u32 %v4794_v45, 16 }
  0x8f   : > { %v1009_v49 = vsel %vm4296_vm2, %v1004_v29, %v4743_v2  ;;  %v1058_v15 = vrot.slane %v1057_v61, 4  ;;  %v1036_v58 = vrot.slane %v1034_v56, 5  ;;  %v1044_v47 = vshrl.u32 %v4794_v45, 16  ;;  %v4825_v29 = vld [vmem:[%s4286_s30 + $0x12c] sm:$0xf] }
  0x90   : > { %v4815_v30 = vcombine.low %v999_v50, %v1009_v49  ;;  %v1068_v0 = vrot.slane %v1067_v12, 4  ;;  %v1042_v27 = vrot.slane %v1040_v22, 5  ;;  %v1094_v17 = vshll.u32 %v4805_v53, 16  ;;  %6876 = vst [vmem:[#allocation40_spill] sm:$0xff] %v4825_v29  ;;  %v4838_v22 = vld [vmem:[%s4286_s30 + $0x130] sm:$0xf] }
  0x91   : > { %v1063_v44 = vsel %vm4296_vm2, %v1058_v15, %v1062_v32  ;;  %v1037_v42 = vor.u32 %v1036_v58, %v1033_v16  ;;  %v1046_v7 = vrot.slane %v1044_v47, 4  ;;  %v1098_v2 = vshrl.u32 %v4805_v53, 16  ;;  %6878 = vst [vmem:[#allocation42_spill] sm:$0xff] %v4838_v22 }
  0x92   : > { %6874 = vst [vmem:[#allocation38_spill] sm:$0xff] %v4815_v30  ;;  %1777 = vrot.lane.b32.xlu0 %v4815_v30, %s4207_s5  ;;  %v1073_v49 = vsel %vm4296_vm2, %v1068_v0, %v1072_v1  ;;  %v4831_v50 = vrot.slane %v1094_v17, 5  ;;  %v1104_v61 = vshll.u32 %v4813_v20, 16  ;;  %v1108_v15 = vshrl.u32 %v4813_v20, 16 }
  0x93   : > { %v4835_v32 = vcombine.low %v1063_v44, %v1073_v49  ;;  %v1038_v56 = vrot.slane %v1037_v42, 4  ;;  %v1047_v12 = vor.u32 %v1046_v7, %v1042_v27  ;;  %v1100_v16 = vrot.slane %v1098_v2, 4 }
  0x94   : > { %v1106_v58 = vrot.slane %v1104_v61, 5  ;;  %v1110_v47 = vrot.slane %v1108_v15, 4  ;;  %v1114_v30 = vshll.u32 %v4821_v8, 16  ;;  %v1075_v53 = vshrl.u32 %v4825_v29, 16 }
  0x95   : > { %6877 = vst [vmem:[#allocation41_spill] sm:$0xff] %v4835_v32  ;;  %1783 = vrot.lane.b32.xlu1 %v4835_v32, %s4207_s5  ;;  %v1043_v0 = vsel %vm4296_vm2, %v1038_v56, %v1042_v27  ;;  %v1048_v1 = vrot.slane %v1047_v12, 4  ;;  %v1101_v17 = vor.u32 %v1100_v16, %v4831_v50  ;;  %v1078_v7 = vshll.u32 %v4825_v29, 16 }
  0x96   : > { %v1111_v42 = vor.u32 %v1110_v47, %v1106_v58  ;;  %v1116_v44 = vrot.slane %v1114_v30, 5  ;;  %v1077_v2 = vrot.slane %v1075_v53, 4  ;;  %v1084_v49 = vshll.u32 %v4838_v22, 16 }
  0x97   : > { %v1053_v61 = vsel %vm4296_vm2, %v1048_v1, %v4787_v43  ;;  %v1102_v15 = vrot.slane %v1101_v17, 4  ;;  %v1080_v32 = vrot.slane %v1078_v7, 5  ;;  %v1088_v27 = vshrl.u32 %v4838_v22, 16  ;;  %v4862_v1 = vld [vmem:[%s4286_s30 + $0x8] sm:$0xf] }
  0x98   : > { %v4853_v56 = vcombine.low %v1043_v0, %v1053_v61  ;;  %v1112_v12 = vrot.slane %v1111_v42, 4  ;;  %v1086_v16 = vrot.slane %v1084_v49, 5  ;;  %6880 = vst [vmem:[#allocation44_spill] sm:$0xff] %v4862_v1  ;;  %v1206_v0 = vrot.slane %v4862_v1, 5  ;;  %v4866_v17 = vld [vmem:[%s4286_s30 + $0xc] sm:$0xf] }
  0x99   : > { %v1107_v53 = vsel %vm4296_vm2, %v1102_v15, %v1106_v58  ;;  %v1081_v30 = vor.u32 %v1080_v32, %v1077_v2  ;;  %v1090_v47 = vrot.slane %v1088_v27, 4  ;;  %6881 = vst [vmem:[#allocation45_spill] sm:$0xff] %v4866_v17  ;;  %v1209_v58 = vrot.slane %v4866_v17, 5  ;;  %v4099_v7 = vld [vmem:[%s4286_s30 + $0x10] sm:$0x1] }
  0x9a   : > { %6879 = vst [vmem:[#allocation43_spill] sm:$0xff] %v4853_v56  ;;  %1781 = vrot.lane.b32.xlu0 %v4853_v56, %s4207_s5  ;;  %v1117_v43 = vsel %vm4296_vm2, %v1112_v12, %v1116_v44  ;;  %v1212_v32 = vrot.slane %v4099_v7, 5  ;;  %v6883_v44 = vmov 0  ;;  %v4878_v61 = vld [vmem:[%s4286_s30] sm:$0xf]  ;;  %v1208_v27 = vrot.slane %v1206_v0, 4 }
  0x9b   : > { %v4870_v42 = vcombine.low %v1107_v53, %v1117_v43  ;;  %v1082_v2 = vrot.slane %v1081_v30, 4  ;;  %v1091_v49 = vor.u32 %v1090_v47, %v1086_v16  ;;  %v6884_v44 = vsel %vm4873_vm5, 4294967295, %v6883_v44  ;;  %6886 = vst [vmem:[#allocation48_spill] sm:$0xff] %v4878_v61  ;;  %v4882_v56 = vld [vmem:[%s4286_s30 + $0x4] sm:$0xf] }
  0x9c   : > { %6885 = vst [vmem:[#allocation47_spill] sm:$0xff] %v6884_v44  ;;  %v3697_v15 = vrot.slane %v4878_v61, 9  ;;  %v1211_v12 = vrot.slane %v1209_v58, 4  ;;  %6887 = vst [vmem:[#allocation49_spill] sm:$0xff] %v4882_v56  ;;  %v1203_v7 = vrot.slane %v4882_v56, 5  ;;  %v1210_v56 = vsel %vm4873_vm5, %v1208_v27, %v1209_v58 }
  0x9d   : > { %6882 = vst [vmem:[#allocation46_spill] sm:$0xff] %v4870_v42  ;;  %v4886_v53 = vld [vmem:[%s4286_s30 + $0x1c] sm:$0xf]  ;;  %1787 = vrot.lane.b32.xlu1 %v4870_v42, %s4207_s5  ;;  %v1087_v47 = vsel %vm4296_vm2, %v1082_v2, %v1086_v16  ;;  %v1092_v43 = vrot.slane %v1091_v49, 4  ;;  %v4894_v1 = vld [vmem:[%s4286_s30 + $0x20] sm:$0xf] }
  0x9e   : > { %6888 = vst [vmem:[#allocation50_spill] sm:$0xff] %v4886_v53  ;;  %v1219_v30 = vrot.slane %v4886_v53, 5  ;;  %6889 = vst [vmem:[#allocation51_spill] sm:$0xff] %v4894_v1  ;;  %v1222_v17 = vrot.slane %v4894_v1, 5  ;;  %v4104_v61 = vld [vmem:[%s4286_s30 + $0x24] sm:$0x1]  ;;  %v1213_v53 = vsel %vm4873_vm5, %v1211_v12, %v1212_v32  ;;  %v1204_v42 = vsel %vm4873_vm5, %v3697_v15, %v1203_v7 }
  0x9f   : > { %v1225_v29 = vrot.slane %v4104_v61, 5  ;;  %v1205_v22 = vrot.slane %v1203_v7, 4  ;;  %v1097_v16 = vsel %vm4296_vm2, %v1092_v43, %v4831_v50  ;;  %v3780_v2 = vcombine.low %v1210_v56, %v1213_v53  ;;  %v4912_v61 = vld [vmem:[%s4286_s30 + $0x14] sm:$0xf]  ;;  %v4916_v15 = vld [vmem:[%s4286_s30 + $0x18] sm:$0xf] }
  0xa0   : > { %v1221_v49 = vrot.slane %v1219_v30, 4  ;;  %v1224_v1 = vrot.slane %v1222_v17, 4  ;;  %v4907_v8 = vcombine.low %v1087_v47, %v1097_v16  ;;  %6891 = vst [vmem:[#allocation53_spill] sm:$0xff] %v4912_v61  ;;  %v3698_v32 = vrot.slane %v4912_v61, 9  ;;  %6892 = vst [vmem:[#allocation54_spill] sm:$0xff] %v4916_v15 }
  0xa1   : > { %v1207_v58 = vsel %vm4873_vm5, %v1205_v22, %v1206_v0  ;;  %v1216_v27 = vrot.slane %v4916_v15, 5  ;;  %1887 = vrot.lane.b32.xlu1 %v3780_v2, %s4208_s6  ;;  %v4925_v0 = vld [vmem:[%s4286_s30 + $0x30] sm:$0xf]  ;;  %v4935_v47 = vld [vmem:[%s4286_s30 + $0x34] sm:$0xf] }
  0xa2   : > { %6890 = vst [vmem:[#allocation52_spill] sm:$0xff] %v4907_v8  ;;  %v3779_v50 = vcombine.low %v1204_v42, %v1207_v58  ;;  %v1223_v56 = vsel %vm4873_vm5, %v1221_v49, %v1222_v17  ;;  %v1226_v22 = vsel %vm4873_vm5, %v1224_v1, %v1225_v29  ;;  %6893 = vst [vmem:[#allocation55_spill] sm:$0xff] %v4925_v0  ;;  %v1232_v12 = vrot.slane %v4925_v0, 5  ;;  %v4109_v1 = vld [vmem:[%s4286_s30 + $0x38] sm:$0x1] }
  0xa3   : > { %1785 = vrot.lane.b32.xlu0 %v4907_v8, %s4207_s5  ;;  %v4930_v7 = vcombine.low %v1223_v56, %v1226_v22  ;;  %v1217_v42 = vsel %vm4873_vm5, %v3698_v32, %v1216_v27  ;;  %v1218_v53 = vrot.slane %v1216_v27, 4  ;;  %v1235_v17 = vrot.slane %v4935_v47, 5  ;;  %v4940_v16 = vld [vmem:[%s4286_s30 + $0x28] sm:$0xf]  ;;  %v4944_v49 = vld [vmem:[%s4286_s30 + $0x2c] sm:$0xf]  ;;  %s6055_s5 = scalar_lea.vmem %s6702_s1, %s3692_s28 }
  0xa4   : > { %v1234_v29 = vrot.slane %v1232_v12, 4  ;;  %v1238_v43 = vrot.slane %v4109_v1, 5  ;;  %6895 = vst [vmem:[#allocation57_spill] sm:$0xff] %v4940_v16  ;;  %v3699_v2 = vrot.slane %v4940_v16, 9  ;;  %6896 = vst [vmem:[#allocation58_spill] sm:$0xff] %v4944_v49  ;;  %v1229_v58 = vrot.slane %v4944_v49, 5 }
  0xa5   : > { %6894 = vst [vmem:[#allocation56_spill] sm:$0xff] %v4930_v7  ;;  %v1220_v32 = vsel %vm4873_vm5, %v1218_v53, %v1219_v30  ;;  %v1237_v27 = vrot.slane %v1235_v17, 4  ;;  %v4950_v56 = vld [vmem:[%s4286_s30 + $0x44] sm:$0xf]  ;;  %v1248_v1 = vrot.slane %v4954_v24, 5  ;;  %1891 = vrot.lane.b32.xlu1 %v4930_v7, %s4208_s6 }
  0xa6   : > { %6897 = vst [vmem:[#allocation59_spill] sm:$0xff] %v4950_v56  ;;  %v1245_v22 = vrot.slane %v4950_v56, 5  ;;  %v4959_v8 = vcombine.low %v1217_v42, %v1220_v32  ;;  %v1236_v16 = vsel %vm4873_vm5, %v1234_v29, %v1235_v17  ;;  %v1230_v30 = vsel %vm4873_vm5, %v3699_v2, %v1229_v58  ;;  %v4114_v61 = vld [vmem:[%s4286_s30 + $0x4c] sm:$0x1]  ;;  %v4974_v29 = vld [vmem:[%s4286_s30 + $0x3c] sm:$0xf] }
  0xa7   : > { %v1231_v53 = vrot.slane %v1229_v58, 4  ;;  %1885 = vrot.lane.b32.xlu0 %v3779_v50, %s4208_s6  ;;  %v1239_v49 = vsel %vm4873_vm5, %v1237_v27, %v1238_v43  ;;  %v1250_v24 = vrot.slane %v1248_v1, 4  ;;  %v1251_v15 = vrot.slane %v4114_v61, 5  ;;  %6901 = vst [vmem:[#allocation63_spill] sm:$0xff] %v4974_v29  ;;  %v4978_v58 = vld [vmem:[%s4286_s30 + $0x40] sm:$0xf] }
  0xa8   : > { %6899 = vst [vmem:[#allocation61_spill] sm:$0xff] %v4959_v8  ;;  %v1247_v56 = vrot.slane %v1245_v22, 4  ;;  %v4969_v42 = vcombine.low %v1236_v16, %v1239_v49  ;;  %v3700_v2 = vrot.slane %v4974_v29, 9  ;;  %6902 = vst [vmem:[#allocation64_spill] sm:$0xff] %v4978_v58  ;;  %v1242_v50 = vrot.slane %v4978_v58, 5 }
  0xa9   : > { %v1233_v17 = vsel %vm4873_vm5, %v1231_v53, %v1232_v12  ;;  %v1252_v16 = vsel %vm4873_vm5, %v1250_v24, %v1251_v15  ;;  %v4988_v12 = vld [vmem:[%s4286_s30 + $0x58] sm:$0xf]  ;;  %v4119_v15 = vld [vmem:[%s4286_s30 + $0x60] sm:$0x1]  ;;  %v5015_v7 = vld [vmem:[%s4286_s30 + $0x6c] sm:$0xf] }
  0xaa   : > { %6900 = vst [vmem:[#allocation62_spill] sm:$0xff] %v4969_v42  ;;  %v4981_v43 = vcombine.low %v1230_v30, %v1233_v17  ;;  %v1249_v61 = vsel %vm4873_vm5, %v1247_v56, %v1248_v1  ;;  %6903 = vst [vmem:[#allocation65_spill] sm:$0xff] %v4988_v12  ;;  %v1258_v49 = vrot.slane %v4988_v12, 5  ;;  %1895 = vrot.lane.b32.xlu1 %v4969_v42, %s4208_s6  ;;  %v1244_v30 = vrot.slane %v1242_v50, 4  ;;  %v4998_v56 = vld [vmem:[%s4286_s30 + $0x5c] sm:$0xf] }
  0xab   : > { %v4993_v32 = vcombine.low %v1249_v61, %v1252_v16  ;;  %v1243_v27 = vsel %vm4873_vm5, %v3700_v2, %v1242_v50  ;;  %6904 = vst [vmem:[#allocation66_spill] sm:$0xff] %v4998_v56  ;;  %v1261_v1 = vrot.slane %v4998_v56, 5  ;;  %1889 = vrot.lane.b32.xlu0 %v4959_v8, %s4208_s6  ;;  %v1264_v53 = vrot.slane %v4119_v15, 5  ;;  %v5005_v17 = vld [vmem:[%s4286_s30 + $0x50] sm:$0xf]  ;;  %6907 = vst [vmem:[#allocation69_spill] sm:$0xff] %v5015_v7 }
  0xac   : > { %v1260_v24 = vrot.slane %v1258_v49, 4  ;;  %6905 = vst [vmem:[#allocation67_spill] sm:$0xff] %v5005_v17  ;;  %v3701_v61 = vrot.slane %v5005_v17, 9  ;;  %v5009_v16 = vld [vmem:[%s4286_s30 + $0x54] sm:$0xf]  ;;  %v1246_v50 = vsel %vm4873_vm5, %v1244_v30, %v1245_v22  ;;  %v1271_v8 = vrot.slane %v5015_v7, 5 }
  0xad   : > { %6906 = vst [vmem:[#allocation68_spill] sm:$0xff] %v5009_v16  ;;  %v1255_v2 = vrot.slane %v5009_v16, 5  ;;  %v1263_v42 = vrot.slane %v1261_v1, 4  ;;  %v5019_v29 = vld [vmem:[%s4286_s30 + $0x70] sm:$0xf]  ;;  %v5022_v58 = vcombine.low %v1243_v27, %v1246_v50 }
  0xae   : > { %v1274_v15 = vrot.slane %v5019_v29, 5  ;;  %v1262_v17 = vsel %vm4873_vm5, %v1260_v24, %v1261_v1  ;;  %1899 = vrot.lane.b32.xlu1 %v4993_v32, %s4208_s6  ;;  %v1273_v30 = vrot.slane %v1271_v8, 4  ;;  %v4124_v56 = vld [vmem:[%s4286_s30 + $0x74] sm:$0x1]  ;;  %v5040_v24 = vld [vmem:[%s4286_s30 + $0x64] sm:$0xf] }
  0xaf   : > { %v1256_v16 = vsel %vm4873_vm5, %v3701_v61, %v1255_v2  ;;  %v1257_v12 = vrot.slane %v1255_v2, 4  ;;  %v1265_v22 = vsel %vm4873_vm5, %v1263_v42, %v1264_v53  ;;  %v1277_v0 = vrot.slane %v4124_v56, 5  ;;  %1893 = vrot.lane.b32.xlu0 %v4981_v43, %s4208_s6  ;;  %v4138_v44 = vld [vmem:[%s4286_s30 + $0xa4] sm:$0xf] }
  0xb0   : > { %v1276_v7 = vrot.slane %v1274_v15, 4  ;;  %v5035_v27 = vcombine.low %v1262_v17, %v1265_v22  ;;  %v3702_v61 = vrot.slane %v5040_v24, 9  ;;  %v1268_v2 = vrot.slane %v4399_v6, 5 }
  0xb1   : > { %v1259_v1 = vsel %vm4873_vm5, %v1257_v12, %v1258_v49  ;;  %v1275_v42 = vsel %vm4873_vm5, %v1273_v30, %v1274_v15  ;;  %v1284_v53 = vrot.slane %v4404_v11, 5  ;;  %v1287_v22 = vrot.slane %v4417_v28, 5 }
  0xb2   : > { %v5044_v50 = vcombine.low %v1256_v16, %v1259_v1  ;;  %v1278_v56 = vsel %vm4873_vm5, %v1276_v7, %v1277_v0  ;;  %v1269_v12 = vsel %vm4873_vm5, %v3702_v61, %v1268_v2  ;;  %v1270_v49 = vrot.slane %v1268_v2, 4  ;;  %1903 = vrot.lane.b32.xlu1 %v5035_v27, %s4208_s6 }
  0xb3   : > { %v5051_v17 = vcombine.low %v1275_v42, %v1278_v56  ;;  %v1286_v6 = vrot.slane %v1284_v53, 4  ;;  %v1290_v16 = vrot.slane %v4423_v34, 5  ;;  %v3703_v15 = vrot.slane %v4431_v38, 9  ;;  %1897 = vrot.lane.b32.xlu0 %v5022_v58, %s4208_s6 }
  0xb4   : > { %v1281_v0 = vrot.slane %v4443_v48, 5  ;;  %v1272_v11 = vsel %vm4873_vm5, %v1270_v49, %v1271_v8  ;;  %v1289_v7 = vrot.slane %v1287_v22, 4  ;;  %v1297_v30 = vrot.slane %v4451_v60, 5 }
  0xb5   : > { %v1300_v28 = vrot.slane %v4461_v5, 5  ;;  %v5067_v1 = vcombine.low %v1269_v12, %v1272_v11  ;;  %v1288_v34 = vsel %vm4873_vm5, %v1286_v6, %v1287_v22  ;;  %v1303_v42 = vrot.slane %v4469_v18, 5  ;;  %v5082_v12 = vpop.permute.xlu1 %1729 }
  0xb6   : > { %v1283_v61 = vrot.slane %v1281_v0, 4  ;;  %v1291_v38 = vsel %vm4873_vm5, %v1289_v7, %v1290_v16  ;;  %v1299_v48 = vrot.slane %v1297_v30, 4  ;;  %1907 = vrot.lane.b32.xlu1 %v5051_v17, %s4208_s6  ;;  %v1282_v60 = vsel %vm4873_vm5, %v3703_v15, %v1281_v0 }
  0xb7   : > { %v1302_v2 = vrot.slane %v1300_v28, 4  ;;  %v5076_v8 = vcombine.low %v1288_v34, %v1291_v38  ;;  %v3704_v5 = vrot.slane %v4473_v19, 9  ;;  %v1294_v56 = vrot.slane %v4486_v33, 5  ;;  %1901 = vrot.lane.b32.xlu0 %v5044_v50, %s4208_s6 }
  0xb8   : > { %v1285_v18 = vsel %vm4873_vm5, %v1283_v61, %v1284_v53  ;;  %v1301_v49 = vsel %vm4873_vm5, %v1299_v48, %v1300_v28  ;;  %v1310_v6 = vrot.slane %v4497_v46, 5  ;;  %v1313_v15 = vrot.slane %v4505_v59, 5 }
  0xb9   : > { %v1304_v22 = vsel %vm4873_vm5, %v1302_v2, %v1303_v42  ;;  %v1295_v19 = vsel %vm4873_vm5, %v3704_v5, %v1294_v56  ;;  %v1296_v33 = vrot.slane %v1294_v56, 4  ;;  %v1316_v11 = vrot.slane %v4513_v4, 5  ;;  %v5118_v2 = vpop.permute.xlu1 %1731 }
  0xba   : > { %v5093_v16 = vcombine.low %v1301_v49, %v1304_v22  ;;  %v1312_v0 = vrot.slane %v1310_v6, 4  ;;  %v3705_v53 = vrot.slane %v4517_v9, 9  ;;  %v1307_v7 = vrot.slane %v4530_v26, 5  ;;  %1911 = vrot.lane.b32.xlu1 %v5076_v8, %s4208_s6  ;;  %v5113_v26 = vpop.permute.xlu0 %1725 }
  0xbb   : > { %v1298_v46 = vsel %vm4873_vm5, %v1296_v33, %v1297_v30  ;;  %v1315_v28 = vrot.slane %v1313_v15, 4  ;;  %v1323_v34 = vrot.slane %v4541_v41, 5  ;;  %v1326_v61 = vrot.slane %v4549_v57, 5  ;;  %1905 = vrot.lane.b32.xlu0 %v5067_v1, %s4208_s6 }
  0xbc   : > { %6908 = vst [vmem:[#allocation70_spill] sm:$0xff] %v5093_v16  ;;  %v5109_v59 = vcombine.low %v1282_v60, %v1285_v18  ;;  %v1314_v4 = vsel %vm4873_vm5, %v1312_v0, %v1313_v15  ;;  %v1309_v9 = vrot.slane %v1307_v7, 4  ;;  %v1329_v41 = vrot.slane %v4557_v37, 5 }
  0xbd   : > { %v1317_v38 = vsel %vm4873_vm5, %v1315_v28, %v1316_v11  ;;  %v1325_v30 = vrot.slane %v1323_v34, 4  ;;  %v1328_v48 = vrot.slane %v1326_v61, 4  ;;  %v5120_v57 = vcombine.low %v1295_v19, %v1298_v46  ;;  %v5155_v46 = vpop.permute.xlu1 %1735 }
  0xbe   : > { %v1308_v42 = vsel %vm4873_vm5, %v3705_v53, %v1307_v7  ;;  %v1320_v60 = vrot.slane %v4574_v35, 5  ;;  %1915 = vrot.lane.b32.xlu1 %v5093_v16, %s4208_s6  ;;  %v5127_v5 = vcombine.low %v1314_v4, %v1317_v38  ;;  %v1311_v56 = vsel %vm4873_vm5, %v1309_v9, %v1310_v6  ;;  %v5145_v53 = vpop.permute.xlu0 %1727  ;;  %6913 = vst [vmem:[#allocation75_spill] sm:$0xff] %v5155_v46  ;;  %v6994_v16 = vld [vmem:[#allocation62_spill] sm:$0xff]  ;;  %v7037_v46 = vld [vmem:[#allocation49_spill] sm:$0xff] }
  0xbf   : > { %6909 = vst [vmem:[#allocation71_spill] sm:$0xff] %v5120_v57  ;;  %v3706_v18 = vrot.slane %v4561_v10, 9  ;;  %v1336_v37 = vrot.slane %v4585_v51, 5  ;;  %1909 = vrot.lane.b32.xlu0 %v5109_v59, %s4208_s6  ;;  %v1327_v49 = vsel %vm4873_vm5, %v1325_v30, %v1326_v61  ;;  %v1330_v35 = vsel %vm4873_vm5, %v1328_v48, %v1329_v41 }
  0xc0   : > { %6910 = vst [vmem:[#allocation72_spill] sm:$0xff] %v5127_v5  ;;  %v1322_v22 = vrot.slane %v1320_v60, 4  ;;  %v1339_v19 = vrot.slane %v4593_v3, 5  ;;  %v1342_v15 = vrot.slane %v4601_v25, 5  ;;  %v3707_v6 = vrot.slane %v4605_v39, 9 }
  0xc1   : > { %v1338_v33 = vrot.slane %v1336_v37, 4  ;;  %v1333_v10 = vrot.slane %v4618_v62, 5  ;;  %v1349_v0 = vrot.slane %v4629_v31, 5  ;;  %v1352_v11 = vrot.slane %v4637_v52, 5 }
  0xc2   : > { %v1341_v51 = vrot.slane %v1339_v19, 4  ;;  %1919 = vrot.lane.b32.xlu1 %v5127_v5, %s4208_s6  ;;  %v5149_v7 = vcombine.low %v1308_v42, %v1311_v56  ;;  %v5151_v3 = vcombine.low %v1327_v49, %v1330_v35  ;;  %v1355_v28 = vrot.slane %v4645_v14, 5  ;;  %v5190_v35 = vpop.permute.xlu1 %1739 }
  0xc3   : > { %v1340_v25 = vsel %vm4873_vm5, %v1338_v33, %v1339_v19  ;;  %v1335_v39 = vrot.slane %v1333_v10, 4  ;;  %1913 = vrot.lane.b32.xlu0 %v5120_v57, %s4208_s6  ;;  %v1351_v31 = vrot.slane %v1349_v0, 4  ;;  %v1354_v52 = vrot.slane %v1352_v11, 4  ;;  %6916 = vst [vmem:[#allocation78_spill] sm:$0xff] %v5190_v35  ;;  %v6995_v57 = vld [vmem:[#allocation22_spill] sm:$0xff] }
  0xc4   : > { %6911 = vst [vmem:[#allocation73_spill] sm:$0xff] %v5149_v7  ;;  %6912 = vst [vmem:[#allocation74_spill] sm:$0xff] %v5151_v3  ;;  %v1343_v62 = vsel %vm4873_vm5, %v1341_v51, %v1342_v15  ;;  %v1321_v61 = vsel %vm4873_vm5, %v3706_v18, %v1320_v60  ;;  %v1324_v4 = vsel %vm4873_vm5, %v1322_v22, %v1323_v34  ;;  %v1346_v38 = vrot.slane %v4662_v36, 5 }
  0xc5   : > { %v1334_v9 = vsel %vm4873_vm5, %v3707_v6, %v1333_v10  ;;  %v5169_v30 = vcombine.low %v1340_v25, %v1343_v62  ;;  %v1337_v48 = vsel %vm4873_vm5, %v1335_v39, %v1336_v37  ;;  %v3708_v41 = vrot.slane %v4649_v13, 9  ;;  %v5188_v37 = vpop.permute.xlu0 %1733  ;;  %v6917_v10 = vld [vmem:[#allocation25_spill] sm:$0xff] }
  0xc6   : > { %v1362_v14 = vrot.slane %v4673_v55, 5  ;;  %1923 = vrot.lane.b32.xlu1 %v5151_v3, %s4208_s6  ;;  %v1353_v34 = vsel %vm4873_vm5, %v1351_v31, %v1352_v11  ;;  %v1356_v42 = vsel %vm4873_vm5, %v1354_v52, %v1355_v28  ;;  %v1348_v60 = vrot.slane %v1346_v38, 4  ;;  %6915 = vst [vmem:[#allocation77_spill] sm:$0xff] %v5188_v37  ;;  %v6918_v11 = vld [vmem:[#allocation27_spill] sm:$0xff]  ;;  %v6919_v52 = vld [vmem:[#allocation30_spill] sm:$0xff]  ;;  %v7039_v37 = vld [vmem:[#allocation45_spill] sm:$0xff] }
  0xc7   : > { %v1365_v36 = vrot.slane %v4681_v40, 5  ;;  %1917 = vrot.lane.b32.xlu0 %v5149_v7, %s4208_s6  ;;  %v5184_v56 = vcombine.low %v1321_v61, %v1324_v4  ;;  %v1368_v55 = vrot.slane %v4689_v54, 5  ;;  %v1359_v18 = vrot.slane %v4706_v23, 5  ;;  %v6921_v4 = vld [vmem:[#allocation28_spill] sm:$0xff]  ;;  %v4139_v7 = vld [vmem:[%s4286_s30 + $0xbc] sm:$0xf] }
  0xc8   : > { %v1364_v13 = vrot.slane %v1362_v14, 4  ;;  %v5192_v22 = vcombine.low %v1334_v9, %v1337_v48  ;;  %v5194_v19 = vcombine.low %v1353_v34, %v1356_v42  ;;  %v3709_v40 = vrot.slane %v4693_v63, 9  ;;  %v5226_v42 = vpop.permute.xlu1 %1743 }
  0xc9   : > { %6914 = vst [vmem:[#allocation76_spill] sm:$0xff] %v5184_v56  ;;  %v1367_v49 = vrot.slane %v1365_v36, 4  ;;  %v1347_v33 = vsel %vm4873_vm5, %v3708_v41, %v1346_v38  ;;  %v1350_v54 = vsel %vm4873_vm5, %v1348_v60, %v1349_v0  ;;  %v1375_v15 = vrot.slane %v4717_v21, 5  ;;  %v5217_v28 = vpop.permute.xlu0 %1737  ;;  %v6922_v38 = vld [vmem:[#allocation31_spill] sm:$0xff]  ;;  %v6923_v41 = vld [vmem:[#allocation32_spill] sm:$0xff]  ;;  %6924 = vst [vmem:[#allocation27_spill] sm:$0xff] %v5226_v42 }
  0xca   : > { %1927 = vrot.lane.b32.xlu1 %v5169_v30, %s4208_s6  ;;  %v1366_v23 = vsel %vm4873_vm5, %v1364_v13, %v1365_v36  ;;  %v1361_v6 = vrot.slane %v1359_v18, 4  ;;  %v1378_v51 = vrot.slane %v6917_v10, 5  ;;  %v1381_v25 = vrot.slane %v6918_v11, 5  ;;  %6920 = vst [vmem:[#allocation25_spill] sm:$0xff] %v5217_v28 }
  0xcb   : > { %1921 = vrot.lane.b32.xlu0 %v5184_v56, %s4208_s6  ;;  %v1369_v63 = vsel %vm4873_vm5, %v1367_v49, %v1368_v55  ;;  %v1377_v39 = vrot.slane %v1375_v15, 4  ;;  %v5212_v62 = vcombine.low %v1347_v33, %v1350_v54  ;;  %v1360_v0 = vsel %vm4873_vm5, %v3709_v40, %v1359_v18  ;;  %v6925_v55 = vld [vmem:[#allocation34_spill] sm:$0xff] }
  0xcc   : > { %v1380_v31 = vrot.slane %v1378_v51, 4  ;;  %v1372_v21 = vrot.slane %v6919_v52, 5  ;;  %v5221_v61 = vcombine.low %v1366_v23, %v1369_v63  ;;  %v3710_v9 = vrot.slane %v6921_v4, 9 }
  0xcd   : > { %v1388_v48 = vrot.slane %v6922_v38, 5  ;;  %v1391_v34 = vrot.slane %v6923_v41, 5  ;;  %v1363_v60 = vsel %vm4873_vm5, %v1361_v6, %v1362_v14  ;;  %v1379_v36 = vsel %vm4873_vm5, %v1377_v39, %v1378_v51  ;;  %v6931_v38 = vld [vmem:[#allocation42_spill] sm:$0xff] }
  0xce   : > { %1931 = vrot.lane.b32.xlu1 %v5194_v19, %s4208_s6  ;;  %v1382_v13 = vsel %vm4873_vm5, %v1380_v31, %v1381_v25  ;;  %v1394_v18 = vrot.slane %v6925_v55, 5  ;;  %v1374_v49 = vrot.slane %v1372_v21, 4  ;;  %v1385_v54 = vrot.slane %v4794_v45, 5  ;;  %v6926_v45 = vld [vmem:[#allocation35_spill] sm:$0xff]  ;;  %v5253_v25 = vpop.permute.xlu0 %1741 }
  0xcf   : > { %1925 = vrot.lane.b32.xlu0 %v5192_v22, %s4208_s6  ;;  %v1390_v40 = vrot.slane %v1388_v48, 4  ;;  %v1393_v33 = vrot.slane %v1391_v34, 4  ;;  %v5240_v23 = vcombine.low %v1360_v0, %v1363_v60  ;;  %v5242_v63 = vcombine.low %v1379_v36, %v1382_v13  ;;  %6927 = vst [vmem:[#allocation30_spill] sm:$0xff] %v5253_v25  ;;  %v6928_v0 = vld [vmem:[#allocation37_spill] sm:$0xff] }
  0xd0   : > { %v1373_v14 = vsel %vm4873_vm5, %v3710_v9, %v1372_v21  ;;  %v3711_v51 = vrot.slane %v6926_v45, 9  ;;  %v1387_v11 = vrot.slane %v1385_v54, 4  ;;  %v1376_v39 = vsel %vm4873_vm5, %v1374_v49, %v1375_v15  ;;  %v6929_v21 = vld [vmem:[#allocation39_spill] sm:$0xff]  ;;  %v5260_v9 = vpop.permute.xlu1 %1747  ;;  %v6933_v49 = vld [vmem:[#allocation40_spill] sm:$0xff] }
  0xd1   : > { %v1392_v6 = vsel %vm4873_vm5, %v1390_v40, %v1391_v34  ;;  %v1395_v10 = vsel %vm4873_vm5, %v1393_v33, %v1394_v18  ;;  %v1401_v31 = vrot.slane %v6928_v0, 5  ;;  %v1404_v52 = vrot.slane %v4813_v20, 5  ;;  %6930 = vst [vmem:[#allocation28_spill] sm:$0xff] %v5260_v9  ;;  %v6941_v0 = vld [vmem:[#allocation50_spill] sm:$0xff]  ;;  %v4133_v9 = vld [vmem:[%s4286_s30 + $0xb4] sm:$0xf] }
  0xd2   : > { %1935 = vrot.lane.b32.xlu1 %v5221_v61, %s4208_s6  ;;  %v1407_v4 = vrot.slane %v6929_v21, 5  ;;  %v1398_v41 = vrot.slane %v6931_v38, 5  ;;  %v5265_v34 = vcombine.low %v1392_v6, %v1395_v10  ;;  %v5269_v15 = vcombine.low %v1373_v14, %v1376_v39  ;;  %v5280_v6 = vpop.permute.xlu0 %1745  ;;  %v6940_v39 = vld [vmem:[#allocation51_spill] sm:$0xff]  ;;  %v6945_v38 = vld [vmem:[#allocation54_spill] sm:$0xff] }
  0xd3   : > { %1929 = vrot.lane.b32.xlu0 %v5212_v62, %s4208_s6  ;;  %v1403_v60 = vrot.slane %v1401_v31, 4  ;;  %v1406_v36 = vrot.slane %v1404_v52, 4  ;;  %v1386_v20 = vsel %vm4873_vm5, %v3711_v51, %v1385_v54  ;;  %v1389_v13 = vsel %vm4873_vm5, %v1387_v11, %v1388_v48  ;;  %6934 = vst [vmem:[#allocation32_spill] sm:$0xff] %v5280_v6  ;;  %v4134_v6 = vld [vmem:[%s4286_s30 + $0xb8] sm:$0xf] }
  0xd4   : > { %6932 = vst [vmem:[#allocation31_spill] sm:$0xff] %v5265_v34  ;;  %v3712_v40 = vrot.slane %v6933_v49, 9  ;;  %v1400_v33 = vrot.slane %v1398_v41, 4  ;;  %v5286_v54 = vpop.permute.xlu1 %1751  ;;  %v5290_v48 = vcombine.low %v1386_v20, %v1389_v13  ;;  %v6948_v13 = vld [vmem:[#allocation60_spill] sm:$0xff]  ;;  %v6952_v49 = vld [vmem:[#allocation57_spill] sm:$0xff]  ;;  %v5404_v42 = vcombine.low %v4133_v9, %v4134_v6 }
  0xd5   : > { %v1405_v55 = vsel %vm4873_vm5, %v1403_v60, %v1404_v52  ;;  %v1408_v18 = vsel %vm4873_vm5, %v1406_v36, %v1407_v4  ;;  %6936 = vst [vmem:[#allocation35_spill] sm:$0xff] %v5286_v54  ;;  %v5306_v52 = vcombine.low %v6941_v0, %v6940_v39  ;;  %v4130_v54 = vld [vmem:[%s4286_s30 + $0x98] sm:$0xf]  ;;  %v6971_v6 = vld [vmem:[#allocation4_spill] sm:$0xff] }
  0xd6   : > { %1939 = vrot.lane.b32.xlu1 %v5242_v63, %s4208_s6  ;;  %v5284_v14 = vcombine.low %v1405_v55, %v1408_v18  ;;  %6937 = vst [vmem:[#allocation37_spill] sm:$0xff] %v5290_v48  ;;  %v1399_v10 = vsel %vm4873_vm5, %v3712_v40, %v1398_v41  ;;  %v1402_v45 = vsel %vm4873_vm5, %v1400_v33, %v1401_v31  ;;  %v5302_v11 = vpop.permute.xlu0 %1749  ;;  %v6943_v31 = vld [vmem:[#allocation55_spill] sm:$0xff]  ;;  %v6946_v41 = vld [vmem:[#allocation53_spill] sm:$0xff] }
  0xd7   : > { %1933 = vrot.lane.b32.xlu0 %v5240_v23, %s4208_s6  ;;  %v5300_v51 = vcombine.low %v1399_v10, %v1402_v45  ;;  %6939 = vst [vmem:[#allocation42_spill] sm:$0xff] %v5302_v11  ;;  %v5316_v4 = vcombine.low %v6943_v31, %v4935_v47  ;;  %v5320_v60 = vcombine.low %v6946_v41, %v6945_v38  ;;  %v6949_v55 = vld [vmem:[#allocation59_spill] sm:$0xff]  ;;  %v6951_v47 = vld [vmem:[#allocation58_spill] sm:$0xff]  ;;  %v6955_v45 = vld [vmem:[#allocation65_spill] sm:$0xff] }
  0xd8   : > { %6935 = vst [vmem:[#allocation34_spill] sm:$0xff] %v5284_v14  ;;  %v5308_v21 = vpop.permute.xlu1 %1755  ;;  %v5332_v18 = vcombine.low %v6949_v55, %v6948_v13  ;;  %v5336_v40 = vcombine.low %v6952_v49, %v6951_v47  ;;  %v6954_v10 = vld [vmem:[#allocation66_spill] sm:$0xff]  ;;  %v6957_v31 = vld [vmem:[#allocation64_spill] sm:$0xff]  ;;  %v6958_v38 = vld [vmem:[#allocation63_spill] sm:$0xff] }
  0xd9   : > { %6938 = vst [vmem:[#allocation39_spill] sm:$0xff] %v5300_v51  ;;  %6942 = vst [vmem:[#allocation40_spill] sm:$0xff] %v5308_v21  ;;  %v5346_v39 = vcombine.low %v6955_v45, %v6954_v10  ;;  %v5352_v41 = vcombine.low %v6958_v38, %v6957_v31  ;;  %v6960_v13 = vld [vmem:[#allocation69_spill] sm:$0xff]  ;;  %v6961_v47 = vld [vmem:[#allocation68_spill] sm:$0xff] }
  0xda   : > { %1943 = vrot.lane.b32.xlu1 %v5265_v34, %s4208_s6  ;;  %6944 = vst [vmem:[#allocation51_spill] sm:$0xff] %v5316_v4  ;;  %v5322_v36 = vpop.permute.xlu0 %1753  ;;  %6950 = vst [vmem:[#allocation55_spill] sm:$0xff] %v5332_v18  ;;  %v5360_v55 = vcombine.low %v6960_v13, %v5019_v29  ;;  %v6962_v49 = vld [vmem:[#allocation67_spill] sm:$0xff]  ;;  %v4128_v13 = vld [vmem:[%s4286_s30 + $0x68] sm:$0xf] }
  0xdb   : > { %1937 = vrot.lane.b32.xlu0 %v5269_v15, %s4208_s6  ;;  %6947 = vst [vmem:[#allocation50_spill] sm:$0xff] %v5322_v36  ;;  %6953 = vst [vmem:[#allocation54_spill] sm:$0xff] %v5336_v40  ;;  %v5364_v10 = vcombine.low %v6962_v49, %v6961_v47  ;;  %v4126_v38 = vld [vmem:[%s4286_s30 + $0x80] sm:$0xf]  ;;  %v4127_v21 = vld [vmem:[%s4286_s30 + $0x84] sm:$0xf]  ;;  %v5380_v47 = vcombine.low %v5040_v24, %v4128_v13 }
  0xdc   : > { %v5326_v20 = vpop.permute.xlu1 %1759  ;;  %6956 = vst [vmem:[#allocation53_spill] sm:$0xff] %v5346_v39  ;;  %6959 = vst [vmem:[#allocation60_spill] sm:$0xff] %v5352_v41  ;;  %v5376_v29 = vcombine.low %v4126_v38, %v4127_v21  ;;  %v4129_v36 = vld [vmem:[%s4286_s30 + $0x94] sm:$0xf]  ;;  %v4131_v38 = vld [vmem:[%s4286_s30 + $0x78] sm:$0xf] }
  0xdd   : > { %6963 = vst [vmem:[#allocation59_spill] sm:$0xff] %v5364_v10  ;;  %v5390_v11 = vcombine.low %v4129_v36, %v4130_v54  ;;  %v4132_v24 = vld [vmem:[%s4286_s30 + $0x7c] sm:$0xf]  ;;  %v4135_v54 = vld [vmem:[%s4286_s30 + $0x8c] sm:$0xf] }
  0xde   : > { %1947 = vrot.lane.b32.xlu1 %v5284_v14, %s4208_s6  ;;  %v5342_v33 = vpop.permute.xlu0 %1757  ;;  %v5396_v13 = vcombine.low %v4131_v38, %v4132_v24  ;;  %v4136_v36 = vld [vmem:[%s4286_s30 + $0x90] sm:$0xf]  ;;  %v4137_v24 = vld [vmem:[%s4286_s30 + $0xa0] sm:$0xf]  ;;  %v7040_v34 = vld [vmem:[#allocation44_spill] sm:$0xff] }
  0xdf   : > { %1941 = vrot.lane.b32.xlu0 %v5290_v48, %s4208_s6  ;;  %6966 = vst [vmem:[#allocation66_spill] sm:$0xff] %v5390_v11  ;;  %v5408_v25 = vcombine.low %v4135_v54, %v4136_v36  ;;  %v5420_v9 = vcombine.low %v4137_v24, %v4138_v44  ;;  %v6976_v24 = vld [vmem:[#allocation61_spill] sm:$0xff]  ;;  %v6985_v14 = vld [vmem:[#allocation7_spill] sm:$0xff]  ;;  %v3716_v48 = vcombine.low %v7040_v34, %v7039_v37 }
  0xe0   : > { %v5348_v0 = vpop.permute.xlu1 %1763 }
  0xe1   : > { %6968 = vst [vmem:[#allocation64_spill] sm:$0xff] %v5408_v25  ;;  %v2375_v34 = vsel %vm2369_vm8, %v3716_v48, %v5145_v53 }
  0xe2   : > { %1957 = vrot.lane.b32.xlu1 %v5306_v52, %s4209_s7 }
  0xe3   : > { %1945 = vrot.lane.b32.xlu0 %v5300_v51, %s4208_s6  ;;  %v4144_v51 = vld [vmem:[%s4286_s30 + $0xd4] sm:$0xf]  ;;  %s3694_s6 = sshll.u32 %s7157_s24, 1 }
  0xe4   : > { %v5366_v45 = vpop.permute.xlu0 %1761 }
  0xe6   : > { %1961 = vrot.lane.b32.xlu1 %v5316_v4, %s4209_s7 }
  0xe7   : > { %1955 = vrot.lane.b32.xlu0 %v5320_v60, %s4209_s7  ;;  %v5370_v31 = vpop.permute.xlu1 %1767 }
  0xe8   : > { %6964 = vst [vmem:[#allocation58_spill] sm:$0xff] %v5370_v31 }
  0xea   : > { %1965 = vrot.lane.b32.xlu1 %v5332_v18, %s4209_s7 }
  0xeb   : > { %1959 = vrot.lane.b32.xlu0 %v5336_v40, %s4209_s7 }
  0xec   : > { %v5386_v49 = vpop.permute.xlu0 %1765 }
  0xed   : > { %6965 = vst [vmem:[#allocation57_spill] sm:$0xff] %v5386_v49 }
  0xee   : > { %1969 = vrot.lane.b32.xlu1 %v5346_v39, %s4209_s7 }
  0xef   : > { %1963 = vrot.lane.b32.xlu0 %v5352_v41, %s4209_s7  ;;  %v5392_v21 = vpop.permute.xlu1 %1771 }
  0xf0   : > { %6967 = vst [vmem:[#allocation65_spill] sm:$0xff] %v5392_v21 }
  0xf2   : > { %1973 = vrot.lane.b32.xlu1 %v5360_v55, %s4209_s7 }
  0xf3   : > { %1967 = vrot.lane.b32.xlu0 %v5364_v10, %s4209_s7 }
  0xf4   : > { %v5410_v5 = vpop.permute.xlu0 %1769 }
  0xf5   : > { %6969 = vst [vmem:[#allocation63_spill] sm:$0xff] %v5410_v5  ;;  %v6974_v5 = vld [vmem:[#allocation5_spill] sm:$0xff] }
  0xf6   : > { %1977 = vrot.lane.b32.xlu1 %v5376_v29, %s4209_s7 }
  0xf7   : > { %1971 = vrot.lane.b32.xlu0 %v5380_v47, %s4209_s7  ;;  %v5414_v38 = vpop.permute.xlu1 %1775 }
  0xf8   : > { %6970 = vst [vmem:[#allocation69_spill] sm:$0xff] %v5414_v38  ;;  %v4140_v38 = vld [vmem:[%s4286_s30 + $0xc0] sm:$0xf] }
  0xf9   : > { %v5432_v21 = vcombine.low %v4139_v7, %v4140_v38  ;;  %v6979_v7 = vld [vmem:[#allocation56_spill] sm:$0xff] }
  0xfa   : > { %1981 = vrot.lane.b32.xlu1 %v5390_v11, %s4209_s7  ;;  %v6980_v38 = vld [vmem:[#allocation20_spill] sm:$0xff] }
  0xfb   : > { %1975 = vrot.lane.b32.xlu0 %v5396_v13, %s4209_s7 }
  0xfc   : > { %v5426_v54 = vpop.permute.xlu0 %1773 }
  0xfd   : > { %6972 = vst [vmem:[#allocation68_spill] sm:$0xff] %v5426_v54 }
  0xfe   : > { %1987 = vrot.lane.b32.xlu1 %v5404_v42, %s4209_s7 }
  0xff   : > { %1979 = vrot.lane.b32.xlu0 %v5408_v25, %s4209_s7  ;;  %v5428_v36 = vpop.permute.xlu1 %1779 }
 0x100   : > { %6973 = vst [vmem:[#allocation67_spill] sm:$0xff] %v5428_v36  ;;  %v6978_v36 = vld [vmem:[#allocation21_spill] sm:$0xff] }
 0x102   : > { %2025 = vrot.lane.b32.xlu1 %v6971_v6, %s4210_s8 }
 0x103   : > { %1983 = vrot.lane.b32.xlu0 %v5420_v9, %s4209_s7 }
 0x104   : > { %v5438_v44 = vpop.permute.xlu0 %1777 }
 0x105   : > { %6975 = vst [vmem:[#allocation4_spill] sm:$0xff] %v5438_v44 }
 0x106   : > { %2027 = vrot.lane.b32.xlu1 %v6974_v5, %s4210_s8 }
 0x107   : > { %1989 = vrot.lane.b32.xlu0 %v5432_v21, %s4209_s7  ;;  %v5442_v6 = vpop.permute.xlu1 %1783 }
 0x108   : > { %6977 = vst [vmem:[#allocation5_spill] sm:$0xff] %v5442_v6 }
 0x10a   : > { %2095 = vrot.lane.b32.xlu1 %v6976_v24, %s4211_s9 }
 0x10b   : > { %2057 = vrot.lane.b32.xlu0 %v6978_v36, %s4210_s8  ;;  %v4142_v36 = vld [vmem:[%s4286_s30 + $0xcc] sm:$0xf] }
 0x10c   : > { %v5450_v5 = vpop.permute.xlu0 %1781 }
 0x10d   : > { %6981 = vst [vmem:[#allocation61_spill] sm:$0xff] %v5450_v5  ;;  %v4213_v5 = vmov 65535  }
 0x10e   : > { %2097 = vrot.lane.b32.xlu1 %v6979_v7, %s4211_s9  ;;  %v4091_v7 = vld [vmem:[%s6703_s2] sm:$0xff]   ;;  %v3003_v44 = vsel %vm3001_vm6, 4294967295, %v4213_v5 }
 0x10f   : > { %2059 = vrot.lane.b32.xlu0 %v6980_v38, %s4210_s8  ;;  %v5452_v54 = vpop.permute.xlu1 %1787  ;;  %3935 = vmatprep.subr.bf16.mxu0 %v4091_v7  ;;  %v4141_v38 = vld [vmem:[%s4286_s30 + $0xc8] sm:$0xf] }
 0x110   : > { %6982 = vst [vmem:[#allocation56_spill] sm:$0xff] %v5452_v54  ;;  %v4092_v54 = vld [vmem:[%s6703_s2 + $0x8] sm:$0x3f]   ;;  %3936 = vmatpush3.bf16.msra.mxu0 %v4091_v7  ;;  %4003 = vmatprep.subr.bf16.mxu1 %v4091_v7  ;;  %v5476_v35 = vcombine.low %v4141_v38, %v4142_v36 }
 0x111   : > { %4005 = vmatpush3.bf16.msra.mxu1 %v4091_v7 }
 0x112   : > { %2165 = vrot.lane.b32.xlu1 %v5336_v40, %s4212_s10  ;;  %6984 = vst [vmem:[#allocation80_spill] sm:$0xff] %v5476_v35 }
 0x113   : > { %2127 = vrot.lane.b32.xlu0 %v5184_v56, %s4211_s9  ;;  %v5458_v24 = vpop.permute.xlu1 %1887  ;;  %v3004_v56 = vsel %vm3002_vm7, %v3003_v44, 0  ;;  %v4143_v44 = vld [vmem:[%s4286_s30 + $0xd0] sm:$0xf] }
 0x114   : > { %v3006_v28 = vand.u32 %v4092_v54, %v3004_v56  ;;  %v5488_v36 = vcombine.low %v4143_v44, %v4144_v51  ;;  %v6988_v56 = vld [vmem:[#allocation6_spill] sm:$0xff]  ;;  %v6991_v51 = vld [vmem:[#allocation23_spill] sm:$0xff] }
 0x115   : > { %v5460_v6 = vpop.permute.xlu0 %1785 }
 0x116   : > { %6983 = vst [vmem:[#allocation79_spill] sm:$0xff] %v5460_v6  ;;  %2167 = vrot.lane.b32.xlu1 %v5316_v4, %s4212_s10  ;;  %3937 = vmatprep.subr.bf16.mxu0 %v3006_v28  ;;  %6987 = vst [vmem:[#allocation81_spill] sm:$0xff] %v5488_v36 }
 0x117   : > { %2129 = vrot.lane.b32.xlu0 %v5151_v3, %s4211_s9  ;;  %v5472_v6 = vpop.permute.xlu1 %1891  ;;  %3938 = vmatpush3.bf16.msra.mxu0 %v3006_v28 }
 0x118   : > { %4004 = vmatprep.subr.bf16.mxu1 %v3006_v28 }
 0x119   : > { %v5478_v3 = vpop.permute.xlu0 %1885  ;;  %4006 = vmatpush3.bf16.msra.mxu1 %v3006_v28 }
 0x11a   : > { %2235 = vrot.lane.b32.xlu1 %v6985_v14, %s4214_s23 }
 0x11b   : > { %2197 = vrot.lane.b32.xlu0 %v5476_v35, %s4212_s10 }
 0x11c   : > { %v5484_v5 = vpop.permute.xlu1 %1895 }
 0x11d   : > { %6986 = vst [vmem:[#allocation7_spill] sm:$0xff] %v5484_v5  ;;  %v5490_v38 = vpop.permute.xlu0 %1889 }
 0x11e   : > { %2237 = vrot.lane.b32.xlu1 %v6988_v56, %s4214_s23 }
 0x11f   : > { %2199 = vrot.lane.b32.xlu0 %v5488_v36, %s4212_s10 }
 0x120   : > { %v5496_v54 = vpop.permute.xlu1 %1899 }
 0x121   : > { %6989 = vst [vmem:[#allocation6_spill] sm:$0xff] %v5496_v54  ;;  %v5498_v7 = vpop.permute.xlu0 %1893 }
 0x122   : > { %6990 = vst [vmem:[#allocation82_spill] sm:$0xff] %v5498_v7  ;;  %2305 = vrot.lane.b32.xlu1 %v4981_v43, %s4215_s25 }
 0x123   : > { %2267 = vrot.lane.b32.xlu0 %v6991_v51, %s4214_s23 }
 0x124   : > { %v5504_v44 = vpop.permute.xlu1 %1903 }
 0x125   : > { %6992 = vst [vmem:[#allocation23_spill] sm:$0xff] %v5504_v44  ;;  %v5506_v28 = vpop.permute.xlu0 %1897 }
 0x126   : > { %6993 = vst [vmem:[#allocation83_spill] sm:$0xff] %v5506_v28  ;;  %2307 = vrot.lane.b32.xlu1 %v6994_v16, %s4215_s25 }
 0x127   : > { %2269 = vrot.lane.b32.xlu0 %v6995_v57, %s4214_s23 }
 0x128   : > { %v5512_v54 = vpop.permute.xlu1 %1907 }
 0x129   : > { %6996 = vst [vmem:[#allocation62_spill] sm:$0xff] %v5512_v54  ;;  %v5514_v31 = vpop.permute.xlu0 %1901 }
 0x12a   : > { %6997 = vst [vmem:[#allocation22_spill] sm:$0xff] %v5514_v31  ;;  %1991 = vrot.lane.b32.xlu1 %v5476_v35, %s4209_s7 }
 0x12b   : > { %2337 = vrot.lane.b32.xlu0 %v5192_v22, %s4215_s25 }
 0x12c   : > { %v5520_v11 = vpop.permute.xlu1 %1911 }
 0x12d   : > { %6998 = vst [vmem:[#allocation84_spill] sm:$0xff] %v5520_v11  ;;  %v5522_v44 = vpop.permute.xlu0 %1905 }
 0x12e   : > { %6999 = vst [vmem:[#allocation85_spill] sm:$0xff] %v5522_v44  ;;  %2029 = vrot.lane.b32.xlu1 %v6985_v14, %s4210_s8 }
 0x12f   : > { %2339 = vrot.lane.b32.xlu0 %v5169_v30, %s4215_s25 }
 0x130   : > { %v5528_v28 = vpop.permute.xlu1 %1915 }
 0x131   : > { %7000 = vst [vmem:[#allocation86_spill] sm:$0xff] %v5528_v28  ;;  %v5530_v54 = vpop.permute.xlu0 %1909 }
 0x132   : > { %7001 = vst [vmem:[#allocation87_spill] sm:$0xff] %v5530_v54  ;;  %2031 = vrot.lane.b32.xlu1 %v6988_v56, %s4210_s8  ;;  %v4146_v54 = vld [vmem:[%s4286_s30 + $0xe0] sm:$0xf] }
 0x133   : > { %1993 = vrot.lane.b32.xlu0 %v5488_v36, %s4209_s7 }
 0x134   : > { %v5536_v31 = vpop.permute.xlu1 %1919 }
 0x135   : > { %v5538_v11 = vpop.permute.xlu0 %1913 }
 0x136   : > { %7002 = vst [vmem:[#allocation88_spill] sm:$0xff] %v5538_v11  ;;  %2099 = vrot.lane.b32.xlu1 %v4981_v43, %s4211_s9 }
 0x137   : > { %2061 = vrot.lane.b32.xlu0 %v6991_v51, %s4210_s8 }
 0x138   : > { %v5544_v14 = vpop.permute.xlu1 %1923 }
 0x139   : > { %v5546_v28 = vpop.permute.xlu0 %1917 }
 0x13a   : > { %2101 = vrot.lane.b32.xlu1 %v6994_v16, %s4211_s9 }
 0x13b   : > { %2063 = vrot.lane.b32.xlu0 %v6995_v57, %s4210_s8  ;;  %v4145_v57 = vld [vmem:[%s4286_s30 + $0xdc] sm:$0xf] }
 0x13c   : > { %v5552_v56 = vpop.permute.xlu1 %1927  ;;  %v5572_v44 = vcombine.low %v4145_v57, %v4146_v54 }
 0x13d   : > { %7003 = vst [vmem:[#allocation89_spill] sm:$0xff] %v5552_v56  ;;  %v5554_v11 = vpop.permute.xlu0 %1921  ;;  %v4148_v56 = vld [vmem:[%s4286_s30 + $0xe8] sm:$0xf] }
 0x13e   : > { %2169 = vrot.lane.b32.xlu1 %v5352_v41, %s4212_s10  ;;  %7007 = vst [vmem:[#allocation93_spill] sm:$0xff] %v5572_v44 }
 0x13f   : > { %2131 = vrot.lane.b32.xlu0 %v5192_v22, %s4211_s9  ;;  %v7009_v22 = vld [vmem:[#allocation9_spill] sm:$0xff] }
 0x140   : > { %v5560_v43 = vpop.permute.xlu1 %1931 }
 0x141   : > { %7004 = vst [vmem:[#allocation90_spill] sm:$0xff] %v5560_v43  ;;  %v5562_v51 = vpop.permute.xlu0 %1925 }
 0x142   : > { %7005 = vst [vmem:[#allocation91_spill] sm:$0xff] %v5562_v51  ;;  %2171 = vrot.lane.b32.xlu1 %v5332_v18, %s4212_s10  ;;  %v4147_v18 = vld [vmem:[%s4286_s30 + $0xe4] sm:$0xf] }
 0x143   : > { %2133 = vrot.lane.b32.xlu0 %v5169_v30, %s4211_s9  ;;  %v5584_v36 = vcombine.low %v4147_v18, %v4148_v56 }
 0x144   : > { %v5568_v16 = vpop.permute.xlu1 %1935 }
 0x145   : > { %7006 = vst [vmem:[#allocation92_spill] sm:$0xff] %v5568_v16  ;;  %v5574_v41 = vpop.permute.xlu0 %1929  ;;  %7011 = vst [vmem:[#allocation95_spill] sm:$0xff] %v5584_v36  ;;  %v7013_v16 = vld [vmem:[#allocation8_spill] sm:$0xff] }
 0x146   : > { %7008 = vst [vmem:[#allocation94_spill] sm:$0xff] %v5574_v41  ;;  %2239 = vrot.lane.b32.xlu1 %v7009_v22, %s4214_s23 }
 0x147   : > { %2201 = vrot.lane.b32.xlu0 %v5572_v44, %s4212_s10 }
 0x148   : > { %v5580_v43 = vpop.permute.xlu1 %1939 }
 0x149   : > { %7010 = vst [vmem:[#allocation9_spill] sm:$0xff] %v5580_v43  ;;  %v5586_v30 = vpop.permute.xlu0 %1933  ;;  %v7016_v43 = vld [vmem:[#allocation26_spill] sm:$0xff] }
 0x14a   : > { %7012 = vst [vmem:[#allocation96_spill] sm:$0xff] %v5586_v30  ;;  %2241 = vrot.lane.b32.xlu1 %v7013_v16, %s4214_s23  ;;  %v7019_v30 = vld [vmem:[#allocation24_spill] sm:$0xff] }
 0x14b   : > { %2203 = vrot.lane.b32.xlu0 %v5584_v36, %s4212_s10 }
 0x14c   : > { %v5592_v54 = vpop.permute.xlu1 %1943 }
 0x14d   : > { %7014 = vst [vmem:[#allocation8_spill] sm:$0xff] %v5592_v54  ;;  %v5594_v57 = vpop.permute.xlu0 %1937 }
 0x14e   : > { %7015 = vst [vmem:[#allocation97_spill] sm:$0xff] %v5594_v57  ;;  %2309 = vrot.lane.b32.xlu1 %v5022_v58, %s4215_s25 }
 0x14f   : > { %2271 = vrot.lane.b32.xlu0 %v7016_v43, %s4214_s23 }
 0x150   : > { %v5600_v18 = vpop.permute.xlu1 %1947 }
 0x151   : > { %7017 = vst [vmem:[#allocation26_spill] sm:$0xff] %v5600_v18  ;;  %v5602_v56 = vpop.permute.xlu0 %1941 }
 0x152   : > { %7018 = vst [vmem:[#allocation98_spill] sm:$0xff] %v5602_v56  ;;  %2311 = vrot.lane.b32.xlu1 %v4993_v32, %s4215_s25 }
 0x153   : > { %2273 = vrot.lane.b32.xlu0 %v7019_v30, %s4214_s23 }
 0x154   : > { %v5608_v41 = vpop.permute.xlu1 %1957 }
 0x155   : > { %v5610_v54 = vpop.permute.xlu0 %1945 }
 0x156   : > { %7020 = vst [vmem:[#allocation24_spill] sm:$0xff] %v5610_v54  ;;  %1995 = vrot.lane.b32.xlu1 %v5572_v44, %s4209_s7 }
 0x157   : > { %2341 = vrot.lane.b32.xlu0 %v5212_v62, %s4215_s25 }
 0x158   : > { %v5616_v57 = vpop.permute.xlu1 %1961 }
 0x159   : > { %v5618_v18 = vpop.permute.xlu0 %1955 }
 0x15a   : > { %2033 = vrot.lane.b32.xlu1 %v7009_v22, %s4210_s8 }
 0x15b   : > { %2343 = vrot.lane.b32.xlu0 %v5194_v19, %s4215_s25 }
 0x15c   : > { %v5624_v56 = vpop.permute.xlu1 %1965 }
 0x15d   : > { %7021 = vst [vmem:[#allocation99_spill] sm:$0xff] %v5624_v56  ;;  %v5626_v51 = vpop.permute.xlu0 %1959 }
 0x15e   : > { %2035 = vrot.lane.b32.xlu1 %v7013_v16, %s4210_s8 }
 0x15f   : > { %1997 = vrot.lane.b32.xlu0 %v5584_v36, %s4209_s7 }
 0x160   : > { %v5632_v54 = vpop.permute.xlu1 %1969 }
 0x161   : > { %7022 = vst [vmem:[#allocation100_spill] sm:$0xff] %v5632_v54  ;;  %v5634_v44 = vpop.permute.xlu0 %1963  ;;  %v7034_v54 = vld [vmem:[#allocation10_spill] sm:$0xff] }
 0x162   : > { %7023 = vst [vmem:[#allocation101_spill] sm:$0xff] %v5634_v44  ;;  %2103 = vrot.lane.b32.xlu1 %v5022_v58, %s4211_s9  ;;  %v7038_v44 = vld [vmem:[#allocation48_spill] sm:$0xff] }
 0x163   : > { %2065 = vrot.lane.b32.xlu0 %v7016_v43, %s4210_s8  ;;  %v3715_v7 = vcombine.low %v7038_v44, %v7037_v46 }
 0x164   : > { %v5640_v22 = vpop.permute.xlu1 %1973 }
 0x165   : > { %7024 = vst [vmem:[#allocation102_spill] sm:$0xff] %v5640_v22  ;;  %v5642_v35 = vpop.permute.xlu0 %1967  ;;  %v2372_v40 = vsel %vm2369_vm8, %v3715_v7, %v5113_v26 }
 0x166   : > { %7025 = vst [vmem:[#allocation103_spill] sm:$0xff] %v5642_v35  ;;  %2105 = vrot.lane.b32.xlu1 %v4993_v32, %s4211_s9  ;;  %v2468_v46 = vsel %vm2466_vm9, %v2372_v40, %v5478_v3  ;;  %v2470_v3 = vsel %vm2466_vm9, %v2375_v34, %v5458_v24  ;;  %v4154_v24 = vld [vmem:[%s4286_s30 + $0xac] sm:$0xf]  ;;  %v4156_v34 = vld [vmem:[%s4286_s30 + $0x108] sm:$0xf] }
 0x167   : > { %2067 = vrot.lane.b32.xlu0 %v7019_v30, %s4210_s8  ;;  %v4149_v30 = vld [vmem:[%s4286_s30 + $0xf0] sm:$0xf]  ;;  %v2533_v44 = vsel %vm2531_vm10, %v2468_v46, %v5618_v18  ;;  %v2535_v53 = vsel %vm2531_vm10, %v2470_v3, %v5608_v41  ;;  %v2420_v41 = vsel %vm2369_vm8, %v5420_v9, %v5342_v33 }
 0x168   : > { %v5648_v16 = vpop.permute.xlu1 %1977 }
 0x169   : > { %7026 = vst [vmem:[#allocation104_spill] sm:$0xff] %v5648_v16  ;;  %v5650_v36 = vpop.permute.xlu0 %1971  ;;  %v4150_v16 = vld [vmem:[%s4286_s30 + $0xf4] sm:$0xf] }
 0x16a   : > { %7027 = vst [vmem:[#allocation105_spill] sm:$0xff] %v5650_v36  ;;  %2173 = vrot.lane.b32.xlu1 %v5364_v10, %s4212_s10  ;;  %v5668_v22 = vcombine.low %v4149_v30, %v4150_v16 }
 0x16b   : > { %2135 = vrot.lane.b32.xlu0 %v5212_v62, %s4211_s9  ;;  %v7032_v62 = vld [vmem:[#allocation11_spill] sm:$0xff] }
 0x16c   : > { %v5656_v58 = vpop.permute.xlu1 %1981  ;;  %7030 = vst [vmem:[#allocation108_spill] sm:$0xff] %v5668_v22 }
 0x16d   : > { %7028 = vst [vmem:[#allocation106_spill] sm:$0xff] %v5656_v58  ;;  %v5658_v43 = vpop.permute.xlu0 %1975 }
 0x16e   : > { %7029 = vst [vmem:[#allocation107_spill] sm:$0xff] %v5658_v43  ;;  %2175 = vrot.lane.b32.xlu1 %v5346_v39, %s4212_s10  ;;  %v4151_v43 = vld [vmem:[%s4286_s30 + $0xf8] sm:$0xf]  ;;  %v4152_v39 = vld [vmem:[%s4286_s30 + $0xfc] sm:$0xf] }
 0x16f   : > { %2137 = vrot.lane.b32.xlu0 %v5194_v19, %s4211_s9  ;;  %v5678_v10 = vcombine.low %v4151_v43, %v4152_v39  ;;  %v7036_v43 = vld [vmem:[#allocation29_spill] sm:$0xff] }
 0x170   : > { %v5664_v32 = vpop.permute.xlu1 %1987 }
 0x171   : > { %v5670_v36 = vpop.permute.xlu0 %1979 }
 0x172   : > { %7031 = vst [vmem:[#allocation109_spill] sm:$0xff] %v5670_v36  ;;  %2243 = vrot.lane.b32.xlu1 %v7032_v62, %s4214_s23  ;;  %v7035_v36 = vld [vmem:[#allocation33_spill] sm:$0xff] }
 0x173   : > { %2205 = vrot.lane.b32.xlu0 %v5668_v22, %s4212_s10 }
 0x174   : > { %v2026_v58 = vpop.permute.xlu1 %2025 }
 0x175   : > { %v5680_v19 = vpop.permute.xlu0 %1983  ;;  %v2598_v26 = vsel %vm2596_vm11, %v2533_v44, %v2026_v58 }
 0x176   : > { %7033 = vst [vmem:[#allocation11_spill] sm:$0xff] %v5680_v19  ;;  %2245 = vrot.lane.b32.xlu1 %v7034_v54, %s4214_s23 }
 0x177   : > { %2207 = vrot.lane.b32.xlu0 %v5678_v10, %s4212_s10 }
 0x178   : > { %v2028_v16 = vpop.permute.xlu1 %2027 }
 0x179   : > { %v5686_v30 = vpop.permute.xlu0 %1989 }
 0x17a   : > { %2313 = vrot.lane.b32.xlu1 %v5044_v50, %s4215_s25 }
 0x17b   : > { %2275 = vrot.lane.b32.xlu0 %v7035_v36, %s4214_s23 }
 0x17c   : > { %v2096_v35 = vpop.permute.xlu1 %2095 }
 0x17d   : > { %v5692_v39 = vpop.permute.xlu0 %2057 }
 0x17e   : > { %2315 = vrot.lane.b32.xlu1 %v5035_v27, %s4215_s25 }
 0x17f   : > { %2277 = vrot.lane.b32.xlu0 %v7036_v43, %s4214_s23 }
 0x180   : > { %v2098_v19 = vpop.permute.xlu1 %2097 }
 0x181   : > { %v5698_v49 = vpop.permute.xlu0 %2059 }
 0x182   : > { %1999 = vrot.lane.b32.xlu1 %v5668_v22, %s4209_s7 }
 0x183   : > { %2345 = vrot.lane.b32.xlu0 %v5240_v23, %s4215_s25 }
 0x184   : > { %v2166_v25 = vpop.permute.xlu1 %2165 }
 0x185   : > { %v2128_v56 = vpop.permute.xlu0 %2127 }
 0x186   : > { %2037 = vrot.lane.b32.xlu1 %v7032_v62, %s4210_s8 }
 0x187   : > { %2347 = vrot.lane.b32.xlu0 %v5221_v61, %s4215_s25 }
 0x188   : > { %v2168_v5 = vpop.permute.xlu1 %2167 }
 0x189   : > { %v5708_v4 = vpop.permute.xlu0 %2129 }
 0x18a   : > { %2039 = vrot.lane.b32.xlu1 %v7034_v54, %s4210_s8 }
 0x18b   : > { %2001 = vrot.lane.b32.xlu0 %v5678_v10, %s4209_s7 }
 0x18c   : > { %v2236_v22 = vpop.permute.xlu1 %2235 }
 0x18d   : > { %v2198_v62 = vpop.permute.xlu0 %2197 }
 0x18e   : > { %2107 = vrot.lane.b32.xlu1 %v5044_v50, %s4211_s9  ;;  %v2663_v50 = vsel %vm2661_vm12, %v2598_v26, %v2096_v35 }
 0x18f   : > { %2069 = vrot.lane.b32.xlu0 %v7035_v36, %s4210_s8  ;;  %v2728_v40 = vsel %vm2726_vm13, %v2663_v50, %v2166_v25  ;;  %v2600_v36 = vsel %vm2596_vm11, %v2535_v53, %v2028_v16  ;;  %v4153_v25 = vld [vmem:[%s4286_s30 + $0xa8] sm:$0xf] }
 0x190   : > { %v2238_v54 = vpop.permute.xlu1 %2237  ;;  %v2793_v35 = vsel %vm2791_vm14, %v2728_v40, %v2236_v22  ;;  %v2665_v18 = vsel %vm2661_vm12, %v2600_v36, %v2098_v19  ;;  %v5750_v58 = vcombine.low %v4153_v25, %v4154_v24  ;;  %v2500_v19 = vsel %vm2466_vm9, %v2420_v41, %v5546_v28  ;;  %v7043_v25 = vld [vmem:[#allocation38_spill] sm:$0xff] }
 0x191   : > { %v2200_v37 = vpop.permute.xlu0 %2199  ;;  %v2730_v22 = vsel %vm2726_vm13, %v2665_v18, %v2168_v5  ;;  %v2565_v46 = vsel %vm2531_vm10, %v2500_v19, %v5664_v32  ;;  %v7042_v18 = vld [vmem:[#allocation12_spill] sm:$0xff] }
 0x192   : > { %2109 = vrot.lane.b32.xlu1 %v5035_v27, %s4211_s9  ;;  %v2795_v16 = vsel %vm2791_vm14, %v2730_v22, %v2238_v54  ;;  %v2630_v33 = vsel %vm2596_vm11, %v2565_v46, %v5692_v39  ;;  %v4155_v54 = vld [vmem:[%s4286_s30 + $0x104] sm:$0xf]  ;;  %v7044_v22 = vld [vmem:[#allocation36_spill] sm:$0xff] }
 0x193   : > { %2071 = vrot.lane.b32.xlu0 %v7036_v43, %s4210_s8  ;;  %v2695_v5 = vsel %vm2661_vm12, %v2630_v33, %v2128_v56  ;;  %v5782_v50 = vcombine.low %v4155_v54, %v4156_v34 }
 0x194   : > { %v2306_v48 = vpop.permute.xlu1 %2305  ;;  %v2760_v32 = vsel %vm2726_vm13, %v2695_v5, %v2198_v62  ;;  %v7041_v62 = vld [vmem:[#allocation13_spill] sm:$0xff]  ;;  %v2378_v5 = vsel %vm2369_vm8, %v5320_v60, %v5082_v12  ;;  %v2381_v12 = vsel %vm2369_vm8, %v5306_v52, %v5118_v2 }
 0x195   : > { %v2268_v27 = vpop.permute.xlu0 %2267  ;;  %v2858_v7 = vsel %vm2856_vm15, %v2793_v35, %v2306_v48  ;;  %v4157_v35 = vld [vmem:[%s4286_s30 + $0x10c] sm:$0xf]  ;;  %v4158_v48 = vld [vmem:[%s4286_s30 + $0x110] sm:$0xf] }
 0x196   : > { %2177 = vrot.lane.b32.xlu1 %v5380_v47, %s4212_s10  ;;  %3939 = vmatprep.mubr.msk.bf16.mxu0 %vm2936_vm0, %v2858_v7  ;;  %v2825_v56 = vsel %vm2791_vm14, %v2760_v32, %v2268_v27  ;;  %v5800_v36 = vcombine.low %v4157_v35, %v4158_v48 }
 0x197   : > { %2139 = vrot.lane.b32.xlu0 %v5240_v23, %s4211_s9  ;;  %v2423_v23 = vsel %vm2369_vm8, %v5750_v58, %v5326_v20 }
 0x198   : > { %v2308_v43 = vpop.permute.xlu1 %2307  ;;  %v2502_v28 = vsel %vm2466_vm9, %v2423_v23, %v5536_v31 }
 0x199   : > { %v2270_v44 = vpop.permute.xlu0 %2269  ;;  %v2860_v26 = vsel %vm2856_vm15, %v2795_v16, %v2308_v43  ;;  %v2567_v20 = vsel %vm2531_vm10, %v2502_v28, %v5686_v30  ;;  %v2472_v28 = vsel %vm2466_vm9, %v2378_v5, %v5490_v38 }
 0x19a   : > { %2179 = vrot.lane.b32.xlu1 %v5360_v55, %s4212_s10  ;;  %3940 = vmatmul.mubr.msk.bf16.vlgmr.msra.gmra.mrb[0].mxu0 %vm2936_vm0, %v2860_v26  ;;  %v2537_v32 = vsel %vm2531_vm10, %v2472_v28, %v5626_v51  ;;  %v7047_v28 = vld [vmem:[#allocation43_spill] sm:$0xff] }
 0x19b   : > { %2141 = vrot.lane.b32.xlu0 %v5221_v61, %s4211_s9  ;;  %v2632_v61 = vsel %vm2596_vm11, %v2567_v20, %v5698_v49 }
 0x19c   : > { %v5778_v39 = vpop.permute.xlu1 %1991  ;;  %v2697_v40 = vsel %vm2661_vm12, %v2632_v61, %v5708_v4 }
 0x19d   : > { %v2338_v3 = vpop.permute.xlu0 %2337  ;;  %v2762_v30 = vsel %vm2726_vm13, %v2697_v40, %v2200_v37 }
 0x19e   : > { %v2890_v31 = vsel %vm2856_vm15, %v2825_v56, %v2338_v3  ;;  %2247 = vrot.lane.b32.xlu1 %v7041_v62, %s4214_s23  ;;  %v2827_v49 = vsel %vm2791_vm14, %v2762_v30, %v2270_v44 }
 0x19f   : > { %2209 = vrot.lane.b32.xlu0 %v5782_v50, %s4212_s10  ;;  %3971 = vmatprep.mubr.msk.bf16.mxu1 %vm2936_vm0, %v2890_v31 }
 0x1a0   : > { %v2030_v53 = vpop.permute.xlu1 %2029 }
 0x1a1   : > { %v2340_v27 = vpop.permute.xlu0 %2339  ;;  %v2602_v34 = vsel %vm2596_vm11, %v2537_v32, %v2030_v53 }
 0x1a2   : > { %v2892_v7 = vsel %vm2856_vm15, %v2827_v49, %v2340_v27  ;;  %2249 = vrot.lane.b32.xlu1 %v7042_v18, %s4214_s23  ;;  %v4159_v27 = vld [vmem:[%s4286_s30 + $0x118] sm:$0xf] }
 0x1a3   : > { %2211 = vrot.lane.b32.xlu0 %v5800_v36, %s4212_s10  ;;  %3972 = vmatmul.mubr.msk.bf16.vlgmr.msra.gmra.mrb[0].mxu1 %vm2936_vm0, %v2892_v7  ;;  %v4160_v7 = vld [vmem:[%s4286_s30 + $0x11c] sm:$0xf] }
 0x1a4   : > { %v2032_v4 = vpop.permute.xlu1 %2031 }
 0x1a5   : > { %v5809_v37 = vpop.permute.xlu0 %1993 }
 0x1a6   : > { %2317 = vrot.lane.b32.xlu1 %v5067_v1, %s4215_s25 }
 0x1a7   : > { %2279 = vrot.lane.b32.xlu0 %v7043_v25, %s4214_s23 }
 0x1a8   : > { %v2100_v24 = vpop.permute.xlu1 %2099 }
 0x1a9   : > { %v2062_v41 = vpop.permute.xlu0 %2061  ;;  %v2667_v60 = vsel %vm2661_vm12, %v2602_v34, %v2100_v24  ;;  %v7045_v24 = vld [vmem:[#allocation15_spill] sm:$0xff]  ;;  %v7048_v34 = vld [vmem:[#allocation41_spill] sm:$0xff] }
 0x1aa   : > { %2319 = vrot.lane.b32.xlu1 %v5051_v17, %s4215_s25 }
 0x1ab   : > { %2281 = vrot.lane.b32.xlu0 %v7044_v22, %s4214_s23 }
 0x1ac   : > { %v2102_v19 = vpop.permute.xlu1 %2101 }
 0x1ad   : > { %v2064_v16 = vpop.permute.xlu0 %2063 }
 0x1ae   : > { %2003 = vrot.lane.b32.xlu1 %v5782_v50, %s4209_s7 }
 0x1af   : > { %2349 = vrot.lane.b32.xlu0 %v5269_v15, %s4215_s25 }
 0x1b0   : > { %v2170_v43 = vpop.permute.xlu1 %2169 }
 0x1b1   : > { %v2132_v46 = vpop.permute.xlu0 %2131  ;;  %v2732_v38 = vsel %vm2726_vm13, %v2667_v60, %v2170_v43  ;;  %v4162_v43 = vld [vmem:[%s4286_s30 + $0x124] sm:$0xf]  ;;  %v7049_v60 = vld [vmem:[#allocation37_spill] sm:$0xff] }
 0x1b2   : > { %2041 = vrot.lane.b32.xlu1 %v7041_v62, %s4210_s8 }
 0x1b3   : > { %2351 = vrot.lane.b32.xlu0 %v5242_v63, %s4215_s25 }
 0x1b4   : > { %v2172_v44 = vpop.permute.xlu1 %2171 }
 0x1b5   : > { %v2134_v26 = vpop.permute.xlu0 %2133 }
 0x1b6   : > { %2043 = vrot.lane.b32.xlu1 %v7042_v18, %s4210_s8  ;;  %v5892_v18 = vcombine.low %v4159_v27, %v4160_v7  ;;  %v7058_v7 = vld [vmem:[#allocation99_spill] sm:$0xff] }
 0x1b7   : > { %2005 = vrot.lane.b32.xlu0 %v5800_v36, %s4209_s7 }
 0x1b8   : > { %v2240_v33 = vpop.permute.xlu1 %2239 }
 0x1b9   : > { %v2202_v23 = vpop.permute.xlu0 %2201  ;;  %v2797_v56 = vsel %vm2791_vm14, %v2732_v38, %v2240_v33 }
 0x1ba   : > { %2111 = vrot.lane.b32.xlu1 %v5067_v1, %s4211_s9  ;;  %v2474_v1 = vsel %vm2466_vm9, %v2381_v12, %v5472_v6  ;;  %v2426_v6 = vsel %vm2369_vm8, %v5404_v42, %v5366_v45 }
 0x1bb   : > { %2073 = vrot.lane.b32.xlu0 %v7043_v25, %s4210_s8  ;;  %v2539_v51 = vsel %vm2531_vm10, %v2474_v1, %v5616_v57  ;;  %v2504_v31 = vsel %vm2466_vm9, %v2426_v6, %v5554_v11 }
 0x1bc   : > { %v2242_v54 = vpop.permute.xlu1 %2241  ;;  %v2604_v2 = vsel %vm2596_vm11, %v2539_v51, %v2032_v4  ;;  %v2569_v30 = vsel %vm2531_vm10, %v2504_v31, %v5778_v39  ;;  %v7050_v51 = vld [vmem:[#allocation31_spill] sm:$0xff] }
 0x1bd   : > { %v2204_v20 = vpop.permute.xlu0 %2203  ;;  %v2634_v45 = vsel %vm2596_vm11, %v2569_v30, %v2062_v41 }
 0x1be   : > { %2113 = vrot.lane.b32.xlu1 %v5051_v17, %s4211_s9  ;;  %v2669_v17 = vsel %vm2661_vm12, %v2604_v2, %v2102_v19  ;;  %v2699_v11 = vsel %vm2661_vm12, %v2634_v45, %v2132_v46  ;;  %v4161_v19 = vld [vmem:[%s4286_s30 + $0x120] sm:$0xf] }
 0x1bf   : > { %2075 = vrot.lane.b32.xlu0 %v7044_v22, %s4210_s8  ;;  %v2734_v57 = vsel %vm2726_vm13, %v2669_v17, %v2172_v44  ;;  %v2764_v48 = vsel %vm2726_vm13, %v2699_v11, %v2202_v23  ;;  %v5908_v46 = vcombine.low %v4161_v19, %v4162_v43  ;;  %v7046_v23 = vld [vmem:[#allocation14_spill] sm:$0xff]  ;;  %v7055_v45 = vld [vmem:[#allocation75_spill] sm:$0xff] }
 0x1c0   : > { %v2310_v3 = vpop.permute.xlu1 %2309  ;;  %v2799_v62 = vsel %vm2791_vm14, %v2734_v57, %v2242_v54  ;;  %v7052_v17 = vld [vmem:[#allocation54_spill] sm:$0xff] }
 0x1c1   : > { %v2272_v52 = vpop.permute.xlu0 %2271  ;;  %v2862_v61 = vsel %vm2856_vm15, %v2797_v56, %v2310_v3  ;;  %v7053_v57 = vld [vmem:[#allocation82_spill] sm:$0xff] }
 0x1c2   : > { %2181 = vrot.lane.b32.xlu1 %v5396_v13, %s4212_s10  ;;  %3943 = vmatprep.mubr.msk.bf16.mxu0 %vm2936_vm0, %v2862_v61  ;;  %v2829_v4 = vsel %vm2791_vm14, %v2764_v48, %v2272_v52  ;;  %v7051_v61 = vld [vmem:[#allocation77_spill] sm:$0xff] }
 0x1c3   : > { %2143 = vrot.lane.b32.xlu0 %v5269_v15, %s4211_s9  ;;  %v2429_v15 = vsel %vm2369_vm8, %v5432_v21, %v5348_v0  ;;  %v2384_v6 = vsel %vm2369_vm8, %v7052_v17, %v7051_v61 }
 0x1c4   : > { %v2312_v40 = vpop.permute.xlu1 %2311  ;;  %v2506_v39 = vsel %vm2466_vm9, %v2429_v15, %v5544_v14  ;;  %v2476_v31 = vsel %vm2466_vm9, %v2384_v6, %v7053_v57  ;;  %v7056_v15 = vld [vmem:[#allocation51_spill] sm:$0xff]  ;;  %v4163_v6 = vld [vmem:[%s4286_s30 + $0x12c] sm:$0xf]  ;;  %v4164_v57 = vld [vmem:[%s4286_s30 + $0x130] sm:$0xf] }
 0x1c5   : > { %v2274_v53 = vpop.permute.xlu0 %2273  ;;  %v2864_v35 = vsel %vm2856_vm15, %v2799_v62, %v2312_v40  ;;  %v2571_v0 = vsel %vm2531_vm10, %v2506_v39, %v5809_v37  ;;  %v7054_v62 = vld [vmem:[#allocation101_spill] sm:$0xff]  ;;  %v2387_v11 = vsel %vm2369_vm8, %v7056_v15, %v7055_v45 }
 0x1c6   : > { %2183 = vrot.lane.b32.xlu1 %v5376_v29, %s4212_s10  ;;  %3944 = vmatmul.mubr.msk.bf16.gmra.mrb[4].mxu0 %vm2936_vm0, %v2864_v35  ;;  %v2541_v40 = vsel %vm2531_vm10, %v2476_v31, %v7054_v62  ;;  %v6000_v31 = vcombine.low %v4163_v6, %v4164_v57  ;;  %v4165_v15 = vld [vmem:[%s4286_s30 + $0x134] sm:$0xf]  ;;  %v7078_v6 = vld [vmem:[#allocation78_spill] sm:$0xff]  ;;  %v7079_v57 = vld [vmem:[#allocation55_spill] sm:$0xff] }
 0x1c7   : > { %2145 = vrot.lane.b32.xlu0 %v5242_v63, %s4211_s9  ;;  %v2636_v63 = vsel %vm2596_vm11, %v2571_v0, %v2064_v16 }
 0x1c8   : > { %v5888_v49 = vpop.permute.xlu1 %1995  ;;  %v2701_v41 = vsel %vm2661_vm12, %v2636_v63, %v2134_v26 }
 0x1c9   : > { %v2342_v25 = vpop.permute.xlu0 %2341  ;;  %v2766_v22 = vsel %vm2726_vm13, %v2701_v41, %v2204_v20  ;;  %v7059_v41 = vld [vmem:[#allocation64_spill] sm:$0xff] }
 0x1ca   : > { %v2894_v14 = vsel %vm2856_vm15, %v2829_v4, %v2342_v25  ;;  %2251 = vrot.lane.b32.xlu1 %v7045_v24, %s4214_s23  ;;  %v2831_v16 = vsel %vm2791_vm14, %v2766_v22, %v2274_v53  ;;  %v7060_v22 = vld [vmem:[#allocation57_spill] sm:$0xff] }
 0x1cb   : > { %2213 = vrot.lane.b32.xlu0 %v5892_v18, %s4212_s10  ;;  %3975 = vmatprep.mubr.msk.bf16.mxu1 %vm2936_vm0, %v2894_v14 }
 0x1cc   : > { %v2034_v37 = vpop.permute.xlu1 %2033 }
 0x1cd   : > { %v2344_v44 = vpop.permute.xlu0 %2343  ;;  %v2606_v53 = vsel %vm2596_vm11, %v2541_v40, %v2034_v37  ;;  %v7061_v37 = vld [vmem:[#allocation80_spill] sm:$0xff] }
 0x1ce   : > { %v2896_v33 = vsel %vm2856_vm15, %v2831_v16, %v2344_v44  ;;  %2253 = vrot.lane.b32.xlu1 %v7046_v23, %s4214_s23  ;;  %v2432_v19 = vsel %vm2369_vm8, %v7061_v37, %v7060_v22  ;;  %v7062_v16 = vld [vmem:[#allocation91_spill] sm:$0xff] }
 0x1cf   : > { %2215 = vrot.lane.b32.xlu0 %v5908_v46, %s4212_s10  ;;  %3976 = vmatmul.mubr.msk.bf16.gmra.mrb[4].mxu1 %vm2936_vm0, %v2896_v33  ;;  %v2508_v44 = vsel %vm2466_vm9, %v2432_v19, %v7062_v16  ;;  %v7073_v22 = vld [vmem:[#allocation39_spill] sm:$0xff] }
 0x1d0   : > { %v2036_v26 = vpop.permute.xlu1 %2035 }
 0x1d1   : > { %v5917_v5 = vpop.permute.xlu0 %1997 }
 0x1d2   : > { %2321 = vrot.lane.b32.xlu1 %v5109_v59, %s4215_s25 }
 0x1d3   : > { %2283 = vrot.lane.b32.xlu0 %v7047_v28, %s4214_s23 }
 0x1d4   : > { %v2104_v32 = vpop.permute.xlu1 %2103 }
 0x1d5   : > { %v2066_v54 = vpop.permute.xlu0 %2065  ;;  %v2671_v39 = vsel %vm2661_vm12, %v2606_v53, %v2104_v32 }
 0x1d6   : > { %2323 = vrot.lane.b32.xlu1 %v5076_v8, %s4215_s25 }
 0x1d7   : > { %2285 = vrot.lane.b32.xlu0 %v7048_v34, %s4214_s23 }
 0x1d8   : > { %v2106_v20 = vpop.permute.xlu1 %2105 }
 0x1d9   : > { %v2068_v12 = vpop.permute.xlu0 %2067 }
 0x1da   : > { %2007 = vrot.lane.b32.xlu1 %v5892_v18, %s4209_s7 }
 0x1db   : > { %2353 = vrot.lane.b32.xlu0 %v7049_v60, %s4215_s25 }
 0x1dc   : > { %v2174_v1 = vpop.permute.xlu1 %2173 }
 0x1dd   : > { %v2136_v38 = vpop.permute.xlu0 %2135  ;;  %v2736_v27 = vsel %vm2726_vm13, %v2671_v39, %v2174_v1  ;;  %v7065_v1 = vld [vmem:[#allocation81_spill] sm:$0xff] }
 0x1de   : > { %2045 = vrot.lane.b32.xlu1 %v7045_v24, %s4210_s8 }
 0x1df   : > { %2355 = vrot.lane.b32.xlu0 %v7050_v51, %s4215_s25 }
 0x1e0   : > { %v2176_v56 = vpop.permute.xlu1 %2175 }
 0x1e1   : > { %v2138_v3 = vpop.permute.xlu0 %2137 }
 0x1e2   : > { %2047 = vrot.lane.b32.xlu1 %v7046_v23, %s4210_s8 }
 0x1e3   : > { %2009 = vrot.lane.b32.xlu0 %v5908_v46, %s4209_s7 }
 0x1e4   : > { %v2244_v2 = vpop.permute.xlu1 %2243 }
 0x1e5   : > { %v2206_v52 = vpop.permute.xlu0 %2205  ;;  %v2801_v4 = vsel %vm2791_vm14, %v2736_v27, %v2244_v2 }
 0x1e6   : > { %2115 = vrot.lane.b32.xlu1 %v5109_v59, %s4211_s9  ;;  %v7057_v59 = vld [vmem:[#allocation7_spill] sm:$0xff] }
 0x1e7   : > { %2077 = vrot.lane.b32.xlu0 %v7047_v28, %s4210_s8  ;;  %v2478_v48 = vsel %vm2466_vm9, %v2387_v11, %v7057_v59  ;;  %v4166_v11 = vld [vmem:[%s4286_s30 + $0x138] sm:$0xf] }
 0x1e8   : > { %v2246_v30 = vpop.permute.xlu1 %2245  ;;  %v2543_v0 = vsel %vm2531_vm10, %v2478_v48, %v7058_v7  ;;  %v6017_v39 = vcombine.low %v4165_v15, %v4166_v11  ;;  %v7069_v7 = vld [vmem:[#allocation71_spill] sm:$0xff]  ;;  %v6098_v11 = vld [vmem:[%s6055_s5 + $0xc] sm:$0xf] }
 0x1e9   : > { %v2208_v35 = vpop.permute.xlu0 %2207  ;;  %v2608_v63 = vsel %vm2596_vm11, %v2543_v0, %v2036_v26  ;;  %v2573_v26 = vsel %vm2531_vm10, %v2508_v44, %v5888_v49  ;;  %v7066_v49 = vld [vmem:[#allocation89_spill] sm:$0xff]  ;;  %v7070_v0 = vld [vmem:[#allocation52_spill] sm:$0xff] }
 0x1ea   : > { %2117 = vrot.lane.b32.xlu1 %v5076_v8, %s4211_s9  ;;  %v2673_v8 = vsel %vm2661_vm12, %v2608_v63, %v2106_v20  ;;  %v7063_v20 = vld [vmem:[#allocation66_spill] sm:$0xff] }
 0x1eb   : > { %2079 = vrot.lane.b32.xlu0 %v7048_v34, %s4210_s8  ;;  %v2738_v43 = vsel %vm2726_vm13, %v2673_v8, %v2176_v56  ;;  %v2638_v34 = vsel %vm2596_vm11, %v2573_v26, %v2066_v54  ;;  %v7071_v63 = vld [vmem:[#allocation70_spill] sm:$0xff] }
 0x1ec   : > { %v2314_v25 = vpop.permute.xlu1 %2313  ;;  %v2803_v33 = vsel %vm2791_vm14, %v2738_v43, %v2246_v30  ;;  %v2703_v2 = vsel %vm2661_vm12, %v2638_v34, %v2136_v38  ;;  %v7074_v43 = vld [vmem:[#allocation34_spill] sm:$0xff]  ;;  %v7076_v34 = vld [vmem:[#allocation60_spill] sm:$0xff] }
 0x1ed   : > { %v2276_v14 = vpop.permute.xlu0 %2275  ;;  %v2866_v24 = vsel %vm2856_vm15, %v2801_v4, %v2314_v25  ;;  %v2768_v54 = vsel %vm2726_vm13, %v2703_v2, %v2206_v52  ;;  %v7067_v52 = vld [vmem:[#allocation17_spill] sm:$0xff] }
 0x1ee   : > { %2185 = vrot.lane.b32.xlu1 %v7059_v41, %s4212_s10  ;;  %3947 = vmatprep.mubr.msk.bf16.mxu0 %vm2936_vm0, %v2866_v24  ;;  %v2833_v62 = vsel %vm2791_vm14, %v2768_v54, %v2276_v14  ;;  %v7072_v14 = vld [vmem:[#allocation46_spill] sm:$0xff] }
 0x1ef   : > { %2147 = vrot.lane.b32.xlu0 %v7049_v60, %s4211_s9  ;;  %v7064_v60 = vld [vmem:[#allocation58_spill] sm:$0xff] }
 0x1f0   : > { %v2316_v23 = vpop.permute.xlu1 %2315  ;;  %v2435_v56 = vsel %vm2369_vm8, %v7065_v1, %v7064_v60 }
 0x1f1   : > { %v2278_v28 = vpop.permute.xlu0 %2277  ;;  %v2868_v32 = vsel %vm2856_vm15, %v2803_v33, %v2316_v23  ;;  %v2510_v61 = vsel %vm2466_vm9, %v2435_v56, %v7066_v49  ;;  %v6064_v33 = vld [vmem:[%s6055_s5] sm:$0xf]  ;;  %v6067_v23 = vld [vmem:[%s6055_s5 + $0x4] sm:$0xf] }
 0x1f2   : > { %2187 = vrot.lane.b32.xlu1 %v7063_v20, %s4212_s10  ;;  %3948 = vmatmul.mubr.msk.bf16.gmra.mrb[8].mxu0 %vm2936_vm0, %v2868_v32  ;;  %v2575_v38 = vsel %vm2531_vm10, %v2510_v61, %v5917_v5  ;;  %v7075_v32 = vld [vmem:[#allocation25_spill] sm:$0xff]  ;;  %v1410_v1 = vshrl.u32 %v6064_v33, 16  ;;  %v1413_v56 = vshll.u32 %v6064_v33, 16  ;;  %v1419_v2 = vshll.u32 %v6067_v23, 16  ;;  %v7077_v49 = vld [vmem:[#allocation83_spill] sm:$0xff] }
 0x1f3   : > { %2149 = vrot.lane.b32.xlu0 %v7050_v51, %s4211_s9  ;;  %v2640_v40 = vsel %vm2596_vm11, %v2575_v38, %v2068_v12  ;;  %v2390_v60 = vsel %vm2369_vm8, %v7076_v34, %v7075_v32  ;;  %v1423_v54 = vshrl.u32 %v6067_v23, 16  ;;  %v2393_v38 = vsel %vm2369_vm8, %v7079_v57, %v7078_v6  ;;  %v7082_v34 = vld [vmem:[#allocation100_spill] sm:$0xff] }
 0x1f4   : > { %v5996_v17 = vpop.permute.xlu1 %1999  ;;  %v2705_v53 = vsel %vm2661_vm12, %v2640_v40, %v2138_v3  ;;  %v7068_v3 = vld [vmem:[#allocation16_spill] sm:$0xff]  ;;  %v2480_v61 = vsel %vm2466_vm9, %v2390_v60, %v7077_v49  ;;  %v7083_v49 = vld [vmem:[#allocation63_spill] sm:$0xff] }
 0x1f5   : > { %v2346_v51 = vpop.permute.xlu0 %2345  ;;  %v2770_v5 = vsel %vm2726_vm13, %v2705_v53, %v2208_v35 }
 0x1f6   : > { %v2898_v30 = vsel %vm2856_vm15, %v2833_v62, %v2346_v51  ;;  %2255 = vrot.lane.b32.xlu1 %v7067_v52, %s4214_s23  ;;  %v2835_v12 = vsel %vm2791_vm14, %v2770_v5, %v2278_v28  ;;  %v7080_v62 = vld [vmem:[#allocation103_spill] sm:$0xff] }
 0x1f7   : > { %2217 = vrot.lane.b32.xlu0 %v6000_v31, %s4212_s10  ;;  %3979 = vmatprep.mubr.msk.bf16.mxu1 %vm2936_vm0, %v2898_v30  ;;  %v2545_v51 = vsel %vm2531_vm10, %v2480_v61, %v7080_v62  ;;  %v6090_v30 = vld [vmem:[%s6055_s5 + $0x8] sm:$0xf]  ;;  %v7084_v61 = vld [vmem:[#allocation93_spill] sm:$0xff] }
 0x1f8   : > { %v2038_v45 = vpop.permute.xlu1 %2037  ;;  %v1429_v32 = vshll.u32 %v6090_v30, 16 }
 0x1f9   : > { %v2348_v59 = vpop.permute.xlu0 %2347  ;;  %v2610_v5 = vsel %vm2596_vm11, %v2545_v51, %v2038_v45  ;;  %v1433_v45 = vshrl.u32 %v6090_v30, 16  ;;  %v7085_v51 = vld [vmem:[#allocation94_spill] sm:$0xff] }
 0x1fa   : > { %v2900_v48 = vsel %vm2856_vm15, %v2835_v12, %v2348_v59  ;;  %2257 = vrot.lane.b32.xlu1 %v7068_v3, %s4214_s23  ;;  %v1412_v59 = vrot.slane %v1410_v1, 4  ;;  %v1443_v1 = vshrl.u32 %v6098_v11, 16 }
 0x1fb   : > { %2219 = vrot.lane.b32.xlu0 %v6017_v39, %s4212_s10  ;;  %3980 = vmatmul.mubr.msk.bf16.gmra.mrb[8].mxu1 %vm2936_vm0, %v2900_v48  ;;  %v1415_v48 = vrot.slane %v1413_v56, 5  ;;  %v1439_v56 = vshll.u32 %v6098_v11, 16  ;;  %v1435_v62 = vrot.slane %v1433_v45, 4 }
 0x1fc   : > { %v2040_v35 = vpop.permute.xlu1 %2039 }
 0x1fd   : > { %v6026_v27 = vpop.permute.xlu0 %2001 }
 0x1fe   : > { %2325 = vrot.lane.b32.xlu1 %v7069_v7, %s4215_s25 }
 0x1ff   : > { %2287 = vrot.lane.b32.xlu0 %v7070_v0, %s4214_s23 }
 0x200   : > { %v2108_v4 = vpop.permute.xlu1 %2107 }
 0x201   : > { %v6032_v25 = vpop.permute.xlu0 %2069  ;;  %v2675_v12 = vsel %vm2661_vm12, %v2610_v5, %v2108_v4  ;;  %v1445_v5 = vrot.slane %v1443_v1, 4 }
 0x202   : > { %2327 = vrot.lane.b32.xlu1 %v7071_v63, %s4215_s25 }
 0x203   : > { %2289 = vrot.lane.b32.xlu0 %v7072_v14, %s4214_s23 }
 0x204   : > { %v2110_v24 = vpop.permute.xlu1 %2109 }
 0x205   : > { %v6038_v8 = vpop.permute.xlu0 %2071 }
 0x206   : > { %2011 = vrot.lane.b32.xlu1 %v6000_v31, %s4209_s7 }
 0x207   : > { %2357 = vrot.lane.b32.xlu0 %v7073_v22, %s4215_s25 }
 0x208   : > { %v2178_v37 = vpop.permute.xlu1 %2177 }
 0x209   : > { %v6046_v19 = vpop.permute.xlu0 %2139 }
 0x20a   : > { %2049 = vrot.lane.b32.xlu1 %v7067_v52, %s4210_s8  ;;  %v7081_v52 = vld [vmem:[#allocation6_spill] sm:$0xff] }
 0x20b   : > { %2359 = vrot.lane.b32.xlu0 %v7074_v43, %s4215_s25  ;;  %v2482_v53 = vsel %vm2466_vm9, %v2393_v38, %v7081_v52  ;;  %v1431_v38 = vrot.slane %v1429_v32, 5 }
 0x20c   : > { %v2180_v16 = vpop.permute.xlu1 %2179  ;;  %v2547_v4 = vsel %vm2531_vm10, %v2482_v53, %v7082_v34 }
 0x20d   : > { %v6057_v44 = vpop.permute.xlu0 %2141 }
 0x20e   : > { %2051 = vrot.lane.b32.xlu1 %v7068_v3, %s4210_s8  ;;  %v6103_v3 = vrot.slane %v1419_v2, 5 }
 0x20f   : > { %2013 = vrot.lane.b32.xlu0 %v6017_v39, %s4209_s7 }
 0x210   : > { %v2248_v26 = vpop.permute.xlu1 %2247 }
 0x211   : > { %v6069_v28 = vpop.permute.xlu0 %2209 }
 0x212   : > { %2119 = vrot.lane.b32.xlu1 %v7069_v7, %s4211_s9  ;;  %v2740_v7 = vsel %vm2726_vm13, %v2675_v12, %v2178_v37  ;;  %v2612_v37 = vsel %vm2596_vm11, %v2547_v4, %v2040_v35  ;;  %v1436_v4 = vor.u32 %v1435_v62, %v1431_v38 }
 0x213   : > { %2081 = vrot.lane.b32.xlu0 %v7070_v0, %s4210_s8  ;;  %v1425_v0 = vrot.slane %v1423_v54, 4  ;;  %v2805_v60 = vsel %vm2791_vm14, %v2740_v7, %v2248_v26  ;;  %v2438_v54 = vsel %vm2369_vm8, %v7084_v61, %v7083_v49  ;;  %v2677_v6 = vsel %vm2661_vm12, %v2612_v37, %v2110_v24  ;;  %v7087_v7 = vld [vmem:[#allocation95_spill] sm:$0xff] }
 0x214   : > { %v2250_v40 = vpop.permute.xlu1 %2249  ;;  %v1416_v26 = vor.u32 %v1415_v48, %v1412_v59  ;;  %v2742_v57 = vsel %vm2726_vm13, %v2677_v6, %v2180_v16  ;;  %v2512_v52 = vsel %vm2466_vm9, %v2438_v54, %v7085_v51  ;;  %v6135_v48 = vld [vmem:[%s6055_s5 + $0x10] sm:$0x1]  ;;  %v7089_v54 = vld [vmem:[#allocation19_spill] sm:$0xff] }
 0x215   : > { %v6095_v15 = vpop.permute.xlu0 %2211  ;;  %v1426_v35 = vor.u32 %v1425_v0, %v6103_v3  ;;  %v2807_v24 = vsel %vm2791_vm14, %v2742_v57, %v2250_v40  ;;  %v2577_v12 = vsel %vm2531_vm10, %v2512_v52, %v5996_v17  ;;  %v3811_v17 = vcombine.low %v6064_v33, %v6067_v23 }
 0x216   : > { %2121 = vrot.lane.b32.xlu1 %v7071_v63, %s4211_s9  ;;  %v2642_v0 = vsel %vm2596_vm11, %v2577_v12, %v6032_v25  ;;  %v1417_v32 = vrot.slane %v1416_v26, 4  ;;  %v1449_v37 = vshll.u32 %v6135_v48, 16  ;;  %v1437_v26 = vrot.slane %v1436_v4, 4 }
 0x217   : > { %2083 = vrot.lane.b32.xlu0 %v7072_v14, %s4210_s8  ;;  %v2707_v40 = vsel %vm2661_vm12, %v2642_v0, %v6046_v19  ;;  %v1427_v34 = vrot.slane %v1426_v35, 4  ;;  %v7111_v0 = vld [vmem:[#allocation74_spill] sm:$0xff] }
 0x218   : > { %v2318_v63 = vpop.permute.xlu1 %2317  ;;  %v1451_v51 = vrot.slane %v1449_v37, 5 }
 0x219   : > { %v2280_v2 = vpop.permute.xlu0 %2279  ;;  %v2870_v14 = vsel %vm2856_vm15, %v2805_v60, %v2318_v63  ;;  %v7088_v60 = vld [vmem:[#allocation90_spill] sm:$0xff]  ;;  %v2772_v63 = vsel %vm2726_vm13, %v2707_v40, %v6069_v28  ;;  %v3812_v28 = vcombine.low %v6090_v30, %v6098_v11 }
 0x21a   : > { %2189 = vrot.lane.b32.xlu1 %v5420_v9, %s4212_s10  ;;  %3951 = vmatprep.mubr.msk.bf16.mxu0 %vm2936_vm0, %v2870_v14  ;;  %v1441_v9 = vrot.slane %v1439_v56, 5  ;;  %v2837_v14 = vsel %vm2791_vm14, %v2772_v63, %v2280_v2  ;;  %v1422_v2 = vsel %vm4296_vm2, %v1417_v32, %v6103_v3  ;;  %v7091_v3 = vld [vmem:[#allocation18_spill] sm:$0xff] }
 0x21b   : > { %2151 = vrot.lane.b32.xlu0 %v7073_v22, %s4211_s9  ;;  %v7086_v22 = vld [vmem:[#allocation65_spill] sm:$0xff] }
 0x21c   : > { %v2320_v53 = vpop.permute.xlu1 %2319  ;;  %v2441_v45 = vsel %vm2369_vm8, %v7087_v7, %v7086_v22  ;;  %v1446_v56 = vor.u32 %v1445_v5, %v1441_v9  ;;  %v3713_v5 = vrot.slane %v6064_v33, 9  ;;  %v1466_v22 = vrot.slane %v6098_v11, 5 }
 0x21d   : > { %v2282_v59 = vpop.permute.xlu0 %2281  ;;  %v2872_v16 = vsel %vm2856_vm15, %v2807_v24, %v2320_v53  ;;  %v2514_v25 = vsel %vm2466_vm9, %v2441_v45, %v7088_v60  ;;  %v7092_v45 = vld [vmem:[#allocation73_spill] sm:$0xff]  ;;  %v7094_v60 = vld [vmem:[#allocation72_spill] sm:$0xff] }
 0x21e   : > { %2191 = vrot.lane.b32.xlu1 %v5750_v58, %s4212_s10  ;;  %3952 = vmatmul.mubr.msk.bf16.gmra.mrb[12].mxu0 %vm2936_vm0, %v2872_v16  ;;  %v2579_v19 = vsel %vm2531_vm10, %v2514_v25, %v6026_v27  ;;  %v1447_v62 = vrot.slane %v1446_v56, 4  ;;  %v1463_v16 = vrot.slane %v6090_v30, 5  ;;  %v1468_v4 = vrot.slane %v1466_v22, 4 }
 0x21f   : > { %2153 = vrot.lane.b32.xlu0 %v7074_v43, %s4211_s9  ;;  %v2644_v49 = vsel %vm2596_vm11, %v2579_v19, %v6038_v8  ;;  %v1432_v8 = vsel %vm4296_vm2, %v1427_v34, %v1431_v38  ;;  %v1469_v30 = vrot.slane %v6135_v48, 5 }
 0x220   : > { %v6155_v1 = vpop.permute.xlu1 %2003  ;;  %v2709_v6 = vsel %vm2661_vm12, %v2644_v49, %v6057_v44  ;;  %v1460_v44 = vrot.slane %v6067_v23, 5  ;;  %v3813_v38 = vcombine.low %v1422_v2, %v1432_v8  ;;  %v1452_v23 = vsel %vm4296_vm2, %v1447_v62, %v1451_v51  ;;  %v6226_v49 = vld [vmem:[%s6055_s5 + $0x14] sm:$0xf]  ;;  %v6245_v62 = vld [vmem:[%s6055_s5 + $0x20] sm:$0xf]  ;;  %v7095_v51 = vld [vmem:[#allocation30_spill] sm:$0xff] }
 0x221   : > { %v2350_v43 = vpop.permute.xlu0 %2349  ;;  %v2774_v57 = vsel %vm2726_vm13, %v2709_v6, %v6095_v15  ;;  %v1442_v15 = vsel %vm4296_vm2, %v1437_v26, %v1441_v9  ;;  %v1465_v34 = vrot.slane %v1463_v16, 4  ;;  %v1470_v37 = vsel %vm4873_vm5, %v1468_v4, %v1469_v30  ;;  %v7099_v4 = vld [vmem:[#allocation53_spill] sm:$0xff] }
 0x222   : > { %v2902_v61 = vsel %vm2856_vm15, %v2837_v14, %v2350_v43  ;;  %2259 = vrot.lane.b32.xlu1 %v7089_v54, %s4214_s23  ;;  %v2839_v52 = vsel %vm2791_vm14, %v2774_v57, %v2282_v59  ;;  %v1462_v59 = vrot.slane %v1460_v44, 4  ;;  %v3814_v9 = vcombine.low %v1442_v15, %v1452_v23  ;;  %v6239_v57 = vld [vmem:[%s6055_s5 + $0x1c] sm:$0xf] }
 0x223   : > { %2221 = vrot.lane.b32.xlu0 %v3811_v17, %s4212_s10  ;;  %3983 = vmatprep.mubr.msk.bf16.mxu1 %vm2936_vm0, %v2902_v61  ;;  %v1461_v33 = vsel %vm4873_vm5, %v3713_v5, %v1460_v44  ;;  %v1467_v56 = vsel %vm4873_vm5, %v1465_v34, %v1466_v22  ;;  %v6230_v61 = vld [vmem:[%s6055_s5 + $0x18] sm:$0xf]  ;;  %v1475_v8 = vshll.u32 %v6226_v49, 16  ;;  %v7096_v44 = vld [vmem:[#allocation59_spill] sm:$0xff]  ;;  %v1491_v23 = vshll.u32 %v6239_v57, 16 }
 0x224   : > { %v6179_v35 = vpop.permute.xlu1 %2041  ;;  %v1464_v32 = vsel %vm4873_vm5, %v1462_v59, %v1463_v16  ;;  %v3816_v48 = vcombine.low %v1467_v56, %v1470_v37  ;;  %v1485_v26 = vshrl.u32 %v6230_v61, 16  ;;  %v1505_v59 = vshrl.u32 %v6245_v62, 16  ;;  %v7098_v34 = vld [vmem:[#allocation27_spill] sm:$0xff]  ;;  %v7100_v56 = vld [vmem:[#allocation105_spill] sm:$0xff] }
 0x225   : > { %v2352_v24 = vpop.permute.xlu0 %2351  ;;  %v3815_v25 = vcombine.low %v1461_v33, %v1464_v32  ;;  %v1477_v5 = vrot.slane %v1475_v8, 5  ;;  %v1501_v22 = vshll.u32 %v6245_v62, 16  ;;  %v7097_v33 = vld [vmem:[#allocation22_spill] sm:$0xff]  ;;  %v2399_v30 = vsel %vm2369_vm8, %v7099_v4, %v7098_v34  ;;  %v7101_v34 = vld [vmem:[#allocation23_spill] sm:$0xff] }
 0x226   : > { %v2904_v53 = vsel %vm2856_vm15, %v2839_v52, %v2352_v24  ;;  %2261 = vrot.lane.b32.xlu1 %v7091_v3, %s4214_s23  ;;  %v2396_v52 = vsel %vm2369_vm8, %v7096_v44, %v7095_v51  ;;  %v1487_v16 = vrot.slane %v1485_v26, 4 }
 0x227   : > { %2223 = vrot.lane.b32.xlu0 %v3812_v28, %s4212_s10  ;;  %3984 = vmatmul.mubr.msk.bf16.gmra.mrb[12].mxu1 %vm2936_vm0, %v2904_v53  ;;  %v2484_v32 = vsel %vm2466_vm9, %v2396_v52, %v7097_v33  ;;  %v6275_v52 = vrot.slane %v1501_v22, 5  ;;  %v1507_v33 = vrot.slane %v1505_v59, 4 }
 0x228   : > { %v6191_v12 = vpop.permute.xlu1 %2043 }
 0x229   : > { %v6197_v7 = vpop.permute.xlu0 %2005 }
 0x22a   : > { %2329 = vrot.lane.b32.xlu1 %v7092_v45, %s4215_s25 }
 0x22b   : > { %2291 = vrot.lane.b32.xlu0 %v3813_v38, %s4214_s23 }
 0x22c   : > { %v2112_v40 = vpop.permute.xlu1 %2111 }
 0x22d   : > { %v6207_v11 = vpop.permute.xlu0 %2073 }
 0x22e   : > { %2331 = vrot.lane.b32.xlu1 %v7094_v60, %s4215_s25 }
 0x22f   : > { %2293 = vrot.lane.b32.xlu0 %v3814_v9, %s4214_s23 }
 0x230   : > { %v6212_v63 = vpop.permute.xlu1 %2113 }
 0x231   : > { %v6218_v19 = vpop.permute.xlu0 %2075 }
 0x232   : > { %2015 = vrot.lane.b32.xlu1 %v3811_v17, %s4209_s7  ;;  %v1472_v17 = vshrl.u32 %v6226_v49, 16 }
 0x233   : > { %2361 = vrot.lane.b32.xlu0 %v3815_v25, %s4215_s25 }
 0x234   : > { %v2182_v14 = vpop.permute.xlu1 %2181  ;;  %v1474_v15 = vrot.slane %v1472_v17, 4 }
 0x235   : > { %v6222_v43 = vpop.permute.xlu0 %2143 }
 0x236   : > { %2017 = vrot.lane.b32.xlu1 %v3812_v28, %s4209_s7  ;;  %v1481_v28 = vshll.u32 %v6230_v61, 16  ;;  %v1478_v26 = vor.u32 %v1477_v5, %v1474_v15  ;;  %v3817_v5 = vcombine.low %v6226_v49, %v6230_v61 }
 0x237   : > { %2363 = vrot.lane.b32.xlu0 %v3816_v48, %s4215_s25 }
 0x238   : > { %v2184_v6 = vpop.permute.xlu1 %2183 }
 0x239   : > { %v6232_v2 = vpop.permute.xlu0 %2145 }
 0x23a   : > { %2085 = vrot.lane.b32.xlu1 %v3813_v38, %s4210_s8  ;;  %v1495_v38 = vshrl.u32 %v6239_v57, 16 }
 0x23b   : > { %1985 = vrot.lane.b32.xlu0 %v5750_v58, %s4209_s7  ;;  %v6256_v58 = vrot.slane %v1481_v28, 5  ;;  %v1493_v28 = vrot.slane %v1491_v23, 5  ;;  %s3695_s7 = sshll.u32 %s7153_s16, 5 }
 0x23c   : > { %v2252_v24 = vpop.permute.xlu1 %2251  ;;  %v1497_v51 = vrot.slane %v1495_v38, 4  ;;  %v7102_v38 = vld [vmem:[#allocation102_spill] sm:$0xff]  ;;  %s6536_s16 = sadd.s32 %s3695_s7, %s3694_s6 }
 0x23d   : > { %v6250_v53 = vpop.permute.xlu0 %2213 }
 0x23e   : > { %2087 = vrot.lane.b32.xlu1 %v3814_v9, %s4210_s8  ;;  %v2549_v9 = vsel %vm2531_vm10, %v2484_v32, %v7100_v56  ;;  %v2486_v32 = vsel %vm2466_vm9, %v2399_v30, %v7101_v34  ;;  %v1498_v22 = vor.u32 %v1497_v51, %v1493_v28  ;;  %v1508_v30 = vor.u32 %v1507_v33, %v6275_v52 }
 0x23f   : > { %2053 = vrot.lane.b32.xlu0 %v7089_v54, %s4210_s8  ;;  %v2614_v17 = vsel %vm2596_vm11, %v2549_v9, %v6179_v35  ;;  %v1488_v54 = vor.u32 %v1487_v16, %v6256_v58  ;;  %v6283_v35 = vld [vmem:[%s6055_s5 + $0x24] sm:$0x1]  ;;  %v1479_v16 = vrot.slane %v1478_v26, 4  ;;  %v7103_v9 = vld [vmem:[#allocation68_spill] sm:$0xff] }
 0x240   : > { %v2254_v37 = vpop.permute.xlu1 %2253  ;;  %v2679_v44 = vsel %vm2661_vm12, %v2614_v17, %v2112_v40  ;;  %v2551_v40 = vsel %vm2531_vm10, %v2486_v32, %v7102_v38  ;;  %v1511_v56 = vshll.u32 %v6283_v35, 16  ;;  %v7104_v17 = vld [vmem:[#allocation108_spill] sm:$0xff]  ;;  %v1509_v38 = vrot.slane %v1508_v30, 4 }
 0x241   : > { %v6270_v8 = vpop.permute.xlu0 %2215  ;;  %v2744_v4 = vsel %vm2726_vm13, %v2679_v44, %v2182_v14  ;;  %v2616_v23 = vsel %vm2596_vm11, %v2551_v40, %v6191_v12  ;;  %v2444_v12 = vsel %vm2369_vm8, %v7104_v17, %v7103_v9  ;;  %v7105_v26 = vld [vmem:[#allocation96_spill] sm:$0xff]  ;;  %v7106_v40 = vld [vmem:[#allocation69_spill] sm:$0xff]  ;;  %v1531_v9 = vrot.slane %v6283_v35, 5 }
 0x242   : > { %2155 = vrot.lane.b32.xlu1 %v3815_v25, %s4211_s9  ;;  %v2809_v25 = vsel %vm2791_vm14, %v2744_v4, %v2252_v24  ;;  %v1489_v24 = vrot.slane %v1488_v54, 4  ;;  %v3818_v54 = vcombine.low %v6239_v57, %v6245_v62 }
 0x243   : > { %2055 = vrot.lane.b32.xlu0 %v7091_v3, %s4210_s8  ;;  %v2681_v3 = vsel %vm2661_vm12, %v2616_v23, %v6212_v63  ;;  %v2516_v63 = vsel %vm2466_vm9, %v2444_v12, %v7105_v26  ;;  %v7108_v26 = vld [vmem:[#allocation21_spill] sm:$0xff] }
 0x244   : > { %v2322_v15 = vpop.permute.xlu1 %2321  ;;  %v2746_v44 = vsel %vm2726_vm13, %v2681_v3, %v2184_v6  ;;  %v2581_v33 = vsel %vm2531_vm10, %v2516_v63, %v6155_v1  ;;  %v1484_v6 = vsel %vm4296_vm2, %v1479_v16, %v6256_v58  ;;  %v1513_v1 = vrot.slane %v1511_v56, 5 }
 0x245   : > { %v2284_v59 = vpop.permute.xlu0 %2283  ;;  %v2874_v14 = vsel %vm2856_vm15, %v2809_v25, %v2322_v15  ;;  %v2646_v4 = vsel %vm2596_vm11, %v2581_v33, %v6207_v11  ;;  %v2447_v25 = vsel %vm2369_vm8, %v5678_v10, %v7106_v40  ;;  %v1522_v11 = vrot.slane %v6230_v61, 5  ;;  %v7107_v15 = vld [vmem:[#allocation92_spill] sm:$0xff] }
 0x246   : > { %2157 = vrot.lane.b32.xlu1 %v3816_v48, %s4211_s9  ;;  %3955 = vmatprep.mubr.msk.bf16.mxu0 %vm2936_vm0, %v2874_v14  ;;  %v2811_v48 = vsel %vm2791_vm14, %v2746_v44, %v2254_v37  ;;  %v1494_v37 = vsel %vm4296_vm2, %v1489_v24, %v1493_v28  ;;  %v2711_v58 = vsel %vm2661_vm12, %v2646_v4, %v6222_v43  ;;  %v1528_v3 = vrot.slane %v6245_v62, 5  ;;  %v7112_v40 = vld [vmem:[#allocation32_spill] sm:$0xff] }
 0x247   : > { %2123 = vrot.lane.b32.xlu0 %v7092_v45, %s4211_s9  ;;  %v1499_v45 = vrot.slane %v1498_v22, 4  ;;  %v2776_v28 = vsel %vm2726_vm13, %v2711_v58, %v6250_v53  ;;  %v3819_v43 = vcombine.low %v1484_v6, %v1494_v37  ;;  %v1514_v53 = vsel %vm4296_vm2, %v1509_v38, %v1513_v1  ;;  %v7113_v58 = vld [vmem:[#allocation85_spill] sm:$0xff] }
 0x248   : > { %v2324_v51 = vpop.permute.xlu1 %2323  ;;  %v2841_v10 = vsel %vm2791_vm14, %v2776_v28, %v2284_v59 }
 0x249   : > { %v2286_v34 = vpop.permute.xlu0 %2285  ;;  %v2876_v32 = vsel %vm2856_vm15, %v2811_v48, %v2324_v51 }
 0x24a   : > { %2225 = vrot.lane.b32.xlu1 %v3817_v5, %s4212_s10  ;;  %3956 = vmatmul.mubr.msk.bf16.gmra.mrb[16].mxu0 %vm2936_vm0, %v2876_v32  ;;  %v2518_v5 = vsel %vm2466_vm9, %v2447_v25, %v7107_v15  ;;  %v7110_v32 = vld [vmem:[#allocation76_spill] sm:$0xff]  ;;  %v2402_v25 = vsel %vm2369_vm8, %v5380_v47, %v7112_v40  ;;  %v7114_v15 = vld [vmem:[#allocation107_spill] sm:$0xff]  ;;  %v7116_v47 = vld [vmem:[#allocation62_spill] sm:$0xff] }
 0x24b   : > { %2125 = vrot.lane.b32.xlu0 %v7094_v60, %s4211_s9  ;;  %v2583_v14 = vsel %vm2531_vm10, %v2518_v5, %v6197_v7  ;;  %v1504_v60 = vsel %vm4296_vm2, %v1499_v45, %v6275_v52  ;;  %v3714_v7 = vrot.slane %v6226_v49, 9  ;;  %v1524_v52 = vrot.slane %v1522_v11, 4 }
 0x24c   : > { %v6334_v23 = vpop.permute.xlu1 %2007  ;;  %v2648_v61 = vsel %vm2596_vm11, %v2583_v14, %v6218_v19  ;;  %v1525_v19 = vrot.slane %v6239_v57, 5  ;;  %vm3544_vm2 = vcmask 125952  }
 0x24d   : > { %v2354_v16 = vpop.permute.xlu0 %2353  ;;  %v2713_v59 = vsel %vm2661_vm12, %v2648_v61, %v6232_v2  ;;  %v3820_v2 = vcombine.low %v1504_v60, %v1514_v53 }
 0x24e   : > { %v2906_v22 = vsel %vm2856_vm15, %v2841_v10, %v2354_v16  ;;  %2227 = vrot.lane.b32.xlu1 %v3818_v54, %s4212_s10  ;;  %v2778_v24 = vsel %vm2726_vm13, %v2713_v59, %v6270_v8  ;;  %v1526_v57 = vsel %vm4873_vm5, %v1524_v52, %v1525_v19  ;;  %v1527_v62 = vrot.slane %v1525_v19, 4  ;;  %v7109_v54 = vld [vmem:[#allocation20_spill] sm:$0xff] }
 0x24f   : > { %2193 = vrot.lane.b32.xlu0 %v5404_v42, %s4212_s10  ;;  %3987 = vmatprep.mubr.msk.bf16.mxu1 %vm2936_vm0, %v2906_v22  ;;  %v2843_v30 = vsel %vm2791_vm14, %v2778_v24, %v2286_v34  ;;  %v1523_v42 = vsel %vm4873_vm5, %v3714_v7, %v1522_v11  ;;  %v1530_v8 = vrot.slane %v1528_v3, 4  ;;  %v2488_v11 = vsel %vm2466_vm9, %v2402_v25, %v7113_v58  ;;  %v7117_v52 = vld [vmem:[#allocation104_spill] sm:$0xff] }
 0x250   : > { %v2046_v27 = vpop.permute.xlu1 %2045  ;;  %v3821_v44 = vcombine.low %v1523_v42, %v1526_v57  ;;  %v2553_v5 = vsel %vm2531_vm10, %v2488_v11, %v7114_v15 }
 0x251   : > { %v2356_v49 = vpop.permute.xlu0 %2355  ;;  %v1532_v63 = vsel %vm4873_vm5, %v1530_v8, %v1531_v9  ;;  %v2618_v14 = vsel %vm2596_vm11, %v2553_v5, %v2046_v27 }
 0x252   : > { %v2908_v56 = vsel %vm2856_vm15, %v2843_v30, %v2356_v49  ;;  %2295 = vrot.lane.b32.xlu1 %v3819_v43, %s4214_s23  ;;  %v7115_v43 = vld [vmem:[#allocation28_spill] sm:$0xff] }
 0x253   : > { %2195 = vrot.lane.b32.xlu0 %v5432_v21, %s4212_s10  ;;  %3988 = vmatmul.mubr.msk.bf16.gmra.mrb[16].mxu1 %vm2936_vm0, %v2908_v56  ;;  %v1529_v21 = vsel %vm4873_vm5, %v1527_v62, %v1528_v3  ;;  %v2405_v60 = vsel %vm2369_vm8, %v5360_v55, %v7115_v43  ;;  %v7119_v62 = vld [vmem:[#allocation97_spill] sm:$0xff]  ;;  %s3696_s10 = sshll.u32 %s6536_s16, 2 }
 0x254   : > { %v2048_v17 = vpop.permute.xlu1 %2047  ;;  %v3822_v35 = vcombine.low %v1529_v21, %v1532_v63  ;;  %v2490_v53 = vsel %vm2466_vm9, %v2405_v60, %v7116_v47  ;;  %s6560_s13 = scalar_lea.vmem %s6705_s4, %s3696_s10 }
 0x255   : > { %v6369_v12 = vpop.permute.xlu0 %2009  ;;  %v2555_v19 = vsel %vm2531_vm10, %v2490_v53, %v7117_v52 }
 0x256   : > { %2297 = vrot.lane.b32.xlu1 %v3820_v2, %s4214_s23  ;;  %v2620_v55 = vsel %vm2596_vm11, %v2555_v19, %v2048_v17  ;;  %v7118_v2 = vld [vmem:[#allocation4_spill] sm:$0xff]  ;;  %v7122_v19 = vld [vmem:[#allocation42_spill] sm:$0xff] }
 0x257   : > { %2263 = vrot.lane.b32.xlu0 %v7108_v26, %s4214_s23  ;;  %v2450_v42 = vsel %vm2369_vm8, %v5782_v50, %v7118_v2  ;;  %v7120_v50 = vld [vmem:[#allocation67_spill] sm:$0xff] }
 0x258   : > { %v2116_v48 = vpop.permute.xlu1 %2115  ;;  %v2520_v8 = vsel %vm2466_vm9, %v2450_v42, %v7119_v62  ;;  %v7125_v62 = vld [vmem:[#allocation35_spill] sm:$0xff] }
 0x259   : > { %v2078_v51 = vpop.permute.xlu0 %2077  ;;  %v2683_v61 = vsel %vm2661_vm12, %v2618_v14, %v2116_v48  ;;  %v2585_v17 = vsel %vm2531_vm10, %v2520_v8, %v6334_v23  ;;  %v2411_v8 = vsel %vm2369_vm8, %v5376_v29, %v7125_v62 }
 0x25a   : > { %2365 = vrot.lane.b32.xlu1 %v3821_v44, %s4215_s25  ;;  %v2650_v63 = vsel %vm2596_vm11, %v2585_v17, %v2078_v51  ;;  %v7127_v17 = vld [vmem:[#allocation84_spill] sm:$0xff] }
 0x25b   : > { %2265 = vrot.lane.b32.xlu0 %v7109_v54, %s4214_s23 }
 0x25c   : > { %v2118_v33 = vpop.permute.xlu1 %2117 }
 0x25d   : > { %v2080_v34 = vpop.permute.xlu0 %2079  ;;  %v2685_v56 = vsel %vm2661_vm12, %v2620_v55, %v2118_v33 }
 0x25e   : > { %2367 = vrot.lane.b32.xlu1 %v3822_v35, %s4215_s25  ;;  %v2453_v35 = vsel %vm2369_vm8, %v5800_v36, %v7120_v50 }
 0x25f   : > { %2333 = vrot.lane.b32.xlu0 %v7110_v32, %s4215_s25  ;;  %v7121_v32 = vld [vmem:[#allocation9_spill] sm:$0xff] }
 0x260   : > { %v2186_v6 = vpop.permute.xlu1 %2185  ;;  %v2522_v23 = vsel %vm2466_vm9, %v2453_v35, %v7121_v32  ;;  %v7128_v35 = vld [vmem:[#allocation106_spill] sm:$0xff] }
 0x261   : > { %v2148_v45 = vpop.permute.xlu0 %2147  ;;  %v2748_v7 = vsel %vm2726_vm13, %v2683_v61, %v2186_v6 }
 0x262   : > { %v2715_v54 = vsel %vm2661_vm12, %v2650_v63, %v2148_v45 }
 0x263   : > { %2335 = vrot.lane.b32.xlu0 %v7111_v0, %s4215_s25 }
 0x264   : > { %v2188_v4 = vpop.permute.xlu1 %2187 }
 0x265   : > { %v2150_v37 = vpop.permute.xlu0 %2149  ;;  %v2750_v57 = vsel %vm2726_vm13, %v2685_v56, %v2188_v4  ;;  %v2587_v4 = vsel %vm2531_vm10, %v2522_v23, %v6369_v12 }
 0x266   : > { %v2652_v45 = vsel %vm2596_vm11, %v2587_v4, %v2080_v34 }
 0x267   : > { %v2717_v58 = vsel %vm2661_vm12, %v2652_v45, %v2150_v37 }
 0x268   : > { %v2256_v38 = vpop.permute.xlu1 %2255 }
 0x269   : > { %v2218_v1 = vpop.permute.xlu0 %2217  ;;  %v2813_v3 = vsel %vm2791_vm14, %v2748_v7, %v2256_v38 }
 0x26a   : > { %v2780_v6 = vsel %vm2726_vm13, %v2715_v54, %v2218_v1 }
 0x26c   : > { %v2258_v28 = vpop.permute.xlu1 %2257 }
 0x26d   : > { %v2220_v10 = vpop.permute.xlu0 %2219  ;;  %v6394_v16 = vpop.f32.mrb[0].mxu0  ;;  %v2815_v9 = vsel %vm2791_vm14, %v2750_v57, %v2258_v28 }
 0x26e   : > { %v6400_v22 = vpop.f32.mrb[1].mxu0  ;;  %v2782_v1 = vsel %vm2726_vm13, %v2717_v58, %v2220_v10 }
 0x26f   : > { %v6405_v59 = vpop.f32.mrb[2].mxu0 }
 0x270   : > { %v2326_v24 = vpop.permute.xlu1 %2325  ;;  %v6410_v27 = vpop.f32.mrb[3].mxu0 }
 0x271   : > { %v2288_v30 = vpop.permute.xlu0 %2287  ;;  %v2878_v49 = vsel %vm2856_vm15, %v2813_v3, %v2326_v24  ;;  %v2408_v3 = vsel %vm2369_vm8, %v5396_v13, %v7122_v19  ;;  %v7123_v24 = vld [vmem:[#allocation87_spill] sm:$0xff] }
 0x272   : > { %3959 = vmatprep.mubr.msk.bf16.mxu0 %vm2936_vm0, %v2878_v49  ;;  %v2845_v38 = vsel %vm2791_vm14, %v2780_v6, %v2288_v30  ;;  %v2492_v55 = vsel %vm2466_vm9, %v2408_v3, %v7123_v24  ;;  %v7124_v30 = vld [vmem:[#allocation109_spill] sm:$0xff] }
 0x273   : > { %v2557_v49 = vsel %vm2531_vm10, %v2492_v55, %v7124_v30 }
 0x274   : > { %v2328_v44 = vpop.permute.xlu1 %2327 }
 0x275   : > { %v2290_v26 = vpop.permute.xlu0 %2289  ;;  %v2880_v21 = vsel %vm2856_vm15, %v2815_v9, %v2328_v44 }
 0x276   : > { %v6427_v48 = vpop.f32.mrb[0].mxu1  ;;  %3960 = vmatmul.mubr.msk.bf16.gmra.mrb[20].mxu0 %vm2936_vm0, %v2880_v21  ;;  %v2847_v15 = vsel %vm2791_vm14, %v2782_v1, %v2290_v26  ;;  %v2494_v26 = vsel %vm2466_vm9, %v2411_v8, %v7127_v17 }
 0x277   : > { %v6434_v33 = vpop.f32.mrb[1].mxu1  ;;  %v2559_v29 = vsel %vm2531_vm10, %v2494_v26, %v7128_v35 }
 0x278   : > { %v6439_v0 = vpop.f32.mrb[2].mxu1  ;;  %v6441_v51 = vpop.permute.xlu1 %2011 }
 0x279   : > { %v6446_v40 = vpop.f32.mrb[3].mxu1  ;;  %v2358_v36 = vpop.permute.xlu0 %2357 }
 0x27a   : > { %v2910_v25 = vsel %vm2856_vm15, %v2845_v38, %v2358_v36 }
 0x27b   : > { %3991 = vmatprep.mubr.msk.bf16.mxu1 %vm2936_vm0, %v2910_v25 }
 0x27c   : > { %v2050_v11 = vpop.permute.xlu1 %2049 }
 0x27d   : > { %v2360_v5 = vpop.permute.xlu0 %2359  ;;  %v2622_v2 = vsel %vm2596_vm11, %v2557_v49, %v2050_v11 }
 0x27e   : > { %v2912_v12 = vsel %vm2856_vm15, %v2847_v15, %v2360_v5 }
 0x27f   : > { %3992 = vmatmul.mubr.msk.bf16.gmra.mrb[20].mxu1 %vm2936_vm0, %v2912_v12 }
 0x280   : > { %v2052_v28 = vpop.permute.xlu1 %2051 }
 0x281   : > { %v6456_v14 = vpop.permute.xlu0 %2013  ;;  %v2624_v6 = vsel %vm2596_vm11, %v2559_v29, %v2052_v28 }
 0x284   : > { %v2120_v34 = vpop.permute.xlu1 %2119 }
 0x285   : > { %v2082_v43 = vpop.permute.xlu0 %2081  ;;  %v2687_v13 = vsel %vm2661_vm12, %v2622_v2, %v2120_v34  ;;  %v7131_v34 = vld [vmem:[#allocation5_spill] sm:$0xff] }
 0x288   : > { %v2122_v60 = vpop.permute.xlu1 %2121 }
 0x289   : > { %v6458_v37 = vpop.permute.xlu0 %2083  ;;  %v2689_v36 = vsel %vm2661_vm12, %v2624_v6, %v2122_v60  ;;  %v2459_v60 = vsel %vm2369_vm8, %v5908_v46, %v7131_v34 }
 0x28c   : > { %v2190_v61 = vpop.permute.xlu1 %2189 }
 0x28d   : > { %v2152_v47 = vpop.permute.xlu0 %2151  ;;  %v2752_v21 = vsel %vm2726_vm13, %v2687_v13, %v2190_v61 }
 0x290   : > { %v2192_v10 = vpop.permute.xlu1 %2191 }
 0x291   : > { %v6460_v53 = vpop.permute.xlu0 %2153  ;;  %v2754_v25 = vsel %vm2726_vm13, %v2689_v36, %v2192_v10 }
 0x294   : > { %v2260_v7 = vpop.permute.xlu1 %2259 }
 0x295   : > { %v2222_v52 = vpop.permute.xlu0 %2221  ;;  %v2817_v54 = vsel %vm2791_vm14, %v2752_v21, %v2260_v7 }
 0x298   : > { %v2262_v56 = vpop.permute.xlu1 %2261 }
 0x299   : > { %v6471_v42 = vpop.permute.xlu0 %2223  ;;  %v3945_v57 = vpop.f32.mrb[4].mxu0  ;;  %v2819_v1 = vsel %vm2791_vm14, %v2754_v25, %v2262_v56 }
 0x29a   : > { %v3299_v9 = vmax.f32 %v6394_v16, %v3945_v57  ;;  %v3058_v44 = vpop.f32.mrb[5].mxu0 }
 0x29b   : > { %v3297_v63 = vmax.f32 %v6400_v22, %v3058_v44  ;;  %v3946_v50 = vpop.f32.mrb[6].mxu0 }
 0x29c   : > { %3332 = vst.msk [vmem:[#allocation2 + $0x10] sm:$0xff] %vm3329_vm1, %v3299_v9  ;;  %v3300_v16 = vmax.f32 %v6405_v59, %v3946_v50  ;;  %v2330_v32 = vpop.permute.xlu1 %2329  ;;  %v3061_v23 = vpop.f32.mrb[7].mxu0  ;;  %v7129_v59 = vld [vmem:[#allocation61_spill] sm:$0xff] }
 0x29d   : > { %v2292_v4 = vpop.permute.xlu0 %2291  ;;  %3330 = vst.msk [vmem:[#allocation2] sm:$0xff] %vm3329_vm1, %v3297_v63  ;;  %v2882_v38 = vsel %vm2856_vm15, %v2817_v54, %v2330_v32  ;;  %v3298_v22 = vmax.f32 %v6410_v27, %v3061_v23  ;;  %v2456_v45 = vsel %vm2369_vm8, %v5892_v18, %v7129_v59  ;;  %v7130_v27 = vld [vmem:[#allocation98_spill] sm:$0xff] }
 0x29e   : > { %3333 = vst.msk [vmem:[#allocation2 + $0x18] sm:$0xff] %vm3329_vm1, %v3300_v16  ;;  %3963 = vmatprep.mubr.msk.bf16.mxu0 %vm2936_vm0, %v2882_v38  ;;  %v2524_v58 = vsel %vm2466_vm9, %v2456_v45, %v7130_v27 }
 0x29f   : > { %3331 = vst.msk [vmem:[#allocation2 + $0x8] sm:$0xff] %vm3329_vm1, %v3298_v22  ;;  %v2589_v15 = vsel %vm2531_vm10, %v2524_v58, %v6441_v51  ;;  %v7132_v51 = vld [vmem:[#allocation8_spill] sm:$0xff] }
 0x2a0   : > { %v2332_v11 = vpop.permute.xlu1 %2331  ;;  %v2654_v28 = vsel %vm2596_vm11, %v2589_v15, %v2082_v43  ;;  %v2526_v19 = vsel %vm2466_vm9, %v2459_v60, %v7132_v51  ;;  %v6528_v43 = vld [vmem:[%s6704_s3] ss:$0 sm:$0xff] }
 0x2a1   : > { %v2294_v5 = vpop.permute.xlu0 %2293  ;;  %v2884_v12 = vsel %vm2856_vm15, %v2819_v1, %v2332_v11  ;;  %v2719_v61 = vsel %vm2661_vm12, %v2654_v28, %v2152_v47  ;;  %v2591_v46 = vsel %vm2531_vm10, %v2526_v19, %v6456_v14  ;;  %v7133_v51 = vld [vmem:[#allocation79_spill] sm:$0xff] }
 0x2a2   : > { %v3977_v18 = vpop.f32.mrb[4].mxu1  ;;  %3964 = vmatmul.mubr.msk.bf16.gmra.mrb[24].mxu0 %vm2936_vm0, %v2884_v12  ;;  %v2784_v3 = vsel %vm2726_vm13, %v2719_v61, %v2222_v52  ;;  %v2462_v19 = vsel %vm2369_vm8, %v6000_v31, %v7133_v51  ;;  %v7136_v31 = vld [vmem:[#allocation50_spill] sm:$0xff] }
 0x2a3   : > { %v3315_v10 = vmax.f32 %v6427_v48, %v3977_v18  ;;  %v3186_v7 = vpop.f32.mrb[5].mxu1  ;;  %v2849_v48 = vsel %vm2791_vm14, %v2784_v3, %v2292_v4 }
 0x2a4   : > { %v3313_v24 = vmax.f32 %v6434_v33, %v3186_v7  ;;  %v3978_v55 = vpop.f32.mrb[6].mxu1  ;;  %v6531_v30 = vpop.permute.xlu1 %2015  ;;  %v2656_v33 = vsel %vm2596_vm11, %v2591_v46, %v6458_v37 }
 0x2a5   : > { %v3364_v47 = vld [vmem:[#allocation2 + $0x10] ss:$2 sm:$0xff]  ;;  %v3396_v49 = vld [vmem:[#allocation2 + $0x11] ss:$2 sm:$0xff]  ;;  %3348 = vst.msk [vmem:[#allocation2 + $0x90] sm:$0xff] %vm3329_vm1, %v3315_v10  ;;  %v3316_v52 = vmax.f32 %v6439_v0, %v3978_v55  ;;  %v3189_v56 = vpop.f32.mrb[7].mxu1  ;;  %v2362_v2 = vpop.permute.xlu0 %2361  ;;  %v2721_v9 = vsel %vm2661_vm12, %v2656_v33, %v6460_v53 }
 0x2a6   : > { %v3426_v57 = vmax.f32 %v3364_v47, %v3396_v49  ;;  %v3362_v62 = vld [vmem:[#allocation2] ss:$2 sm:$0xff]  ;;  %v3394_v8 = vld [vmem:[#allocation2 + $0x1] ss:$2 sm:$0xff]  ;;  %3346 = vst.msk [vmem:[#allocation2 + $0x80] sm:$0xff] %vm3329_vm1, %v3313_v24  ;;  %v3314_v14 = vmax.f32 %v6446_v40, %v3189_v56  ;;  %v2914_v13 = vsel %vm2856_vm15, %v2849_v48, %v2362_v2  ;;  %v2786_v0 = vsel %vm2726_vm13, %v2721_v9, %v6471_v42 }
 0x2a7   : > { %v3425_v44 = vmax.f32 %v3362_v62, %v3394_v8  ;;  %3349 = vst.msk [vmem:[#allocation2 + $0x98] sm:$0xff] %vm3329_vm1, %v3316_v52  ;;  %3995 = vmatprep.mubr.msk.bf16.mxu1 %vm2936_vm0, %v2914_v13  ;;  %v2851_v26 = vsel %vm2791_vm14, %v2786_v0, %v2294_v5  ;;  %v7134_v24 = vld [vmem:[#allocation24_spill] sm:$0xff]  ;;  %v2414_v62 = vsel %vm2369_vm8, %v7059_v41, %v7136_v31  ;;  %v7137_v8 = vld [vmem:[#allocation26_spill] sm:$0xff] }
 0x2a8   : > { %v3449_v37 = vadd.f32 %v6528_v43, %v3426_v57  ;;  %3347 = vst.msk [vmem:[#allocation2 + $0x88] sm:$0xff] %vm3329_vm1, %v3314_v14  ;;  %v2018_v17 = vpop.permute.xlu1 %2017  ;;  %v2528_v55 = vsel %vm2466_vm9, %v2462_v19, %v7134_v24  ;;  %v7135_v2 = vld [vmem:[#allocation56_spill] sm:$0xff] }
 0x2a9   : > { %v3448_v40 = vadd.f32 %v6528_v43, %v3425_v44  ;;  %v2364_v21 = vpop.permute.xlu0 %2363  ;;  %v2593_v48 = vsel %vm2531_vm10, %v2528_v55, %v6531_v30  ;;  %v2465_v33 = vsel %vm2369_vm8, %v6017_v39, %v7135_v2  ;;  %v7138_v13 = vld [vmem:[#allocation88_spill] sm:$0xff]  ;;  %v7139_v39 = vld [vmem:[#allocation11_spill] sm:$0xff] }
 0x2aa   : > { %v3465_v53 = vmax.f32 %v3449_v37, 0.0  ;;  %v2916_v63 = vsel %vm2856_vm15, %v2851_v26, %v2364_v21  ;;  %v2530_v14 = vsel %vm2466_vm9, %v2465_v33, %v7137_v8  ;;  %v2496_v9 = vsel %vm2466_vm9, %v2414_v62, %v7138_v13 }
 0x2ab   : > { %v3464_v42 = vmax.f32 %v3448_v40, 0.0  ;;  %3996 = vmatmul.mubr.msk.bf16.gmra.mrb[24].mxu1 %vm2936_vm0, %v2916_v63  ;;  %v2595_v44 = vsel %vm2531_vm10, %v2530_v14, %v2018_v17  ;;  %v2561_v40 = vsel %vm2531_vm10, %v2496_v9, %v7139_v39 }
 0x2ac   : > { %v3884_v50 = vpack.c.bf16 %v3465_v53, %v3465_v53  ;;  %v2086_v35 = vpop.permute.xlu1 %2085 }
 0x2ad   : > { %v3883_v29 = vpack.c.bf16 %v3464_v42, %v3464_v42  ;;  %v6563_v54 = vpop.permute.xlu0 %1985  ;;  %v2658_v52 = vsel %vm2596_vm11, %v2593_v48, %v2086_v35 }
 0x2ae   : > { %3546 = vst.msk [vmem:[%s6560_s13 + $0x4] sm:$0xf] %vm3544_vm2, %v3884_v50  ;;  %v3380_v16 = vld [vmem:[#allocation2 + $0x90] ss:$2 sm:$0xff]  ;;  %v3412_v32 = vld [vmem:[#allocation2 + $0x91] ss:$2 sm:$0xff] }
 0x2af   : > { %3545 = vst.msk [vmem:[%s6560_s13] sm:$0xf] %vm3544_vm2, %v3883_v29  ;;  %v3434_v23 = vmax.f32 %v3380_v16, %v3412_v32  ;;  %v3378_v6 = vld [vmem:[#allocation2 + $0x80] ss:$2 sm:$0xff]  ;;  %v3410_v4 = vld [vmem:[#allocation2 + $0x81] ss:$2 sm:$0xff] }
 0x2b0   : > { %v3433_v38 = vmax.f32 %v3378_v6, %v3410_v4  ;;  %v2088_v22 = vpop.permute.xlu1 %2087  ;;  %v7140_v50 = vld [vmem:[#allocation40_spill] sm:$0xff]  ;;  %v7141_v32 = vld [vmem:[#allocation86_spill] sm:$0xff] }
 0x2b1   : > { %v3457_v36 = vadd.f32 %v6528_v43, %v3434_v23  ;;  %v2054_v59 = vpop.permute.xlu0 %2053  ;;  %v2660_v26 = vsel %vm2596_vm11, %v2595_v44, %v2088_v22  ;;  %v2417_v17 = vsel %vm2369_vm8, %v7063_v20, %v7140_v50 }
 0x2b2   : > { %v3456_v45 = vadd.f32 %v6528_v43, %v3433_v38  ;;  %v2626_v53 = vsel %vm2596_vm11, %v2561_v40, %v2054_v59  ;;  %v2498_v23 = vsel %vm2466_vm9, %v2417_v17, %v7141_v32 }
 0x2b3   : > { %v3473_v25 = vmax.f32 %v3457_v36, 0.0  ;;  %v2563_v36 = vsel %vm2531_vm10, %v2498_v23, %v6563_v54 }
 0x2b4   : > { %v3472_v27 = vmax.f32 %v3456_v45, 0.0  ;;  %v2156_v58 = vpop.permute.xlu1 %2155 }
 0x2b5   : > { %v3892_v1 = vpack.c.bf16 %v3473_v25, %v3473_v25  ;;  %v2056_v11 = vpop.permute.xlu0 %2055  ;;  %v2723_v57 = vsel %vm2661_vm12, %v2658_v52, %v2156_v58 }
 0x2b6   : > { %v3891_v15 = vpack.c.bf16 %v3472_v27, %v3472_v27  ;;  %v2628_v27 = vsel %vm2596_vm11, %v2563_v36, %v2056_v11 }
 0x2b7   : > { %3554 = vst.msk [vmem:[%s6560_s13 + $0x24] sm:$0xf] %vm3544_vm2, %v3892_v1 }
 0x2b8   : > { %3553 = vst.msk [vmem:[%s6560_s13 + $0x20] sm:$0xf] %vm3544_vm2, %v3891_v15  ;;  %v2158_v5 = vpop.permute.xlu1 %2157 }
 0x2b9   : > { %v2124_v12 = vpop.permute.xlu0 %2123  ;;  %v2725_v63 = vsel %vm2661_vm12, %v2660_v26, %v2158_v5 }
 0x2ba   : > { %v2691_v35 = vsel %vm2661_vm12, %v2626_v53, %v2124_v12 }
 0x2bc   : > { %v2226_v28 = vpop.permute.xlu1 %2225 }
 0x2bd   : > { %v2126_v18 = vpop.permute.xlu0 %2125  ;;  %v2788_v30 = vsel %vm2726_vm13, %v2723_v57, %v2226_v28 }
 0x2be   : > { %v2693_v1 = vsel %vm2661_vm12, %v2628_v27, %v2126_v18 }
 0x2c0   : > { %v2228_v34 = vpop.permute.xlu1 %2227 }
 0x2c1   : > { %v2194_v60 = vpop.permute.xlu0 %2193  ;;  %v2790_v29 = vsel %vm2726_vm13, %v2725_v63, %v2228_v34 }
 0x2c2   : > { %v2756_v6 = vsel %vm2726_vm13, %v2691_v35, %v2194_v60 }
 0x2c4   : > { %v2296_v61 = vpop.permute.xlu1 %2295 }
 0x2c5   : > { %v2196_v10 = vpop.permute.xlu0 %2195  ;;  %v3949_v7 = vpop.f32.mrb[8].mxu0  ;;  %v2853_v0 = vsel %vm2791_vm14, %v2788_v30, %v2296_v61 }
 0x2c6   : > { %v3074_v3 = vpop.f32.mrb[9].mxu0  ;;  %v2758_v15 = vsel %vm2726_vm13, %v2693_v1, %v2196_v10 }
 0x2c7   : > { %v3950_v46 = vpop.f32.mrb[10].mxu0 }
 0x2c8   : > { %v2298_v47 = vpop.permute.xlu1 %2297  ;;  %v3077_v49 = vpop.f32.mrb[11].mxu0 }
 0x2c9   : > { %v2264_v56 = vpop.permute.xlu0 %2263  ;;  %v2855_v4 = vsel %vm2791_vm14, %v2790_v29, %v2298_v47 }
 0x2ca   : > { %v2821_v59 = vsel %vm2791_vm14, %v2756_v6, %v2264_v56 }
 0x2cc   : > { %v2366_v37 = vpop.permute.xlu1 %2365 }
 0x2cd   : > { %v2266_v21 = vpop.permute.xlu0 %2265  ;;  %v2918_v41 = vsel %vm2856_vm15, %v2853_v0, %v2366_v37 }
 0x2ce   : > { %v3981_v42 = vpop.f32.mrb[8].mxu1  ;;  %3999 = vmatprep.mubr.msk.bf16.mxu1 %vm2936_vm0, %v2918_v41  ;;  %v2823_v54 = vsel %vm2791_vm14, %v2758_v15, %v2266_v21 }
 0x2cf   : > { %v3202_v16 = vpop.f32.mrb[9].mxu1 }
 0x2d0   : > { %v3982_v38 = vpop.f32.mrb[10].mxu1  ;;  %v2368_v22 = vpop.permute.xlu1 %2367 }
 0x2d1   : > { %v3205_v20 = vpop.f32.mrb[11].mxu1  ;;  %v2334_v45 = vpop.permute.xlu0 %2333  ;;  %v2920_v25 = vsel %vm2856_vm15, %v2855_v4, %v2368_v22 }
 0x2d2   : > { %v2886_v58 = vsel %vm2856_vm15, %v2821_v59, %v2334_v45  ;;  %4000 = vmatmul.mubr.msk.bf16.gmra.mrb[28].mxu1 %vm2936_vm0, %v2920_v25 }
 0x2d3   : > { %3967 = vmatprep.mubr.msk.bf16.mxu0 %vm2936_vm0, %v2886_v58 }
 0x2d5   : > { %v2336_v5 = vpop.permute.xlu0 %2335 }
 0x2d6   : > { %v2888_v12 = vsel %vm2856_vm15, %v2823_v54, %v2336_v5 }
 0x2d7   : > { %3968 = vmatmul.mubr.msk.bf16.gmra.mrb[28].mxu0 %vm2936_vm0, %v2888_v12 }
 0x2f1   : > { %v3953_v28 = vpop.f32.mrb[12].mxu0 }
 0x2f2   : > { %v3303_v34 = vmax.f32 %v3949_v7, %v3953_v28  ;;  %v3090_v11 = vpop.f32.mrb[13].mxu0 }
 0x2f3   : > { %v3301_v60 = vmax.f32 %v3074_v3, %v3090_v11  ;;  %v3954_v61 = vpop.f32.mrb[14].mxu0 }
 0x2f4   : > { %3336 = vst.msk [vmem:[#allocation2 + $0x30] sm:$0xff] %vm3329_vm1, %v3303_v34  ;;  %v3304_v51 = vmax.f32 %v3950_v46, %v3954_v61  ;;  %v3093_v18 = vpop.f32.mrb[15].mxu0 }
 0x2f5   : > { %3334 = vst.msk [vmem:[#allocation2 + $0x20] sm:$0xff] %vm3329_vm1, %v3301_v60  ;;  %v3302_v19 = vmax.f32 %v3077_v49, %v3093_v18 }
 0x2f6   : > { %3337 = vst.msk [vmem:[#allocation2 + $0x38] sm:$0xff] %vm3329_vm1, %v3304_v51 }
 0x2f7   : > { %3335 = vst.msk [vmem:[#allocation2 + $0x28] sm:$0xff] %vm3329_vm1, %v3302_v19 }
 0x2fa   : > { %v3985_v10 = vpop.f32.mrb[12].mxu1 }
 0x2fb   : > { %v3319_v24 = vmax.f32 %v3981_v42, %v3985_v10  ;;  %v3218_v55 = vpop.f32.mrb[13].mxu1 }
 0x2fc   : > { %v3317_v48 = vmax.f32 %v3202_v16, %v3218_v55  ;;  %v3986_v47 = vpop.f32.mrb[14].mxu1 }
 0x2fd   : > { %v3368_v7 = vld [vmem:[#allocation2 + $0x30] ss:$2 sm:$0xff]  ;;  %v3400_v52 = vld [vmem:[#allocation2 + $0x31] ss:$2 sm:$0xff]  ;;  %3352 = vst.msk [vmem:[#allocation2 + $0xb0] sm:$0xff] %vm3329_vm1, %v3319_v24  ;;  %v3320_v3 = vmax.f32 %v3982_v38, %v3986_v47  ;;  %v3221_v46 = vpop.f32.mrb[15].mxu1 }
 0x2fe   : > { %v3428_v56 = vmax.f32 %v3368_v7, %v3400_v52  ;;  %v3366_v2 = vld [vmem:[#allocation2 + $0x20] ss:$2 sm:$0xff]  ;;  %v3398_v49 = vld [vmem:[#allocation2 + $0x21] ss:$2 sm:$0xff]  ;;  %3350 = vst.msk [vmem:[#allocation2 + $0xa0] sm:$0xff] %vm3329_vm1, %v3317_v48  ;;  %v3318_v33 = vmax.f32 %v3205_v20, %v3221_v46 }
 0x2ff   : > { %v3427_v57 = vmax.f32 %v3366_v2, %v3398_v49  ;;  %3353 = vst.msk [vmem:[#allocation2 + $0xb8] sm:$0xff] %vm3329_vm1, %v3320_v3 }
 0x300   : > { %v3451_v31 = vadd.f32 %v6528_v43, %v3428_v56  ;;  %3351 = vst.msk [vmem:[#allocation2 + $0xa8] sm:$0xff] %vm3329_vm1, %v3318_v33 }
 0x301   : > { %v3450_v62 = vadd.f32 %v6528_v43, %v3427_v57 }
 0x302   : > { %v3467_v8 = vmax.f32 %v3451_v31, 0.0 }
 0x303   : > { %v3466_v14 = vmax.f32 %v3450_v62, 0.0 }
 0x304   : > { %v3886_v30 = vpack.c.bf16 %v3467_v8, %v3467_v8 }
 0x305   : > { %v3885_v13 = vpack.c.bf16 %v3466_v14, %v3466_v14 }
 0x306   : > { %3548 = vst.msk [vmem:[%s6560_s13 + $0xc] sm:$0xf] %vm3544_vm2, %v3886_v30  ;;  %v3384_v9 = vld [vmem:[#allocation2 + $0xb0] ss:$2 sm:$0xff]  ;;  %v3416_v44 = vld [vmem:[#allocation2 + $0xb1] ss:$2 sm:$0xff] }
 0x307   : > { %3547 = vst.msk [vmem:[%s6560_s13 + $0x8] sm:$0xf] %vm3544_vm2, %v3885_v13  ;;  %v3436_v0 = vmax.f32 %v3384_v9, %v3416_v44  ;;  %v3382_v37 = vld [vmem:[#allocation2 + $0xa0] ss:$2 sm:$0xff]  ;;  %v3414_v39 = vld [vmem:[#allocation2 + $0xa1] ss:$2 sm:$0xff] }
 0x308   : > { %v3435_v40 = vmax.f32 %v3382_v37, %v3414_v39 }
 0x309   : > { %v3459_v26 = vadd.f32 %v6528_v43, %v3436_v0 }
 0x30a   : > { %v3458_v21 = vadd.f32 %v6528_v43, %v3435_v40 }
 0x30b   : > { %v3475_v41 = vmax.f32 %v3459_v26, 0.0 }
 0x30c   : > { %v3474_v53 = vmax.f32 %v3458_v21, 0.0 }
 0x30d   : > { %v3894_v63 = vpack.c.bf16 %v3475_v41, %v3475_v41 }
 0x30e   : > { %v3893_v42 = vpack.c.bf16 %v3474_v53, %v3474_v53 }
 0x30f   : > { %3556 = vst.msk [vmem:[%s6560_s13 + $0x2c] sm:$0xf] %vm3544_vm2, %v3894_v63 }
 0x310   : > { %3555 = vst.msk [vmem:[%s6560_s13 + $0x28] sm:$0xf] %vm3544_vm2, %v3893_v42 }
 0x31d   : > { %v3957_v50 = vpop.f32.mrb[16].mxu0 }
 0x31e   : > { %v3106_v17 = vpop.f32.mrb[17].mxu0 }
 0x31f   : > { %v3958_v35 = vpop.f32.mrb[18].mxu0 }
 0x320   : > { %v3109_v29 = vpop.f32.mrb[19].mxu0 }
 0x326   : > { %v3989_v16 = vpop.f32.mrb[16].mxu1 }
 0x327   : > { %v3234_v32 = vpop.f32.mrb[17].mxu1 }
 0x328   : > { %v3990_v23 = vpop.f32.mrb[18].mxu1 }
 0x329   : > { %v3237_v6 = vpop.f32.mrb[19].mxu1 }
 0x349   : > { %v3961_v4 = vpop.f32.mrb[20].mxu0 }
 0x34a   : > { %v3307_v38 = vmax.f32 %v3957_v50, %v3961_v4  ;;  %v3122_v22 = vpop.f32.mrb[21].mxu0 }
 0x34b   : > { %v3305_v36 = vmax.f32 %v3106_v17, %v3122_v22  ;;  %v3962_v59 = vpop.f32.mrb[22].mxu0 }
 0x34c   : > { %3340 = vst.msk [vmem:[#allocation2 + $0x50] sm:$0xff] %vm3329_vm1, %v3307_v38  ;;  %v3308_v20 = vmax.f32 %v3958_v35, %v3962_v59  ;;  %v3125_v45 = vpop.f32.mrb[23].mxu0 }
 0x34d   : > { %3338 = vst.msk [vmem:[#allocation2 + $0x40] sm:$0xff] %vm3329_vm1, %v3305_v36  ;;  %v3306_v25 = vmax.f32 %v3109_v29, %v3125_v45 }
 0x34e   : > { %3341 = vst.msk [vmem:[#allocation2 + $0x58] sm:$0xff] %vm3329_vm1, %v3308_v20 }
 0x34f   : > { %3339 = vst.msk [vmem:[#allocation2 + $0x48] sm:$0xff] %vm3329_vm1, %v3306_v25 }
 0x352   : > { %v3993_v27 = vpop.f32.mrb[20].mxu1 }
 0x353   : > { %v3323_v58 = vmax.f32 %v3989_v16, %v3993_v27  ;;  %v3250_v1 = vpop.f32.mrb[21].mxu1 }
 0x354   : > { %v3321_v15 = vmax.f32 %v3234_v32, %v3250_v1  ;;  %v3994_v54 = vpop.f32.mrb[22].mxu1 }
 0x355   : > { %v3372_v5 = vld [vmem:[#allocation2 + $0x50] ss:$2 sm:$0xff]  ;;  %v3404_v12 = vld [vmem:[#allocation2 + $0x51] ss:$2 sm:$0xff]  ;;  %3356 = vst.msk [vmem:[#allocation2 + $0xd0] sm:$0xff] %vm3329_vm1, %v3323_v58  ;;  %v3324_v28 = vmax.f32 %v3990_v23, %v3994_v54  ;;  %v3253_v34 = vpop.f32.mrb[23].mxu1 }
 0x356   : > { %v3430_v11 = vmax.f32 %v3372_v5, %v3404_v12  ;;  %v3370_v60 = vld [vmem:[#allocation2 + $0x40] ss:$2 sm:$0xff]  ;;  %v3402_v61 = vld [vmem:[#allocation2 + $0x41] ss:$2 sm:$0xff]  ;;  %3354 = vst.msk [vmem:[#allocation2 + $0xc0] sm:$0xff] %vm3329_vm1, %v3321_v15  ;;  %v3322_v51 = vmax.f32 %v3237_v6, %v3253_v34 }
 0x357   : > { %v3429_v18 = vmax.f32 %v3370_v60, %v3402_v61  ;;  %3357 = vst.msk [vmem:[#allocation2 + $0xd8] sm:$0xff] %vm3329_vm1, %v3324_v28 }
 0x358   : > { %v3453_v19 = vadd.f32 %v6528_v43, %v3430_v11  ;;  %3355 = vst.msk [vmem:[#allocation2 + $0xc8] sm:$0xff] %vm3329_vm1, %v3322_v51 }
 0x359   : > { %v3452_v10 = vadd.f32 %v6528_v43, %v3429_v18 }
 0x35a   : > { %v3469_v24 = vmax.f32 %v3453_v19, 0.0 }
 0x35b   : > { %v3468_v55 = vmax.f32 %v3452_v10, 0.0 }
 0x35c   : > { %v3888_v48 = vpack.c.bf16 %v3469_v24, %v3469_v24 }
 0x35d   : > { %v3887_v47 = vpack.c.bf16 %v3468_v55, %v3468_v55 }
 0x35e   : > { %3550 = vst.msk [vmem:[%s6560_s13 + $0x14] sm:$0xf] %vm3544_vm2, %v3888_v48  ;;  %v3388_v7 = vld [vmem:[#allocation2 + $0xd0] ss:$2 sm:$0xff]  ;;  %v3420_v52 = vld [vmem:[#allocation2 + $0xd1] ss:$2 sm:$0xff] }
 0x35f   : > { %3549 = vst.msk [vmem:[%s6560_s13 + $0x10] sm:$0xf] %vm3544_vm2, %v3887_v47  ;;  %v3438_v3 = vmax.f32 %v3388_v7, %v3420_v52  ;;  %v3386_v46 = vld [vmem:[#allocation2 + $0xc0] ss:$2 sm:$0xff]  ;;  %v3418_v56 = vld [vmem:[#allocation2 + $0xc1] ss:$2 sm:$0xff] }
 0x360   : > { %v3437_v2 = vmax.f32 %v3386_v46, %v3418_v56 }
 0x361   : > { %v3461_v49 = vadd.f32 %v6528_v43, %v3438_v3 }
 0x362   : > { %v3460_v33 = vadd.f32 %v6528_v43, %v3437_v2 }
 0x363   : > { %v3477_v57 = vmax.f32 %v3461_v49, 0.0 }
 0x364   : > { %v3476_v31 = vmax.f32 %v3460_v33, 0.0 }
 0x365   : > { %v3896_v62 = vpack.c.bf16 %v3477_v57, %v3477_v57 }
 0x366   : > { %v3895_v8 = vpack.c.bf16 %v3476_v31, %v3476_v31 }
 0x367   : > { %3558 = vst.msk [vmem:[%s6560_s13 + $0x34] sm:$0xf] %vm3544_vm2, %v3896_v62 }
 0x368   : > { %3557 = vst.msk [vmem:[%s6560_s13 + $0x30] sm:$0xf] %vm3544_vm2, %v3895_v8 }
 0x375   : > { %v3965_v14 = vpop.f32.mrb[24].mxu0 }
 0x376   : > { %v3138_v30 = vpop.f32.mrb[25].mxu0 }
 0x377   : > { %v3966_v13 = vpop.f32.mrb[26].mxu0 }
 0x378   : > { %v3141_v9 = vpop.f32.mrb[27].mxu0 }
 0x37e   : > { %v3997_v44 = vpop.f32.mrb[24].mxu1 }
 0x37f   : > { %v3266_v0 = vpop.f32.mrb[25].mxu1 }
 0x380   : > { %v3998_v37 = vpop.f32.mrb[26].mxu1 }
 0x381   : > { %v3269_v39 = vpop.f32.mrb[27].mxu1 }
 0x3a5   : > { %v4001_v40 = vpop.f32.mrb[28].mxu1 }
 0x3a6   : > { %v3327_v26 = vmax.f32 %v3997_v44, %v4001_v40  ;;  %v3282_v21 = vpop.f32.mrb[29].mxu1 }
 0x3a7   : > { %v3325_v41 = vmax.f32 %v3266_v0, %v3282_v21  ;;  %v4002_v53 = vpop.f32.mrb[30].mxu1 }
 0x3a8   : > { %3360 = vst.msk [vmem:[#allocation2 + $0xf0] sm:$0xff] %vm3329_vm1, %v3327_v26  ;;  %v3328_v63 = vmax.f32 %v3998_v37, %v4002_v53  ;;  %v3285_v42 = vpop.f32.mrb[31].mxu1 }
 0x3a9   : > { %3358 = vst.msk [vmem:[#allocation2 + $0xe0] sm:$0xff] %vm3329_vm1, %v3325_v41  ;;  %v3326_v50 = vmax.f32 %v3269_v39, %v3285_v42 }
 0x3aa   : > { %v3969_v17 = vpop.f32.mrb[28].mxu0  ;;  %3361 = vst.msk [vmem:[#allocation2 + $0xf8] sm:$0xff] %vm3329_vm1, %v3328_v63 }
 0x3ab   : > { %v3311_v35 = vmax.f32 %v3965_v14, %v3969_v17  ;;  %v3154_v29 = vpop.f32.mrb[29].mxu0  ;;  %3359 = vst.msk [vmem:[#allocation2 + $0xe8] sm:$0xff] %vm3329_vm1, %v3326_v50 }
 0x3ac   : > { %v3309_v16 = vmax.f32 %v3138_v30, %v3154_v29  ;;  %v3970_v32 = vpop.f32.mrb[30].mxu0 }
 0x3ad   : > { %3344 = vst.msk [vmem:[#allocation2 + $0x70] sm:$0xff] %vm3329_vm1, %v3311_v35  ;;  %v3312_v23 = vmax.f32 %v3966_v13, %v3970_v32  ;;  %v3157_v6 = vpop.f32.mrb[31].mxu0 }
 0x3ae   : > { %3342 = vst.msk [vmem:[#allocation2 + $0x60] sm:$0xff] %vm3329_vm1, %v3309_v16  ;;  %v3310_v4 = vmax.f32 %v3141_v9, %v3157_v6 }
 0x3af   : > { %3345 = vst.msk [vmem:[#allocation2 + $0x78] sm:$0xff] %vm3329_vm1, %v3312_v23 }
 0x3b0   : > { %3343 = vst.msk [vmem:[#allocation2 + $0x68] sm:$0xff] %vm3329_vm1, %v3310_v4 }
 0x3b1   : > { %v3392_v38 = vld [vmem:[#allocation2 + $0xf0] ss:$2 sm:$0xff]  ;;  %v3424_v22 = vld [vmem:[#allocation2 + $0xf1] ss:$2 sm:$0xff] }
 0x3b2   : > { %v3440_v36 = vmax.f32 %v3392_v38, %v3424_v22  ;;  %v3390_v59 = vld [vmem:[#allocation2 + $0xe0] ss:$2 sm:$0xff]  ;;  %v3422_v20 = vld [vmem:[#allocation2 + $0xe1] ss:$2 sm:$0xff] }
 0x3b3   : > { %v3439_v45 = vmax.f32 %v3390_v59, %v3422_v20 }
 0x3b4   : > { %v3463_v25 = vadd.f32 %v6528_v43, %v3440_v36 }
 0x3b5   : > { %v3462_v27 = vadd.f32 %v6528_v43, %v3439_v45 }
 0x3b6   : > { %v3376_v58 = vld [vmem:[#allocation2 + $0x70] ss:$2 sm:$0xff]  ;;  %v3408_v1 = vld [vmem:[#allocation2 + $0x71] ss:$2 sm:$0xff]  ;;  %v3479_v15 = vmax.f32 %v3463_v25, 0.0 }
 0x3b7   : > { %v3432_v54 = vmax.f32 %v3376_v58, %v3408_v1  ;;  %v3374_v5 = vld [vmem:[#allocation2 + $0x60] ss:$2 sm:$0xff]  ;;  %v3406_v12 = vld [vmem:[#allocation2 + $0x61] ss:$2 sm:$0xff]  ;;  %v3478_v28 = vmax.f32 %v3462_v27, 0.0 }
 0x3b8   : > { %v3898_v34 = vpack.c.bf16 %v3479_v15, %v3479_v15  ;;  %v3431_v11 = vmax.f32 %v3374_v5, %v3406_v12 }
 0x3b9   : > { %v3455_v60 = vadd.f32 %v6528_v43, %v3432_v54  ;;  %v3897_v61 = vpack.c.bf16 %v3478_v28, %v3478_v28 }
 0x3ba   : > { %3560 = vst.msk [vmem:[%s6560_s13 + $0x3c] sm:$0xf] %vm3544_vm2, %v3898_v34  ;;  %v3454_v51 = vadd.f32 %v6528_v43, %v3431_v11 }
 0x3bb   : > { %v3471_v18 = vmax.f32 %v3455_v60, 0.0  ;;  %3559 = vst.msk [vmem:[%s6560_s13 + $0x38] sm:$0xf] %vm3544_vm2, %v3897_v61 }
 0x3bc   : > { %v3470_v19 = vmax.f32 %v3454_v51, 0.0 }
 0x3bd   : > { %v3890_v10 = vpack.c.bf16 %v3471_v18, %v3471_v18 }
 0x3be   : > { %v3889_v24 = vpack.c.bf16 %v3470_v19, %v3470_v19 }
 0x3bf   : > { %3552 = vst.msk [vmem:[%s6560_s13 + $0x1c] sm:$0xf] %vm3544_vm2, %v3890_v10 }
 0x3c0   : > { %3551 = vst.msk [vmem:[%s6560_s13 + $0x18] sm:$0xf] %vm3544_vm2, %v3889_v24 }
 0x3c1 PF: > { %s14_s19 = sadd.s32 1, %s4205_s19   ;;  %s7142_s15 = smov %s4197_s17 }
 0x3c2   : > { %p11_p9 = scmp.ge.s32.totalorder %s14_s19, 6   ;;  %s7143_s16 = smov %s4201_s18 }
 0x3c3   : > { %s7144_s17 = smov %s7147_s20  ;;  %s7145_s18 = smov %s7151_s21 }
 0x3c4   :  { %13 = sbr.rel (!%p11_p9) target bundleno = 3 (0x3), region = 100 }

// kernel: fire_cnn_forward.5
= control target key start
LH: loop header
LB: loop body
LE: loop exit
PB: predicated region body
PF: predicated region fallthrough
CT: control target
= control target key end

     0   :  { %v293_v28 = vlaneseq  ;;  %v2082_v36 = vmov 1966171168   ;;  %s2560_s0 = inlined_call_operand.vmem [shape: bf16[2,2048], index: 0, kind: input, shape index: {}]   ;;  %s2561_s1 = inlined_call_operand.vmem [shape: bf16[2048,64], index: 1, kind: input, shape index: {}]   ;;  %s2562_s2 = inlined_call_operand.vmem [shape: f32[1,64], index: 2, kind: input, shape index: {}]   ;;  %s2563_s3 = inlined_call_operand.vmem [shape: bf16[64,2], index: 3, kind: input, shape index: {}]   ;;  %s2564_s4 = inlined_call_operand.vmem [shape: f32[1,2], index: 4, kind: input, shape index: {}]   ;;  %s2565_s5 = inlined_call_operand.hbm [shape: f32[2,2], index: 5, kind: output, shape index: {}]  }
   0x1   :  { %v1924_v0 = vld [vmem:[%s2561_s1 + $0x40] sm:$0xff]   ;;  %v1928_v4 = vld [vmem:[%s2561_s1 + $0x48] sm:$0xff]   ;;  %v1932_v8 = vld [vmem:[%s2561_s1 + $0x50] sm:$0xff]   ;;  %v291_v37 = vunpack.c.l.s4 %v2082_v36 }
   0x2   :  { %v1925_v1 = vld [vmem:[%s2561_s1 + $0xc0] sm:$0xff]   ;;  %1727 = vmatprep.subr.bf16.mxu0 %v1924_v0  ;;  %v1929_v5 = vld [vmem:[%s2561_s1 + $0xc8] sm:$0xff]   ;;  %v1933_v9 = vld [vmem:[%s2561_s1 + $0xd0] sm:$0xff]   ;;  %v294_v33 = vshrl.u32 %v293_v28, 7 }
   0x3   :  { %v1926_v2 = vld [vmem:[%s2561_s1] sm:$0xff]   ;;  %1749 = vmatprep.subr.bf16.mxu1 %v1925_v1  ;;  %v1930_v6 = vld [vmem:[%s2561_s1 + $0x8] sm:$0xff]   ;;  %v1934_v10 = vld [vmem:[%s2561_s1 + $0x10] sm:$0xff]   ;;  %v292_v40 = vunpack.c.0.s8 %v291_v37 }
   0x4   :  { %v1927_v3 = vld [vmem:[%s2561_s1 + $0x80] sm:$0xff]   ;;  %1728 = vmatpush3.bf16.msra.mxu0 %v1926_v2  ;;  %v1931_v7 = vld [vmem:[%s2561_s1 + $0x88] sm:$0xff]   ;;  %v1935_v11 = vld [vmem:[%s2561_s1 + $0x90] sm:$0xff]  }
   0x5   :  { %1750 = vmatpush3.bf16.msra.mxu1 %v1927_v3  ;;  %1729 = vmatprep.subr.bf16.mxu0 %v1928_v4  ;;  %v1936_v12 = vld [vmem:[%s2561_s1 + $0x58] sm:$0xff]   ;;  %v1940_v16 = vld [vmem:[%s2561_s1 + $0x60] sm:$0xff]   ;;  %v1944_v20 = vld [vmem:[%s2561_s1 + $0x68] sm:$0xff]   ;;  %v2221_v41 = vsub.s32 %v292_v40, %v294_v33 }
   0x6   :  { %1751 = vmatprep.subr.bf16.mxu1 %v1929_v5  ;;  %v1937_v13 = vld [vmem:[%s2561_s1 + $0xd8] sm:$0xff]   ;;  %v1941_v17 = vld [vmem:[%s2561_s1 + $0xe0] sm:$0xff]   ;;  %v1945_v21 = vld [vmem:[%s2561_s1 + $0xe8] sm:$0xff]  }
   0x7   :  { %v1938_v14 = vld [vmem:[%s2561_s1 + $0x18] sm:$0xff]   ;;  %v1942_v18 = vld [vmem:[%s2561_s1 + $0x20] sm:$0xff]   ;;  %v1946_v22 = vld [vmem:[%s2561_s1 + $0x28] sm:$0xff]  }
   0x8   :  { %1730 = vmatpush3.bf16.msra.mxu0 %v1930_v6  ;;  %v1939_v15 = vld [vmem:[%s2561_s1 + $0x98] sm:$0xff]   ;;  %v1943_v19 = vld [vmem:[%s2561_s1 + $0xa0] sm:$0xff]   ;;  %v1947_v23 = vld [vmem:[%s2561_s1 + $0xa8] sm:$0xff]  }
   0x9   :  { %1752 = vmatpush3.bf16.msra.mxu1 %v1931_v7  ;;  %1731 = vmatprep.subr.bf16.mxu0 %v1932_v8  ;;  %v1948_v24 = vld [vmem:[%s2561_s1 + $0x70] sm:$0xff]   ;;  %v1952_v29 = vld [vmem:[%s2561_s1 + $0x78] sm:$0xff]   ;;  %v22_v34 = vld [vmem:[%s2560_s0] sm:$0xff] }
   0xa   :  { %1753 = vmatprep.subr.bf16.mxu1 %v1933_v9  ;;  %v1949_v25 = vld [vmem:[%s2561_s1 + $0xf0] sm:$0xff]   ;;  %v1953_v30 = vld [vmem:[%s2561_s1 + $0xf8] sm:$0xff]   ;;  %v1957_v35 = vld [vmem:[%s2561_s1 + $0x140] sm:$0xff]   ;;  %v289_v39 = vcombine.high %v22_v34, %v22_v34  ;;  %v296_v42 = vrot.slane %v22_v34, %v2221_v41 }
   0xb   :  { %v1950_v26 = vld [vmem:[%s2561_s1 + $0x30] sm:$0xff]   ;;  %v1954_v31 = vld [vmem:[%s2561_s1 + $0x38] sm:$0xff]   ;;  %v1958_v38 = vld [vmem:[%s2561_s1 + $0x1c0] sm:$0xff]  }
   0xc   :  { %1732 = vmatpush3.bf16.msra.mxu0 %v1934_v10  ;;  %v1951_v27 = vld [vmem:[%s2561_s1 + $0xb0] sm:$0xff]   ;;  %v1955_v32 = vld [vmem:[%s2561_s1 + $0xb8] sm:$0xff]   ;;  %v2225_v43 = vrot.slane %v289_v39, %v2221_v41  ;;  %v304_v44 = vcombine.high %v296_v42, %v296_v42  ;;  %v312_v45 = vrot.slane %v296_v42, %v2221_v41  ;;  %v1959_v47 = vld [vmem:[%s2561_s1 + $0x100] sm:$0xff]  }
   0xd   :  { %1754 = vmatpush3.bf16.msra.mxu1 %v1935_v11  ;;  %1733 = vmatprep.subr.bf16.mxu0 %v1936_v12  ;;  %v1960_v49 = vld [vmem:[%s2561_s1 + $0x180] sm:$0xff]   ;;  %v1961_v52 = vld [vmem:[%s2561_s1 + $0x148] sm:$0xff]   ;;  %v1965_v58 = vld [vmem:[%s2561_s1 + $0x150] sm:$0xff]  }
   0xe   :  { %1755 = vmatprep.subr.bf16.mxu1 %v1937_v13  ;;  %v305_v46 = vcombine.high %v2225_v43, %v2225_v43  ;;  %v326_v48 = vrot.slane %v304_v44, %v2221_v41  ;;  %v334_v51 = vcombine.high %v312_v45, %v312_v45  ;;  %v1962_v54 = vld [vmem:[%s2561_s1 + $0x1c8] sm:$0xff]   ;;  %v1966_v59 = vld [vmem:[%s2561_s1 + $0x1d0] sm:$0xff]   ;;  %v1969_v62 = vld [vmem:[%s2561_s1 + $0x158] sm:$0xff]  }
   0xf   :  { %v1963_v55 = vld [vmem:[%s2561_s1 + $0x108] sm:$0xff]   ;;  %v1967_v60 = vld [vmem:[%s2561_s1 + $0x110] sm:$0xff]   ;;  %v1970_v63 = vld [vmem:[%s2561_s1 + $0x1d8] sm:$0xff]  }
  0x10   :  { %1734 = vmatpush3.bf16.msra.mxu0 %v1938_v14  ;;  %v333_v50 = vrot.slane %v305_v46, %v2221_v41  ;;  %1203 = vmatprep.mubr.bf16.mxu0 %v326_v48  ;;  %v336_v53 = vcombine.high %v326_v48, %v326_v48  ;;  %v1964_v57 = vld [vmem:[%s2561_s1 + $0x188] sm:$0xff]   ;;  %v1968_v61 = vld [vmem:[%s2561_s1 + $0x190] sm:$0xff]   ;;  %v1971_v0 = vld [vmem:[%s2561_s1 + $0x118] sm:$0xff]  }
  0x11   :  { %1756 = vmatpush3.bf16.msra.mxu1 %v1939_v15  ;;  %1735 = vmatprep.subr.bf16.mxu0 %v1940_v16  ;;  %v1972_v1 = vld [vmem:[%s2561_s1 + $0x198] sm:$0xff]   ;;  %v1973_v2 = vld [vmem:[%s2561_s1 + $0x160] sm:$0xff]   ;;  %v1977_v6 = vld [vmem:[%s2561_s1 + $0x168] sm:$0xff]  }
  0x12   :  { %1757 = vmatprep.subr.bf16.mxu1 %v1941_v17  ;;  %v337_v56 = vcombine.high %v333_v50, %v333_v50  ;;  %1243 = vmatprep.mubr.bf16.mxu1 %v336_v53  ;;  %v1974_v3 = vld [vmem:[%s2561_s1 + $0x1e0] sm:$0xff]   ;;  %v1978_v7 = vld [vmem:[%s2561_s1 + $0x1e8] sm:$0xff]   ;;  %v1981_v10 = vld [vmem:[%s2561_s1 + $0x170] sm:$0xff]  }
  0x13   :  { %v1975_v4 = vld [vmem:[%s2561_s1 + $0x120] sm:$0xff]   ;;  %v1979_v8 = vld [vmem:[%s2561_s1 + $0x128] sm:$0xff]   ;;  %v1982_v11 = vld [vmem:[%s2561_s1 + $0x1f0] sm:$0xff]  }
  0x14   :  { %1736 = vmatpush3.bf16.msra.mxu0 %v1942_v18  ;;  %v1976_v5 = vld [vmem:[%s2561_s1 + $0x1a0] sm:$0xff]   ;;  %v1980_v9 = vld [vmem:[%s2561_s1 + $0x1a8] sm:$0xff]   ;;  %v1983_v12 = vld [vmem:[%s2561_s1 + $0x130] sm:$0xff]   ;;  %v319_v18 = vrot.slane %v2225_v43, %v2221_v41 }
  0x15   :  { %1758 = vmatpush3.bf16.msra.mxu1 %v1943_v19  ;;  %1737 = vmatprep.subr.bf16.mxu0 %v1944_v20  ;;  %v1984_v13 = vld [vmem:[%s2561_s1 + $0x1b0] sm:$0xff]   ;;  %v1985_v14 = vld [vmem:[%s2561_s1 + $0x178] sm:$0xff]   ;;  %v1989_v19 = vld [vmem:[%s2561_s1 + $0x240] sm:$0xff]  }
  0x16   :  { %1759 = vmatprep.subr.bf16.mxu1 %v1945_v21  ;;  %v1986_v15 = vld [vmem:[%s2561_s1 + $0x1f8] sm:$0xff]   ;;  %v1990_v20 = vld [vmem:[%s2561_s1 + $0x2c0] sm:$0xff]   ;;  %v1997_v28 = vld [vmem:[%s2561_s1 + $0x250] sm:$0xff]  }
  0x17   :  { %v1987_v16 = vld [vmem:[%s2561_s1 + $0x138] sm:$0xff]   ;;  %v1991_v21 = vld [vmem:[%s2561_s1 + $0x200] sm:$0xff]   ;;  %v2009_v40 = vld [vmem:[%s2561_s1 + $0x268] sm:$0xff]  }
  0x18   :  { %1738 = vmatpush3.bf16.msra.mxu0 %v1946_v22  ;;  %v1988_v17 = vld [vmem:[%s2561_s1 + $0x1b8] sm:$0xff]   ;;  %v1992_v22 = vld [vmem:[%s2561_s1 + $0x280] sm:$0xff]   ;;  %v2010_v42 = vld [vmem:[%s2561_s1 + $0x2e8] sm:$0xff]  }
  0x19   :  { %1760 = vmatpush3.bf16.msra.mxu1 %v1947_v23  ;;  %1739 = vmatprep.subr.bf16.mxu0 %v1948_v24  ;;  %v335_v23 = vcombine.high %v319_v18, %v319_v18  ;;  %v1993_v24 = vld [vmem:[%s2561_s1 + $0x248] sm:$0xff]   ;;  %v2002_v33 = vld [vmem:[%s2561_s1 + $0x2d8] sm:$0xff]   ;;  %v2005_v36 = vld [vmem:[%s2561_s1 + $0x260] sm:$0xff]  }
  0x1a   :  { %1761 = vmatprep.subr.bf16.mxu1 %v1949_v25  ;;  %v1994_v25 = vld [vmem:[%s2561_s1 + $0x2c8] sm:$0xff]   ;;  %v2003_v34 = vld [vmem:[%s2561_s1 + $0x218] sm:$0xff]   ;;  %v2006_v37 = vld [vmem:[%s2561_s1 + $0x2e0] sm:$0xff]  }
  0x1b   :  { %v2008_v39 = vld [vmem:[%s2561_s1 + $0x2a0] sm:$0xff]   ;;  %v2011_v43 = vld [vmem:[%s2561_s1 + $0x228] sm:$0xff]  }
  0x1c   :  { %1740 = vmatpush3.bf16.msra.mxu0 %v1950_v26  ;;  %v1995_v26 = vld [vmem:[%s2561_s1 + $0x208] sm:$0xff]  }
  0x1d   :  { %1762 = vmatpush3.bf16.msra.mxu1 %v1951_v27  ;;  %1741 = vmatprep.subr.bf16.mxu0 %v1952_v29  ;;  %v1996_v27 = vld [vmem:[%s2561_s1 + $0x288] sm:$0xff]   ;;  %v1998_v29 = vld [vmem:[%s2561_s1 + $0x2d0] sm:$0xff]  }
  0x1e   :  { %1763 = vmatprep.subr.bf16.mxu1 %v1953_v30  ;;  %v1999_v30 = vld [vmem:[%s2561_s1 + $0x210] sm:$0xff]   ;;  %v2012_v44 = vld [vmem:[%s2561_s1 + $0x2a8] sm:$0xff]  }
  0x1f   :  { %v23_v46 = vld [vmem:[%s2560_s0 + $0x8] sm:$0xff] }
  0x20   :  { %1742 = vmatpush3.bf16.msra.mxu0 %v1954_v31  ;;  %v2000_v31 = vld [vmem:[%s2561_s1 + $0x290] sm:$0xff]   ;;  %v345_v48 = vrot.slane %v23_v46, %v2221_v41 }
  0x21   :  { %1764 = vmatpush3.bf16.msra.mxu1 %v1955_v32  ;;  %1771 = vmatprep.subr.bf16.mxu0 %v1957_v35  ;;  %v2001_v32 = vld [vmem:[%s2561_s1 + $0x258] sm:$0xff]  }
  0x22   :  { %1793 = vmatprep.subr.bf16.mxu1 %v1958_v38  ;;  %v2004_v35 = vld [vmem:[%s2561_s1 + $0x298] sm:$0xff]   ;;  %v2007_v38 = vld [vmem:[%s2561_s1 + $0x220] sm:$0xff]  }
  0x23   :  { %1204 = vmatmul.mubr.bf16.vlgmr.msra.gmra.mrb[0].mxu0 %v312_v45  ;;  %v2013_v45 = vld [vmem:[%s2561_s1 + $0x270] sm:$0xff]  }
  0x24   :  { %1772 = vmatpush3.bf16.msra.mxu0 %v1959_v47  ;;  %1244 = vmatmul.mubr.bf16.vlgmr.msra.gmra.mrb[0].mxu1 %v334_v51  ;;  %v2014_v47 = vld [vmem:[%s2561_s1 + $0x2f0] sm:$0xff]  }
  0x25   :  { %1773 = vmatprep.subr.bf16.mxu0 %v1961_v52  ;;  %1794 = vmatpush3.bf16.msra.mxu1 %v1960_v49  ;;  %v338_v49 = vcombine.high %v23_v46, %v23_v46  ;;  %v2016_v51 = vld [vmem:[%s2561_s1 + $0x2b0] sm:$0xff]   ;;  %v353_v52 = vcombine.high %v345_v48, %v345_v48 }
  0x26   :  { %1283 = vmatprep.mubr.bf16.mxu0 %v333_v50  ;;  %1795 = vmatprep.subr.bf16.mxu1 %v1962_v54  ;;  %v2015_v50 = vld [vmem:[%s2561_s1 + $0x230] sm:$0xff]   ;;  %v2017_v54 = vld [vmem:[%s2561_s1 + $0x278] sm:$0xff]  }
  0x27   :  { %1323 = vmatprep.mubr.bf16.mxu1 %v337_v56  ;;  %v2413_v53 = vrot.slane %v338_v49, %v2221_v41  ;;  %v375_v56 = vrot.slane %v353_v52, %v2221_v41 }
  0x28   :  { %1774 = vmatpush3.bf16.msra.mxu0 %v1963_v55  ;;  %v2018_v55 = vld [vmem:[%s2561_s1 + $0x2f8] sm:$0xff]  }
  0x29   :  { %1775 = vmatprep.subr.bf16.mxu0 %v1965_v58  ;;  %1796 = vmatpush3.bf16.msra.mxu1 %v1964_v57  ;;  %v354_v57 = vcombine.high %v2413_v53, %v2413_v53  ;;  %v2019_v58 = vld [vmem:[%s2561_s1 + $0x238] sm:$0xff]  }
  0x2a   :  { %1797 = vmatprep.subr.bf16.mxu1 %v1966_v59  ;;  %v2020_v59 = vld [vmem:[%s2561_s1 + $0x2b8] sm:$0xff]  }
  0x2c   :  { %1776 = vmatpush3.bf16.msra.mxu0 %v1967_v60  ;;  %v385_v60 = vcombine.high %v375_v56, %v375_v56 }
  0x2d   :  { %1777 = vmatprep.subr.bf16.mxu0 %v1969_v62  ;;  %1798 = vmatpush3.bf16.msra.mxu1 %v1968_v61  ;;  %v361_v61 = vrot.slane %v345_v48, %v2221_v41  ;;  %v2021_v62 = vld [vmem:[%s2561_s1 + $0x340] sm:$0xff]  }
  0x2e   :  { %1799 = vmatprep.subr.bf16.mxu1 %v1970_v63  ;;  %v2022_v63 = vld [vmem:[%s2561_s1 + $0x3c0] sm:$0xff]  }
  0x30   :  { %1778 = vmatpush3.bf16.msra.mxu0 %v1971_v0  ;;  %v382_v0 = vrot.slane %v354_v57, %v2221_v41 }
  0x31   :  { %1779 = vmatprep.subr.bf16.mxu0 %v1973_v2  ;;  %1800 = vmatpush3.bf16.msra.mxu1 %v1972_v1  ;;  %v2023_v1 = vld [vmem:[%s2561_s1 + $0x300] sm:$0xff]  }
  0x32   :  { %1801 = vmatprep.subr.bf16.mxu1 %v1974_v3  ;;  %v2024_v2 = vld [vmem:[%s2561_s1 + $0x380] sm:$0xff]   ;;  %v383_v3 = vcombine.high %v361_v61, %v361_v61 }
  0x34   :  { %1780 = vmatpush3.bf16.msra.mxu0 %v1975_v4  ;;  %v2025_v4 = vld [vmem:[%s2561_s1 + $0x348] sm:$0xff]  }
  0x35   :  { %1781 = vmatprep.subr.bf16.mxu0 %v1977_v6  ;;  %1802 = vmatpush3.bf16.msra.mxu1 %v1976_v5  ;;  %v2026_v5 = vld [vmem:[%s2561_s1 + $0x3c8] sm:$0xff]   ;;  %v386_v6 = vcombine.high %v382_v0, %v382_v0 }
  0x36   :  { %1803 = vmatprep.subr.bf16.mxu1 %v1978_v7  ;;  %v2027_v7 = vld [vmem:[%s2561_s1 + $0x308] sm:$0xff]  }
  0x38   :  { %1782 = vmatpush3.bf16.msra.mxu0 %v1979_v8  ;;  %v2028_v8 = vld [vmem:[%s2561_s1 + $0x388] sm:$0xff]  }
  0x39   :  { %1783 = vmatprep.subr.bf16.mxu0 %v1981_v10  ;;  %1804 = vmatpush3.bf16.msra.mxu1 %v1980_v9  ;;  %v2029_v9 = vld [vmem:[%s2561_s1 + $0x350] sm:$0xff]  }
  0x3a   :  { %1805 = vmatprep.subr.bf16.mxu1 %v1982_v11  ;;  %v2030_v10 = vld [vmem:[%s2561_s1 + $0x3d0] sm:$0xff]  }
  0x3b   :  { %v2031_v11 = vld [vmem:[%s2561_s1 + $0x310] sm:$0xff]  }
  0x3c   :  { %1784 = vmatpush3.bf16.msra.mxu0 %v1983_v12  ;;  %v2032_v12 = vld [vmem:[%s2561_s1 + $0x390] sm:$0xff]  }
  0x3d   :  { %1785 = vmatprep.subr.bf16.mxu0 %v1985_v14  ;;  %1806 = vmatpush3.bf16.msra.mxu1 %v1984_v13  ;;  %v2033_v13 = vld [vmem:[%s2561_s1 + $0x358] sm:$0xff]  }
  0x3e   :  { %1807 = vmatprep.subr.bf16.mxu1 %v1986_v15  ;;  %v2034_v14 = vld [vmem:[%s2561_s1 + $0x3d8] sm:$0xff]  }
  0x3f   :  { %v2035_v15 = vld [vmem:[%s2561_s1 + $0x318] sm:$0xff]  }
  0x40   :  { %1786 = vmatpush3.bf16.msra.mxu0 %v1987_v16  ;;  %v2036_v16 = vld [vmem:[%s2561_s1 + $0x398] sm:$0xff]  }
  0x41   :  { %1815 = vmatprep.subr.bf16.mxu0 %v1989_v19  ;;  %1808 = vmatpush3.bf16.msra.mxu1 %v1988_v17  ;;  %v2037_v17 = vld [vmem:[%s2561_s1 + $0x360] sm:$0xff]  }
  0x42   :  { %1837 = vmatprep.subr.bf16.mxu1 %v1990_v20  ;;  %v2039_v19 = vld [vmem:[%s2561_s1 + $0x320] sm:$0xff]  }
  0x43   :  { %1284 = vmatmul.mubr.bf16.vlgmr.msra.gmra.mrb[4].mxu0 %v319_v18  ;;  %v2038_v18 = vld [vmem:[%s2561_s1 + $0x3e0] sm:$0xff]  }
  0x44   :  { %1816 = vmatpush3.bf16.msra.mxu0 %v1991_v21  ;;  %1324 = vmatmul.mubr.bf16.vlgmr.msra.gmra.mrb[4].mxu1 %v335_v23  ;;  %v2040_v20 = vld [vmem:[%s2561_s1 + $0x3a0] sm:$0xff]   ;;  %v2041_v21 = vld [vmem:[%s2561_s1 + $0x368] sm:$0xff]  }
  0x45   :  { %1817 = vmatprep.subr.bf16.mxu0 %v1993_v24  ;;  %1838 = vmatpush3.bf16.msra.mxu1 %v1992_v22  ;;  %v2042_v22 = vld [vmem:[%s2561_s1 + $0x3e8] sm:$0xff]  }
  0x46   :  { %1839 = vmatprep.subr.bf16.mxu1 %v1994_v25  ;;  %1363 = vmatprep.mubr.bf16.mxu0 %v375_v56  ;;  %v2043_v23 = vld [vmem:[%s2561_s1 + $0x328] sm:$0xff]   ;;  %v2045_v25 = vld [vmem:[%s2561_s1 + $0x370] sm:$0xff]  }
  0x47   :  { %1403 = vmatprep.mubr.bf16.mxu1 %v385_v60  ;;  %v2044_v24 = vld [vmem:[%s2561_s1 + $0x3a8] sm:$0xff]  }
  0x48   :  { %1818 = vmatpush3.bf16.msra.mxu0 %v1995_v26  ;;  %v2046_v26 = vld [vmem:[%s2561_s1 + $0x3f0] sm:$0xff]  }
  0x49   :  { %1819 = vmatprep.subr.bf16.mxu0 %v1997_v28  ;;  %1840 = vmatpush3.bf16.msra.mxu1 %v1996_v27  ;;  %v2047_v27 = vld [vmem:[%s2561_s1 + $0x330] sm:$0xff]  }
  0x4a   :  { %1841 = vmatprep.subr.bf16.mxu1 %v1998_v29 }
  0x4c   :  { %1820 = vmatpush3.bf16.msra.mxu0 %v1999_v30 }
  0x4d   :  { %1821 = vmatprep.subr.bf16.mxu0 %v2001_v32  ;;  %1842 = vmatpush3.bf16.msra.mxu1 %v2000_v31 }
  0x4e   :  { %1843 = vmatprep.subr.bf16.mxu1 %v2002_v33 }
  0x50   :  { %1822 = vmatpush3.bf16.msra.mxu0 %v2003_v34 }
  0x51   :  { %1823 = vmatprep.subr.bf16.mxu0 %v2005_v36  ;;  %1844 = vmatpush3.bf16.msra.mxu1 %v2004_v35 }
  0x52   :  { %1845 = vmatprep.subr.bf16.mxu1 %v2006_v37 }
  0x54   :  { %1824 = vmatpush3.bf16.msra.mxu0 %v2007_v38 }
  0x55   :  { %1825 = vmatprep.subr.bf16.mxu0 %v2009_v40  ;;  %1846 = vmatpush3.bf16.msra.mxu1 %v2008_v39 }
  0x56   :  { %1847 = vmatprep.subr.bf16.mxu1 %v2010_v42 }
  0x58   :  { %1826 = vmatpush3.bf16.msra.mxu0 %v2011_v43 }
  0x59   :  { %1827 = vmatprep.subr.bf16.mxu0 %v2013_v45  ;;  %1848 = vmatpush3.bf16.msra.mxu1 %v2012_v44 }
  0x5a   :  { %1849 = vmatprep.subr.bf16.mxu1 %v2014_v47 }
  0x5c   :  { %1828 = vmatpush3.bf16.msra.mxu0 %v2015_v50 }
  0x5d   :  { %1829 = vmatprep.subr.bf16.mxu0 %v2017_v54  ;;  %1850 = vmatpush3.bf16.msra.mxu1 %v2016_v51 }
  0x5e   :  { %1851 = vmatprep.subr.bf16.mxu1 %v2018_v55 }
  0x60   :  { %1830 = vmatpush3.bf16.msra.mxu0 %v2019_v58 }
  0x61   :  { %1859 = vmatprep.subr.bf16.mxu0 %v2021_v62  ;;  %1852 = vmatpush3.bf16.msra.mxu1 %v2020_v59 }
  0x62   :  { %1881 = vmatprep.subr.bf16.mxu1 %v2022_v63 }
  0x63   :  { %1364 = vmatmul.mubr.bf16.vlgmr.msra.gmra.mrb[8].mxu0 %v361_v61 }
  0x64   :  { %1860 = vmatpush3.bf16.msra.mxu0 %v2023_v1  ;;  %1443 = vmatprep.mubr.bf16.mxu0 %v382_v0 }
  0x65   :  { %1404 = vmatmul.mubr.bf16.vlgmr.msra.gmra.mrb[8].mxu1 %v383_v3  ;;  %1861 = vmatprep.subr.bf16.mxu0 %v2025_v4 }
  0x66   :  { %1882 = vmatpush3.bf16.msra.mxu1 %v2024_v2  ;;  %1483 = vmatprep.mubr.bf16.mxu1 %v386_v6 }
  0x67   :  { %1883 = vmatprep.subr.bf16.mxu1 %v2026_v5 }
  0x68   :  { %1862 = vmatpush3.bf16.msra.mxu0 %v2027_v7 }
  0x69   :  { %1863 = vmatprep.subr.bf16.mxu0 %v2029_v9 }
  0x6a   :  { %1884 = vmatpush3.bf16.msra.mxu1 %v2028_v8 }
  0x6b   :  { %1885 = vmatprep.subr.bf16.mxu1 %v2030_v10 }
  0x6c   :  { %1864 = vmatpush3.bf16.msra.mxu0 %v2031_v11 }
  0x6d   :  { %1865 = vmatprep.subr.bf16.mxu0 %v2033_v13 }
  0x6e   :  { %1886 = vmatpush3.bf16.msra.mxu1 %v2032_v12 }
  0x6f   :  { %1887 = vmatprep.subr.bf16.mxu1 %v2034_v14 }
  0x70   :  { %1866 = vmatpush3.bf16.msra.mxu0 %v2035_v15 }
  0x71   :  { %1867 = vmatprep.subr.bf16.mxu0 %v2037_v17 }
  0x72   :  { %1888 = vmatpush3.bf16.msra.mxu1 %v2036_v16 }
  0x73   :  { %1889 = vmatprep.subr.bf16.mxu1 %v2038_v18 }
  0x74   :  { %1868 = vmatpush3.bf16.msra.mxu0 %v2039_v19 }
  0x75   :  { %1869 = vmatprep.subr.bf16.mxu0 %v2041_v21 }
  0x76   :  { %1890 = vmatpush3.bf16.msra.mxu1 %v2040_v20 }
  0x77   :  { %1891 = vmatprep.subr.bf16.mxu1 %v2042_v22 }
  0x78   :  { %1870 = vmatpush3.bf16.msra.mxu0 %v2043_v23 }
  0x79   :  { %10 = vsyncpa [#allocation3], 0  ;;  %1871 = vmatprep.subr.bf16.mxu0 %v2045_v25  ;;  %v2049_v28 = vld [vmem:[%s2561_s1 + $0x378] sm:$0xff]   ;;  %v2048_v29 = vld [vmem:[%s2561_s1 + $0x3b0] sm:$0xff]   ;;  %v368_v32 = vrot.slane %v2413_v53, %v2221_v41  ;;  %v2083_v36 = vmov 0.0   ;;  %vm2084_vm0 = vmmov 0  }
  0x7a   :  { %1892 = vmatpush3.bf16.msra.mxu1 %v2044_v24  ;;  %v2050_v30 = vld [vmem:[%s2561_s1 + $0x3f8] sm:$0xff]   ;;  %v2054_v35 = vld [vmem:[%s2563_s3] sm:$0xff]   ;;  %v2055_v41 = vld [vmem:[%s2563_s3 + $0x8] sm:$0xff]   ;;  %vm1532_vm1 = vcmask 523264   ;;  %s2085_s8 = smov [#allocation2]   ;;  %vm1576_vm2 = vcmask 9216  }
  0x7b   :  { %1893 = vmatprep.subr.bf16.mxu1 %v2046_v26  ;;  %v2051_v31 = vld [vmem:[%s2561_s1 + $0x338] sm:$0xff]   ;;  %v384_v34 = vcombine.high %v368_v32, %v368_v32  ;;  %v2056_v37 = vld [vmem:[%s2563_s3 + $0x10] sm:$0xff]   ;;  %v1592_v40 = vld [vmem:[%s2562_s2] ss:$0 sm:$0xff]  ;;  %s1584_s9 = sshll.u32 %s2085_s8, 4  ;;  %s1585_s9 = int_to_ptr.vmem [resolvable:$true] %s1584_s9 }
  0x7c   :  { %1872 = vmatpush3.bf16.msra.mxu0 %v2047_v27  ;;  %v2052_v33 = vld [vmem:[%s2561_s1 + $0x3b8] sm:$0xff]   ;;  %v1721_v27 = vld [vmem:[%s2564_s4] ss:$0 sm:$0xff]  ;;  %s2058_s10 = scalar_lea.vmem %s1585_s9, 32  ;;  %p2063_p1 = scmp.lt.s32.totalorder %s1585_s9, %s1585_s9 }
  0x7d   :  { %1873 = vmatprep.subr.bf16.mxu0 %v2049_v28  ;;  %v2057_v38 = vld [vmem:[%s2563_s3 + $0x18] sm:$0xff]   ;;  %p2059_p0 = scmp.ne.s32.totalorder %s1585_s9, %s2058_s10  ;;  %p2064_p2 = scmp.lt.s32.totalorder %s2058_s10, %s2058_s10 }
  0x7e   :  { %1894 = vmatpush3.bf16.msra.mxu1 %v2048_v29 }
  0x7f   :  { %1895 = vmatprep.subr.bf16.mxu1 %v2050_v30  ;;  %p2065_p3 = por %p2064_p2, %p2063_p1 }
  0x80   :  { %1874 = vmatpush3.bf16.msra.mxu0 %v2051_v31 }
  0x81   :  { %1908 = vmatprep.subr.bf16.mxu0 %v2083_v36  ;;  %p2066_p4 = pnand %p2065_p3, %p2059_p0 }
  0x82   :  { %1896 = vmatpush3.bf16.msra.mxu1 %v2052_v33 }
  0x83   :  { %1444 = vmatmul.mubr.bf16.vlgmr.msra.gmra.mrb[12].mxu0 %v368_v32 }
  0x84   :  { %1909 = vmatpush3.bf16.msra.mxu0 %v2054_v35  ;;  %1916 = vmatprep.mubr.msk.bf16.mxu0 %vm2084_vm0, %v2083_v36 }
  0x85   :  { %1484 = vmatmul.mubr.bf16.vlgmr.msra.gmra.mrb[12].mxu1 %v384_v34  ;;  %1910 = vmatprep.subr.bf16.mxu0 %v2083_v36 }
  0x88   :  { %1911 = vmatpush3.bf16.msra.mxu0 %v2055_v41 }
  0x89   :  { %1912 = vmatprep.subr.bf16.mxu0 %v2083_v36 }
  0x8c   :  { %1913 = vmatpush3.bf16.msra.mxu0 %v2056_v37 }
  0x8d   :  { %1914 = vmatprep.subr.bf16.mxu0 %v2083_v36 }
  0x90   :  { %1915 = vmatpush3.bf16.msra.mxu0 %v2057_v38 }
  0xf6   :  { %v1743_v39 = vpop.f32.mrb[0].mxu0 }
  0xf7   :  { %v1744_v42 = vpop.f32.mrb[1].mxu0  ;;  %v1765_v43 = vpop.f32.mrb[0].mxu1 }
  0xf8   :  { %v1745_v44 = vadd.f32 %v1744_v42, %v1743_v39  ;;  %v1746_v45 = vpop.f32.mrb[2].mxu0  ;;  %v1766_v46 = vpop.f32.mrb[1].mxu1 }
  0xf9   :  { %v1747_v47 = vpop.f32.mrb[3].mxu0  ;;  %v1767_v49 = vadd.f32 %v1766_v46, %v1765_v43  ;;  %v1768_v50 = vpop.f32.mrb[2].mxu1 }
  0xfa   :  { %v1206_v48 = vadd.f32 %v1745_v44, %v1592_v40  ;;  %v1769_v51 = vpop.f32.mrb[3].mxu1 }
  0xfc   :  { %v1246_v52 = vadd.f32 %v1767_v49, %v1206_v48 }
 0x116   :  { %v1787_v53 = vpop.f32.mrb[4].mxu0 }
 0x117   :  { %v1788_v54 = vpop.f32.mrb[5].mxu0  ;;  %v1809_v55 = vpop.f32.mrb[4].mxu1 }
 0x118   :  { %v1789_v56 = vadd.f32 %v1788_v54, %v1787_v53  ;;  %v1790_v57 = vpop.f32.mrb[6].mxu0  ;;  %v1810_v58 = vpop.f32.mrb[5].mxu1 }
 0x119   :  { %v1791_v59 = vpop.f32.mrb[7].mxu0  ;;  %v1811_v61 = vadd.f32 %v1810_v58, %v1809_v55  ;;  %v1812_v62 = vpop.f32.mrb[6].mxu1 }
 0x11a   :  { %v1286_v60 = vadd.f32 %v1789_v56, %v1246_v52  ;;  %v1813_v63 = vpop.f32.mrb[7].mxu1 }
 0x11c   :  { %v1326_v0 = vadd.f32 %v1811_v61, %v1286_v60 }
 0x136   :  { %v1831_v1 = vpop.f32.mrb[8].mxu0 }
 0x137   :  { %v1832_v2 = vpop.f32.mrb[9].mxu0 }
 0x138   :  { %v1853_v3 = vpop.f32.mrb[8].mxu1  ;;  %v1833_v4 = vadd.f32 %v1832_v2, %v1831_v1  ;;  %v1834_v5 = vpop.f32.mrb[10].mxu0 }
 0x139   :  { %v1854_v6 = vpop.f32.mrb[9].mxu1  ;;  %v1835_v7 = vpop.f32.mrb[11].mxu0 }
 0x13a   :  { %v1366_v8 = vadd.f32 %v1833_v4, %v1326_v0  ;;  %v1855_v9 = vadd.f32 %v1854_v6, %v1853_v3  ;;  %v1856_v10 = vpop.f32.mrb[10].mxu1 }
 0x13b   :  { %v1857_v11 = vpop.f32.mrb[11].mxu1 }
 0x13c   :  { %v1406_v12 = vadd.f32 %v1855_v9, %v1366_v8 }
 0x156   :  { %v1875_v13 = vpop.f32.mrb[12].mxu0 }
 0x157   :  { %v1876_v14 = vpop.f32.mrb[13].mxu0 }
 0x158   :  { %v1897_v15 = vpop.f32.mrb[12].mxu1  ;;  %v1877_v16 = vadd.f32 %v1876_v14, %v1875_v13  ;;  %v1878_v17 = vpop.f32.mrb[14].mxu0 }
 0x159   :  { %v1898_v18 = vpop.f32.mrb[13].mxu1  ;;  %v1879_v19 = vpop.f32.mrb[15].mxu0 }
 0x15a   :  { %v1446_v20 = vadd.f32 %v1877_v16, %v1406_v12  ;;  %v1899_v21 = vadd.f32 %v1898_v18, %v1897_v15  ;;  %v1900_v22 = vpop.f32.mrb[14].mxu1 }
 0x15b   :  { %v1901_v23 = vpop.f32.mrb[15].mxu1 }
 0x15c   :  { %v1486_v24 = vadd.f32 %v1899_v21, %v1446_v20 }
 0x15e   :  { %v1491_v25 = vmax.f32 %v1486_v24, 0.0 }
 0x160   :  { %v1492_v26 = vpack.c.bf16 %v1491_v25, %v1491_v25 }
 0x162   :  { %1917 = vmatmul.mubr.msk.bf16.vlgmr.msra.gmra.mrb[16].mxu0 %vm1532_vm1, %v1492_v26 }
 0x235   :  { %v1570_v28 = vpop.f32.mrb[16].mxu0 }
 0x236   :  { %v1571_v29 = vadd.f32 %v1721_v27, %v1570_v28  ;;  %v1918_v30 = vpop.f32.mrb[17].mxu0 }
 0x237   :  { %v1573_v31 = vpop.f32.mrb[18].mxu0 }
 0x238   :  { %v1919_v32 = vpop.f32.mrb[19].mxu0  ;;  %1577 = vst.msk [vmem:[#allocation2] sm:$0x3] %vm1576_vm2, %v1571_v29 }
 0x239   :  { %2069 = shalt.err (!%p2066_p4)
}
 0x23a   :  { %s2070_s4 = scalar_lea.hbm %s2565_s5, 32 }
 0x23b   :  { %p2071_p5 = scmp.ne.s32.totalorder %s2565_s5, %s2070_s4  ;;  %p2074_p6 = scmp.lt.u32.totalorder %s2070_s4, %s2565_s5 }
 0x23d   :  { %p2076_p7 = pnand %p2074_p6, %p2071_p5 }
 0x23f   :  { %2079 = shalt.err (!%p2076_p7)
}
 0x240   :  { %1587 = dma.vmem_to_hbm [thread:$0]  %s1585_s9, 32, %s2565_s5, [#allocation3]  }
 0x241   :  { %2080 = dma.done.wait [#allocation3], 32  }
 0x242   :  { %2081 = vsyncadd [#allocation3], 4294967264 }
 0x243   :  { %1591 = vsyncpa [#allocation3], 1 }

</bundles_post_ra>
